<compile_context>
chip_gen: v7x
topology: tpu7x:2x2x1
jax: 0.10.0
libtpu: 0.0.40
codegen_flags: <defaults>
</compile_context>

<pallas_src>
import jax
import jax.numpy as jnp
import numpy as np
from jax import lax
from jax.experimental import pallas as pl
from jax.experimental.pallas import tpu as pltpu

# EEGNet hyper-parameters (module defaults; data sizes scaled down in main).
F1 = 8            # temporal filters
D = 2             # depth multiplier
F2 = 16           # separable filters
K1, P1 = 64, 32   # conv1 temporal kernel / padding
K2, P2 = 16, 8    # conv2 temporal kernel / padding
POOL1, POOL2 = 4, 8
BN_EPS = 1e-5


def _elu(x):
    # exp(min(x, 0)) avoids overflowing exp() on the (discarded) positive branch.
    return jnp.where(x > 0, x, jnp.exp(jnp.minimum(x, 0.0)) - 1.0)


def _round_up(n, m):
    return (n + m - 1) // m * m


# ----------------------------- Pallas kernel ---------------------------------
def eegnet_kernel(x_ref, band1_ref, b1_ref, wdbig_ref, b2_ref, comb_ref,
                  b3_ref, tail_ref, bc_ref, out_ref):
    bt = out_ref.shape[0]                 # batch tile
    t1p = band1_ref.shape[1] // F1        # lane-padded conv1 output length
    n3 = comb_ref.shape[2]                # F2 * t3

    # ---- conv1 (+BN1 scale, + zero padding) as one band matmul -------------
    h1 = jnp.dot(x_ref[...], band1_ref[...],
                 preferred_element_type=jnp.float32)
    h1 = _elu(h1 + b1_ref[...])                                # (bt*C, F1*t1p)
    h1b = h1.astype(band1_ref.dtype)                           # bf16 for MXU

    # ---- depthwise conv + pool4 + conv2, fully unrolled per filter group ---
    h3 = jnp.zeros((bt, n3), jnp.float32)
    for g in range(F1):                    # static unroll (F1 = 8)
        # 128-aligned lane-tile view of this group's conv1 output.
        h1g = h1b[:, g * t1p:(g + 1) * t1p]                    # (bt*C, t1p)
        # Block-diagonal-over-batch depthwise weights (BN2 scale folded in);
        # bias + ELU only on the kept (D*bt, t1p) block.
        h2g = jnp.dot(wdbig_ref[g], h1g,
                      preferred_element_type=jnp.float32)
        h2g = _elu(h2g + b2_ref[g])                            # (D*bt, t1p)
        for d in range(D):                 # static unroll (D = 2)
            # Sublane-aligned row slice (multiple of bt); pool4 and conv2
            # (+BN3 scale) are folded into comb[g*D+d] host-side.
            lhs = h2g[d * bt:(d + 1) * bt, :].astype(comb_ref.dtype)
            h3 = h3 + jnp.dot(lhs, comb_ref[g * D + d],
                              preferred_element_type=jnp.float32)

    h3 = _elu(h3 + b3_ref[...])                                # (bt, F2*t3)

    # ---- avg_pool(1,8) + flatten + classifier folded into one matmul -------
    out_ref[...] = (jnp.dot(h3.astype(tail_ref.dtype), tail_ref[...],
                            preferred_element_type=jnp.float32)
                    + bc_ref[...])                             # (bt, 128)


# -------------------- host-side constant-matrix construction -----------------
def _build_operands(params, C, T, bt, ncp):
    (w1, s1, b1, wd, s2, b2, w2, s3, b3, wc, bc) = params
    NC = bc.shape[0]
    FD = F1 * D
    t1 = T + 2 * P1 - K1 + 1
    t1p = _round_up(t1, 128)          # lane-align per-filter column blocks
    t2 = t1 // POOL1
    t2p = t2 + 2 * P2
    t3 = t2p - K2 + 1
    t4 = t3 // POOL2
    f32 = jnp.float32
    bf16 = jnp.bfloat16
    hp = lax.Precision.HIGHEST

    # conv1 band matrix (T, F1*t1p): taps + zero padding + BN1 scale folded in.
    # Columns t1..t1p-1 of each filter block are zero (lane padding).
    w1s = (w1 * s1[:, None]).astype(f32)                      # (F1, K1)
    tt = jnp.arange(T)[:, None]
    jj = jnp.arange(t1p)[None, :]
    k1 = tt - jj + P1
    band1 = jnp.where((k1 >= 0) & (k1 < K1) & (jj < t1),
                      w1s[:, jnp.clip(k1, 0, K1 - 1)], 0.0)    # (F1, T, t1p)
    band1 = band1.transpose(1, 0, 2).reshape(T, F1 * t1p)
    b1row = jnp.where(jnp.arange(t1p)[None, :] < t1,
                      b1.astype(f32)[:, None], 0.0).reshape(1, F1 * t1p)

    # Depthwise weights per group: block-diagonal over the batch tile with the
    # BN2 scale folded in.  wdbig[g, d*bt+b, b'*C+c] = wd_s[g*D+d, c]*(b==b').
    wd_s = (wd * s2[:, None]).astype(f32).reshape(F1, D, C)
    eye_b = jnp.eye(bt, dtype=f32)
    wdbig = (wd_s[:, :, None, None, :] * eye_b[None, None, :, :, None]
             ).reshape(F1, D * bt, bt * C)
    b2col = jnp.repeat(b2.astype(f32).reshape(F1, D), bt, axis=1
                       ).reshape(F1, D * bt, 1)

    # avg-pool(1,4) matrix with conv2's zero padding folded in: (t1p, t2p).
    jj2 = jnp.arange(t1p)[:, None]
    uu = jnp.arange(t2p)[None, :]
    vv = uu - P2
    pool4 = (((vv >= 0) & (vv < t2) &
              (jj2 >= vv * POOL1) & (jj2 < (vv + 1) * POOL1))
             .astype(f32) / POOL1)                             # (t1p, t2p)

    # conv2 band matrix per input channel (FD, t2p, F2*t3), BN3 scale folded.
    w2s = (w2 * s3[:, None, None]).astype(f32)                 # (F2, FD, K2)
    uu2 = jnp.arange(t2p)[:, None]
    tt3 = jnp.arange(t3)[None, :]
    k2 = uu2 - tt3
    band2 = jnp.where((k2 >= 0) & (k2 < K2),
                      w2s[:, :, jnp.clip(k2, 0, K2 - 1)], 0.0)  # (F2, FD, t2p, t3)
    band2 = band2.transpose(1, 2, 0, 3).reshape(FD, t2p, F2 * t3)
    # Fold the pool into conv2: comb[fd] = pool4 @ band2[fd] -> (t1p, F2*t3).
    comb = jnp.einsum("ju,aun->ajn", pool4, band2, precision=hp)
    b3row = jnp.repeat(b3.astype(f32), t3).reshape(1, F2 * t3)

    # avg-pool(1,8) + flatten (torch order) + classifier, lane-padded to ncp.
    wc3 = wc.astype(f32).reshape(NC, F2, t4)
    tt4 = jnp.arange(t3)
    tail = jnp.where((tt4 < t4 * POOL2)[None, None],
                     wc3[:, :, jnp.clip(tt4 // POOL2, 0, t4 - 1)], 0.0) / POOL2
    tail = tail.transpose(1, 2, 0).reshape(F2 * t3, NC)
    tail = jnp.pad(tail, ((0, 0), (0, ncp - NC)))              # (F2*t3, ncp)
    bcrow = jnp.pad(bc.astype(f32), (0, ncp - NC)).reshape(1, ncp)

    # bf16 matrices for the MXU (f32 accumulation in-kernel); biases stay f32.
    return (band1.astype(bf16), b1row, wdbig.astype(bf16), b2col,
            comb.astype(bf16), b3row, tail.astype(bf16), bcrow)


def eegnet_forward(x, params, *, batch_tile=32):
    """x: (B, n_channels, n_samples) float32 -> (B, n_classes) logits."""
    B, C, T = x.shape
    NC = params[-1].shape[0]
    NCp = _round_up(NC, 128)          # lane-dense output (sliced on the host)

    # Batch tiling: `bt` examples per grid step (multiple of 8 sublanes).
    # (v5e: batch_tile=16 so bt*C == 128 fills one MXU pass; v6e/v7x: 32+.)
    bt = _round_up(min(batch_tile, _round_up(B, 8)), 8)
    B_pad = _round_up(B, bt)
    # v7x has 2 TensorCores: prefer >= 2 grid steps when the batch allows it.
    if B_pad // bt < 2 and B_pad >= 16:
        bt = _round_up(B_pad // 2, 8)
        B_pad = _round_up(B, bt)

    xin = x.astype(jnp.bfloat16)
    if B_pad != B:
        xin = jnp.pad(xin, ((0, B_pad - B), (0, 0), (0, 0)))
    xin = xin.reshape(B_pad * C, T)   # rows ordered (batch, channel)

    ops = _build_operands(params, C, T, bt, NCp)

    def const_spec(a):
        # Constant operands: same block every grid step (re-DMA is skipped).
        # TODO(synk): on v7x, pipeline_mode=pl.Buffered(1) would halve their
        #             VMEM footprint; irrelevant at these sizes.
        return pl.BlockSpec(a.shape, lambda i, _n=a.ndim: (0,) * _n)

    grid_spec = pltpu.PrefetchScalarGridSpec(
        num_scalar_prefetch=0,
        grid=(B_pad // bt,),
        in_specs=[pl.BlockSpec((bt * C, T), lambda i: (i, 0))] +
                 [const_spec(a) for a in ops],
        out_specs=pl.BlockSpec((bt, NCp), lambda i: (i, 0)),
    )
    out = pl.pallas_call(
        eegnet_kernel,
        out_shape=jax.ShapeDtypeStruct((B_pad, NCp), jnp.float32),
        grid_spec=grid_spec,
        compiler_params=pltpu.CompilerParams(
            dimension_semantics=("parallel",)),   # v7x megacore shards batch tiles
    )(xin, *ops)
    return out[:B, :NC]


# ------------------------- pure-JAX reference --------------------------------
def eegnet_reference(x, raw):
    (w1, g1, be1, m1, v1, wd, g2, be2, m2, v2, w2, g3, be3, m3, v3, wc, bc) = raw
    hp = lax.Precision.HIGHEST

    def bn(y, g, be, m, v):
        inv = g / jnp.sqrt(v + BN_EPS)
        return (y - m[None, :, None, None]) * inv[None, :, None, None] \
            + be[None, :, None, None]

    B, C, T = x.shape
    y = x[:, None, :, :]                                       # (B,1,C,T)
    y = lax.conv_general_dilated(y, w1.reshape(F1, 1, 1, K1), (1, 1),
                                 [(0, 0), (P1, P1)],
                                 dimension_numbers=("NCHW", "OIHW", "NCHW"),
                                 precision=hp)
    y = _elu(bn(y, g1, be1, m1, v1))
    y = lax.conv_general_dilated(y, wd.reshape(F1 * D, 1, C, 1), (1, 1),
                                 [(0, 0), (0, 0)],
                                 dimension_numbers=("NCHW", "OIHW", "NCHW"),
                                 feature_group_count=F1, precision=hp)
    y = _elu(bn(y, g2, be2, m2, v2))
    t1 = y.shape[-1]
    t2 = t1 // POOL1
    y = y[..., :t2 * POOL1].reshape(B, F1 * D, 1, t2, POOL1).mean(-1)
    y = lax.conv_general_dilated(y, w2.reshape(F2, F1 * D, 1, K2), (1, 1),
                                 [(0, 0), (P2, P2)],
                                 dimension_numbers=("NCHW", "OIHW", "NCHW"),
                                 precision=hp)
    y = _elu(bn(y, g3, be3, m3, v3))
    t3 = y.shape[-1]
    t4 = t3 // POOL2
    y = y[..., :t4 * POOL2].reshape(B, F2, 1, t4, POOL2).mean(-1)
    feat = y.reshape(B, -1)
    return jnp.dot(feat, wc.T, precision=hp) + bc


if __name__ == "__main__":
    B, C, T = 2, 8, 64       # small batch / EEG channels / samples
    NC = 4
    t1 = T + 2 * P1 - K1 + 1
    t2 = t1 // POOL1
    t3 = t2 + 2 * P2 - K2 + 1
    t4 = t3 // POOL2
    n_feat = F2 * t4

    keys = jax.random.split(jax.random.PRNGKey(0), 20)
    w1 = 0.1 * jax.random.normal(keys[0], (F1, K1), jnp.float32)
    g1 = 1.0 + 0.1 * jax.random.normal(keys[1], (F1,), jnp.float32)
    be1 = 0.1 * jax.random.normal(keys[2], (F1,), jnp.float32)
    m1 = 0.1 * jax.random.normal(keys[3], (F1,), jnp.float32)
    v1 = jax.random.uniform(keys[4], (F1,), jnp.float32, 0.5, 1.5)
    wd = 0.2 * jax.random.normal(keys[5], (F1 * D, C), jnp.float32)
    g2 = 1.0 + 0.1 * jax.random.normal(keys[6], (F1 * D,), jnp.float32)
    be2 = 0.1 * jax.random.normal(keys[7], (F1 * D,), jnp.float32)
    m2 = 0.1 * jax.random.normal(keys[8], (F1 * D,), jnp.float32)
    v2 = jax.random.uniform(keys[9], (F1 * D,), jnp.float32, 0.5, 1.5)
    w2 = 0.1 * jax.random.normal(keys[10], (F2, F1 * D, K2), jnp.float32)
    g3 = 1.0 + 0.1 * jax.random.normal(keys[11], (F2,), jnp.float32)
    be3 = 0.1 * jax.random.normal(keys[12], (F2,), jnp.float32)
    m3 = 0.1 * jax.random.normal(keys[13], (F2,), jnp.float32)
    v3 = jax.random.uniform(keys[14], (F2,), jnp.float32, 0.5, 1.5)
    wc = 0.1 * jax.random.normal(keys[15], (NC, n_feat), jnp.float32)
    bc = 0.1 * jax.random.normal(keys[16], (NC,), jnp.float32)
    x = jax.random.normal(keys[17], (B, C, T), jnp.float32)

    # Fold BatchNorm running stats into per-channel scale/shift (eval mode).
    def fold(g, be, m, v):
        s = g / jnp.sqrt(v + BN_EPS)
        return s, be - m * s

    s1, b1 = fold(g1, be1, m1, v1)
    s2, b2 = fold(g2, be2, m2, v2)
    s3, b3 = fold(g3, be3, m3, v3)

    params = (w1, s1, b1, wd, s2, b2, w2, s3, b3, wc, bc)
    out = jax.block_until_ready(eegnet_forward(x, params))

    ref = jax.block_until_ready(
        eegnet_reference(x, (w1, g1, be1, m1, v1, wd, g2, be2, m2, v2,
                             w2, g3, be3, m3, v3, wc, bc)))
    # bf16 MXU inputs (f32 accumulation) vs an f32/HIGHEST reference:
    # loosened tolerance per the performance review.
    np.testing.assert_allclose(np.asarray(out), np.asarray(ref),
                               rtol=3e-2, atol=3e-2)
    print("KERNEL_OK")
</pallas_src>

<mosaic_0001>
module attributes {stable_mosaic.version = 11 : i64} {
  func.func @eegnet_kernel(%arg0: i32, %arg1: memref<64x64xbf16, #tpu.memory_space<vmem>>, %arg2: memref<64x1024xbf16, #tpu.memory_space<vmem>>, %arg3: memref<1x1024xf32, #tpu.memory_space<vmem>>, %arg4: memref<8x16x64xbf16, #tpu.memory_space<vmem>>, %arg5: memref<8x16x1xf32, #tpu.memory_space<vmem>>, %arg6: memref<16x128x272xbf16, #tpu.memory_space<vmem>>, %arg7: memref<1x272xf32, #tpu.memory_space<vmem>>, %arg8: memref<272x128xbf16, #tpu.memory_space<vmem>>, %arg9: memref<1x128xf32, #tpu.memory_space<vmem>>, %arg10: memref<8x128xf32, #tpu.memory_space<vmem>>) attributes {dimension_semantics = [#tpu.dimension_semantics<parallel>], iteration_bounds = array<i64: 1>, scalar_prefetch = 0 : i64, scratch_operands = 0 : i64, tpu.core_type = #tpu.core_type<tc>, window_params = [{transform_indices = @transform_0, window_bounds = array<i64: 64, 64>}, {pipeline_mode = #tpu.pipeline_mode<synchronous>, transform_indices = @transform_1, window_bounds = array<i64: 64, 1024>}, {pipeline_mode = #tpu.pipeline_mode<synchronous>, transform_indices = @transform_2, window_bounds = array<i64: 1, 1024>}, {pipeline_mode = #tpu.pipeline_mode<synchronous>, transform_indices = @transform_3, window_bounds = array<i64: 8, 16, 64>}, {pipeline_mode = #tpu.pipeline_mode<synchronous>, transform_indices = @transform_4, window_bounds = array<i64: 8, 16, 1>}, {pipeline_mode = #tpu.pipeline_mode<synchronous>, transform_indices = @transform_5, window_bounds = array<i64: 16, 128, 272>}, {pipeline_mode = #tpu.pipeline_mode<synchronous>, transform_indices = @transform_6, window_bounds = array<i64: 1, 272>}, {pipeline_mode = #tpu.pipeline_mode<synchronous>, transform_indices = @transform_7, window_bounds = array<i64: 272, 128>}, {pipeline_mode = #tpu.pipeline_mode<synchronous>, transform_indices = @transform_8, window_bounds = array<i64: 1, 128>}, {transform_indices = @transform_9, window_bounds = array<i64: 8, 128>}]} {
    %c0 = arith.constant 0 : index
    %c0_0 = arith.constant 0 : index
    %0 = vector.load %arg1[%c0, %c0_0] : memref<64x64xbf16, #tpu.memory_space<vmem>>, vector<64x64xbf16>
    %c0_1 = arith.constant 0 : index
    %c0_2 = arith.constant 0 : index
    %1 = vector.load %arg2[%c0_1, %c0_2] : memref<64x1024xbf16, #tpu.memory_space<vmem>>, vector<64x1024xbf16>
    %cst = arith.constant dense<0.000000e+00> : vector<64x1024xf32>
    %2 = tpu.matmul %0, %1, %cst {dimension_numbers = #tpu.dot_dimension_numbers<[1], [0], [0], [1], [0, 0, 1, 1], [], []>} : vector<64x64xbf16>, vector<64x1024xbf16>, vector<64x1024xf32> -> vector<64x1024xf32>
    %c0_3 = arith.constant 0 : index
    %c0_4 = arith.constant 0 : index
    %3 = vector.load %arg3[%c0_3, %c0_4] : memref<1x1024xf32, #tpu.memory_space<vmem>>, vector<1x1024xf32>
    %4 = vector.broadcast %3 : vector<1x1024xf32> to vector<64x1024xf32>
    %5 = arith.addf %2, %4 : vector<64x1024xf32>
    %cst_5 = arith.constant 0.000000e+00 : f32
    %6 = vector.broadcast %cst_5 : f32 to vector<64x1024xf32>
    %7 = arith.cmpf ogt, %5, %6 : vector<64x1024xf32>
    %cst_6 = arith.constant 0.000000e+00 : f32
    %8 = vector.broadcast %cst_6 : f32 to vector<64x1024xf32>
    %9 = arith.minimumf %5, %8 : vector<64x1024xf32>
    %10 = math.exp %9 : vector<64x1024xf32>
    %cst_7 = arith.constant 1.000000e+00 : f32
    %11 = vector.broadcast %cst_7 : f32 to vector<64x1024xf32>
    %12 = arith.subf %10, %11 : vector<64x1024xf32>
    %13 = arith.select %7, %5, %12 : vector<64x1024xi1>, vector<64x1024xf32>
    %14 = arith.truncf %13 : vector<64x1024xf32> to vector<64x1024xbf16>
    %cst_8 = arith.constant 0.000000e+00 : f32
    %15 = vector.broadcast %cst_8 : f32 to vector<8x272xf32>
    %16 = vector.extract_strided_slice %14 {offsets = [0, 0], sizes = [64, 128], strides = [1, 1]} : vector<64x1024xbf16> to vector<64x128xbf16>
    %c0_9 = arith.constant 0 : index
    %c0_10 = arith.constant 0 : index
    %c0_11 = arith.constant 0 : index
    %17 = vector.load %arg4[%c0_9, %c0_10, %c0_11] : memref<8x16x64xbf16, #tpu.memory_space<vmem>>, vector<1x16x64xbf16>
    %18 = vector.shape_cast %17 : vector<1x16x64xbf16> to vector<16x64xbf16>
    %cst_12 = arith.constant dense<0.000000e+00> : vector<16x128xf32>
    %19 = tpu.matmul %18, %16, %cst_12 {dimension_numbers = #tpu.dot_dimension_numbers<[1], [0], [0], [1], [0, 0, 1, 1], [], []>} : vector<16x64xbf16>, vector<64x128xbf16>, vector<16x128xf32> -> vector<16x128xf32>
    %c0_13 = arith.constant 0 : index
    %c0_14 = arith.constant 0 : index
    %c0_15 = arith.constant 0 : index
    %20 = vector.load %arg5[%c0_13, %c0_14, %c0_15] : memref<8x16x1xf32, #tpu.memory_space<vmem>>, vector<1x16x1xf32>
    %21 = vector.shape_cast %20 : vector<1x16x1xf32> to vector<16x1xf32>
    %22 = vector.broadcast %21 : vector<16x1xf32> to vector<16x128xf32>
    %23 = arith.addf %19, %22 : vector<16x128xf32>
    %cst_16 = arith.constant 0.000000e+00 : f32
    %24 = vector.broadcast %cst_16 : f32 to vector<16x128xf32>
    %25 = arith.cmpf ogt, %23, %24 : vector<16x128xf32>
    %cst_17 = arith.constant 0.000000e+00 : f32
    %26 = vector.broadcast %cst_17 : f32 to vector<16x128xf32>
    %27 = arith.minimumf %23, %26 : vector<16x128xf32>
    %28 = math.exp %27 : vector<16x128xf32>
    %cst_18 = arith.constant 1.000000e+00 : f32
    %29 = vector.broadcast %cst_18 : f32 to vector<16x128xf32>
    %30 = arith.subf %28, %29 : vector<16x128xf32>
    %31 = arith.select %25, %23, %30 : vector<16x128xi1>, vector<16x128xf32>
    %32 = vector.extract_strided_slice %31 {offsets = [0, 0], sizes = [8, 128], strides = [1, 1]} : vector<16x128xf32> to vector<8x128xf32>
    %33 = arith.truncf %32 : vector<8x128xf32> to vector<8x128xbf16>
    %c0_19 = arith.constant 0 : index
    %c0_20 = arith.constant 0 : index
    %c0_21 = arith.constant 0 : index
    %34 = vector.load %arg6[%c0_19, %c0_20, %c0_21] : memref<16x128x272xbf16, #tpu.memory_space<vmem>>, vector<1x128x272xbf16>
    %35 = vector.shape_cast %34 : vector<1x128x272xbf16> to vector<128x272xbf16>
    %cst_22 = arith.constant dense<0.000000e+00> : vector<8x272xf32>
    %36 = tpu.matmul %33, %35, %cst_22 {dimension_numbers = #tpu.dot_dimension_numbers<[1], [0], [0], [1], [0, 0, 1, 1], [], []>} : vector<8x128xbf16>, vector<128x272xbf16>, vector<8x272xf32> -> vector<8x272xf32>
    %37 = arith.addf %15, %36 : vector<8x272xf32>
    %38 = vector.extract_strided_slice %31 {offsets = [8, 0], sizes = [8, 128], strides = [1, 1]} : vector<16x128xf32> to vector<8x128xf32>
    %39 = arith.truncf %38 : vector<8x128xf32> to vector<8x128xbf16>
    %c1 = arith.constant 1 : index
    %c0_23 = arith.constant 0 : index
    %c0_24 = arith.constant 0 : index
    %40 = vector.load %arg6[%c1, %c0_23, %c0_24] : memref<16x128x272xbf16, #tpu.memory_space<vmem>>, vector<1x128x272xbf16>
    %41 = vector.shape_cast %40 : vector<1x128x272xbf16> to vector<128x272xbf16>
    %cst_25 = arith.constant dense<0.000000e+00> : vector<8x272xf32>
    %42 = tpu.matmul %39, %41, %cst_25 {dimension_numbers = #tpu.dot_dimension_numbers<[1], [0], [0], [1], [0, 0, 1, 1], [], []>} : vector<8x128xbf16>, vector<128x272xbf16>, vector<8x272xf32> -> vector<8x272xf32>
    %43 = arith.addf %37, %42 : vector<8x272xf32>
    %44 = vector.extract_strided_slice %14 {offsets = [0, 128], sizes = [64, 128], strides = [1, 1]} : vector<64x1024xbf16> to vector<64x128xbf16>
    %c1_26 = arith.constant 1 : index
    %c0_27 = arith.constant 0 : index
    %c0_28 = arith.constant 0 : index
    %45 = vector.load %arg4[%c1_26, %c0_27, %c0_28] : memref<8x16x64xbf16, #tpu.memory_space<vmem>>, vector<1x16x64xbf16>
    %46 = vector.shape_cast %45 : vector<1x16x64xbf16> to vector<16x64xbf16>
    %cst_29 = arith.constant dense<0.000000e+00> : vector<16x128xf32>
    %47 = tpu.matmul %46, %44, %cst_29 {dimension_numbers = #tpu.dot_dimension_numbers<[1], [0], [0], [1], [0, 0, 1, 1], [], []>} : vector<16x64xbf16>, vector<64x128xbf16>, vector<16x128xf32> -> vector<16x128xf32>
    %c1_30 = arith.constant 1 : index
    %c0_31 = arith.constant 0 : index
    %c0_32 = arith.constant 0 : index
    %48 = vector.load %arg5[%c1_30, %c0_31, %c0_32] : memref<8x16x1xf32, #tpu.memory_space<vmem>>, vector<1x16x1xf32>
    %49 = vector.shape_cast %48 : vector<1x16x1xf32> to vector<16x1xf32>
    %50 = vector.broadcast %49 : vector<16x1xf32> to vector<16x128xf32>
    %51 = arith.addf %47, %50 : vector<16x128xf32>
    %cst_33 = arith.constant 0.000000e+00 : f32
    %52 = vector.broadcast %cst_33 : f32 to vector<16x128xf32>
    %53 = arith.cmpf ogt, %51, %52 : vector<16x128xf32>
    %cst_34 = arith.constant 0.000000e+00 : f32
    %54 = vector.broadcast %cst_34 : f32 to vector<16x128xf32>
    %55 = arith.minimumf %51, %54 : vector<16x128xf32>
    %56 = math.exp %55 : vector<16x128xf32>
    %cst_35 = arith.constant 1.000000e+00 : f32
    %57 = vector.broadcast %cst_35 : f32 to vector<16x128xf32>
    %58 = arith.subf %56, %57 : vector<16x128xf32>
    %59 = arith.select %53, %51, %58 : vector<16x128xi1>, vector<16x128xf32>
    %60 = vector.extract_strided_slice %59 {offsets = [0, 0], sizes = [8, 128], strides = [1, 1]} : vector<16x128xf32> to vector<8x128xf32>
    %61 = arith.truncf %60 : vector<8x128xf32> to vector<8x128xbf16>
    %c2 = arith.constant 2 : index
    %c0_36 = arith.constant 0 : index
    %c0_37 = arith.constant 0 : index
    %62 = vector.load %arg6[%c2, %c0_36, %c0_37] : memref<16x128x272xbf16, #tpu.memory_space<vmem>>, vector<1x128x272xbf16>
    %63 = vector.shape_cast %62 : vector<1x128x272xbf16> to vector<128x272xbf16>
    %cst_38 = arith.constant dense<0.000000e+00> : vector<8x272xf32>
    %64 = tpu.matmul %61, %63, %cst_38 {dimension_numbers = #tpu.dot_dimension_numbers<[1], [0], [0], [1], [0, 0, 1, 1], [], []>} : vector<8x128xbf16>, vector<128x272xbf16>, vector<8x272xf32> -> vector<8x272xf32>
    %65 = arith.addf %43, %64 : vector<8x272xf32>
    %66 = vector.extract_strided_slice %59 {offsets = [8, 0], sizes = [8, 128], strides = [1, 1]} : vector<16x128xf32> to vector<8x128xf32>
    %67 = arith.truncf %66 : vector<8x128xf32> to vector<8x128xbf16>
    %c3 = arith.constant 3 : index
    %c0_39 = arith.constant 0 : index
    %c0_40 = arith.constant 0 : index
    %68 = vector.load %arg6[%c3, %c0_39, %c0_40] : memref<16x128x272xbf16, #tpu.memory_space<vmem>>, vector<1x128x272xbf16>
    %69 = vector.shape_cast %68 : vector<1x128x272xbf16> to vector<128x272xbf16>
    %cst_41 = arith.constant dense<0.000000e+00> : vector<8x272xf32>
    %70 = tpu.matmul %67, %69, %cst_41 {dimension_numbers = #tpu.dot_dimension_numbers<[1], [0], [0], [1], [0, 0, 1, 1], [], []>} : vector<8x128xbf16>, vector<128x272xbf16>, vector<8x272xf32> -> vector<8x272xf32>
    %71 = arith.addf %65, %70 : vector<8x272xf32>
    %72 = vector.extract_strided_slice %14 {offsets = [0, 256], sizes = [64, 128], strides = [1, 1]} : vector<64x1024xbf16> to vector<64x128xbf16>
    %c2_42 = arith.constant 2 : index
    %c0_43 = arith.constant 0 : index
    %c0_44 = arith.constant 0 : index
    %73 = vector.load %arg4[%c2_42, %c0_43, %c0_44] : memref<8x16x64xbf16, #tpu.memory_space<vmem>>, vector<1x16x64xbf16>
    %74 = vector.shape_cast %73 : vector<1x16x64xbf16> to vector<16x64xbf16>
    %cst_45 = arith.constant dense<0.000000e+00> : vector<16x128xf32>
    %75 = tpu.matmul %74, %72, %cst_45 {dimension_numbers = #tpu.dot_dimension_numbers<[1], [0], [0], [1], [0, 0, 1, 1], [], []>} : vector<16x64xbf16>, vector<64x128xbf16>, vector<16x128xf32> -> vector<16x128xf32>
    %c2_46 = arith.constant 2 : index
    %c0_47 = arith.constant 0 : index
    %c0_48 = arith.constant 0 : index
    %76 = vector.load %arg5[%c2_46, %c0_47, %c0_48] : memref<8x16x1xf32, #tpu.memory_space<vmem>>, vector<1x16x1xf32>
    %77 = vector.shape_cast %76 : vector<1x16x1xf32> to vector<16x1xf32>
    %78 = vector.broadcast %77 : vector<16x1xf32> to vector<16x128xf32>
    %79 = arith.addf %75, %78 : vector<16x128xf32>
    %cst_49 = arith.constant 0.000000e+00 : f32
    %80 = vector.broadcast %cst_49 : f32 to vector<16x128xf32>
    %81 = arith.cmpf ogt, %79, %80 : vector<16x128xf32>
    %cst_50 = arith.constant 0.000000e+00 : f32
    %82 = vector.broadcast %cst_50 : f32 to vector<16x128xf32>
    %83 = arith.minimumf %79, %82 : vector<16x128xf32>
    %84 = math.exp %83 : vector<16x128xf32>
    %cst_51 = arith.constant 1.000000e+00 : f32
    %85 = vector.broadcast %cst_51 : f32 to vector<16x128xf32>
    %86 = arith.subf %84, %85 : vector<16x128xf32>
    %87 = arith.select %81, %79, %86 : vector<16x128xi1>, vector<16x128xf32>
    %88 = vector.extract_strided_slice %87 {offsets = [0, 0], sizes = [8, 128], strides = [1, 1]} : vector<16x128xf32> to vector<8x128xf32>
    %89 = arith.truncf %88 : vector<8x128xf32> to vector<8x128xbf16>
    %c4 = arith.constant 4 : index
    %c0_52 = arith.constant 0 : index
    %c0_53 = arith.constant 0 : index
    %90 = vector.load %arg6[%c4, %c0_52, %c0_53] : memref<16x128x272xbf16, #tpu.memory_space<vmem>>, vector<1x128x272xbf16>
    %91 = vector.shape_cast %90 : vector<1x128x272xbf16> to vector<128x272xbf16>
    %cst_54 = arith.constant dense<0.000000e+00> : vector<8x272xf32>
    %92 = tpu.matmul %89, %91, %cst_54 {dimension_numbers = #tpu.dot_dimension_numbers<[1], [0], [0], [1], [0, 0, 1, 1], [], []>} : vector<8x128xbf16>, vector<128x272xbf16>, vector<8x272xf32> -> vector<8x272xf32>
    %93 = arith.addf %71, %92 : vector<8x272xf32>
    %94 = vector.extract_strided_slice %87 {offsets = [8, 0], sizes = [8, 128], strides = [1, 1]} : vector<16x128xf32> to vector<8x128xf32>
    %95 = arith.truncf %94 : vector<8x128xf32> to vector<8x128xbf16>
    %c5 = arith.constant 5 : index
    %c0_55 = arith.constant 0 : index
    %c0_56 = arith.constant 0 : index
    %96 = vector.load %arg6[%c5, %c0_55, %c0_56] : memref<16x128x272xbf16, #tpu.memory_space<vmem>>, vector<1x128x272xbf16>
    %97 = vector.shape_cast %96 : vector<1x128x272xbf16> to vector<128x272xbf16>
    %cst_57 = arith.constant dense<0.000000e+00> : vector<8x272xf32>
    %98 = tpu.matmul %95, %97, %cst_57 {dimension_numbers = #tpu.dot_dimension_numbers<[1], [0], [0], [1], [0, 0, 1, 1], [], []>} : vector<8x128xbf16>, vector<128x272xbf16>, vector<8x272xf32> -> vector<8x272xf32>
    %99 = arith.addf %93, %98 : vector<8x272xf32>
    %100 = vector.extract_strided_slice %14 {offsets = [0, 384], sizes = [64, 128], strides = [1, 1]} : vector<64x1024xbf16> to vector<64x128xbf16>
    %c3_58 = arith.constant 3 : index
    %c0_59 = arith.constant 0 : index
    %c0_60 = arith.constant 0 : index
    %101 = vector.load %arg4[%c3_58, %c0_59, %c0_60] : memref<8x16x64xbf16, #tpu.memory_space<vmem>>, vector<1x16x64xbf16>
    %102 = vector.shape_cast %101 : vector<1x16x64xbf16> to vector<16x64xbf16>
    %cst_61 = arith.constant dense<0.000000e+00> : vector<16x128xf32>
    %103 = tpu.matmul %102, %100, %cst_61 {dimension_numbers = #tpu.dot_dimension_numbers<[1], [0], [0], [1], [0, 0, 1, 1], [], []>} : vector<16x64xbf16>, vector<64x128xbf16>, vector<16x128xf32> -> vector<16x128xf32>
    %c3_62 = arith.constant 3 : index
    %c0_63 = arith.constant 0 : index
    %c0_64 = arith.constant 0 : index
    %104 = vector.load %arg5[%c3_62, %c0_63, %c0_64] : memref<8x16x1xf32, #tpu.memory_space<vmem>>, vector<1x16x1xf32>
    %105 = vector.shape_cast %104 : vector<1x16x1xf32> to vector<16x1xf32>
    %106 = vector.broadcast %105 : vector<16x1xf32> to vector<16x128xf32>
    %107 = arith.addf %103, %106 : vector<16x128xf32>
    %cst_65 = arith.constant 0.000000e+00 : f32
    %108 = vector.broadcast %cst_65 : f32 to vector<16x128xf32>
    %109 = arith.cmpf ogt, %107, %108 : vector<16x128xf32>
    %cst_66 = arith.constant 0.000000e+00 : f32
    %110 = vector.broadcast %cst_66 : f32 to vector<16x128xf32>
    %111 = arith.minimumf %107, %110 : vector<16x128xf32>
    %112 = math.exp %111 : vector<16x128xf32>
    %cst_67 = arith.constant 1.000000e+00 : f32
    %113 = vector.broadcast %cst_67 : f32 to vector<16x128xf32>
    %114 = arith.subf %112, %113 : vector<16x128xf32>
    %115 = arith.select %109, %107, %114 : vector<16x128xi1>, vector<16x128xf32>
    %116 = vector.extract_strided_slice %115 {offsets = [0, 0], sizes = [8, 128], strides = [1, 1]} : vector<16x128xf32> to vector<8x128xf32>
    %117 = arith.truncf %116 : vector<8x128xf32> to vector<8x128xbf16>
    %c6 = arith.constant 6 : index
    %c0_68 = arith.constant 0 : index
    %c0_69 = arith.constant 0 : index
    %118 = vector.load %arg6[%c6, %c0_68, %c0_69] : memref<16x128x272xbf16, #tpu.memory_space<vmem>>, vector<1x128x272xbf16>
    %119 = vector.shape_cast %118 : vector<1x128x272xbf16> to vector<128x272xbf16>
    %cst_70 = arith.constant dense<0.000000e+00> : vector<8x272xf32>
    %120 = tpu.matmul %117, %119, %cst_70 {dimension_numbers = #tpu.dot_dimension_numbers<[1], [0], [0], [1], [0, 0, 1, 1], [], []>} : vector<8x128xbf16>, vector<128x272xbf16>, vector<8x272xf32> -> vector<8x272xf32>
    %121 = arith.addf %99, %120 : vector<8x272xf32>
    %122 = vector.extract_strided_slice %115 {offsets = [8, 0], sizes = [8, 128], strides = [1, 1]} : vector<16x128xf32> to vector<8x128xf32>
    %123 = arith.truncf %122 : vector<8x128xf32> to vector<8x128xbf16>
    %c7 = arith.constant 7 : index
    %c0_71 = arith.constant 0 : index
    %c0_72 = arith.constant 0 : index
    %124 = vector.load %arg6[%c7, %c0_71, %c0_72] : memref<16x128x272xbf16, #tpu.memory_space<vmem>>, vector<1x128x272xbf16>
    %125 = vector.shape_cast %124 : vector<1x128x272xbf16> to vector<128x272xbf16>
    %cst_73 = arith.constant dense<0.000000e+00> : vector<8x272xf32>
    %126 = tpu.matmul %123, %125, %cst_73 {dimension_numbers = #tpu.dot_dimension_numbers<[1], [0], [0], [1], [0, 0, 1, 1], [], []>} : vector<8x128xbf16>, vector<128x272xbf16>, vector<8x272xf32> -> vector<8x272xf32>
    %127 = arith.addf %121, %126 : vector<8x272xf32>
    %128 = vector.extract_strided_slice %14 {offsets = [0, 512], sizes = [64, 128], strides = [1, 1]} : vector<64x1024xbf16> to vector<64x128xbf16>
    %c4_74 = arith.constant 4 : index
    %c0_75 = arith.constant 0 : index
    %c0_76 = arith.constant 0 : index
    %129 = vector.load %arg4[%c4_74, %c0_75, %c0_76] : memref<8x16x64xbf16, #tpu.memory_space<vmem>>, vector<1x16x64xbf16>
    %130 = vector.shape_cast %129 : vector<1x16x64xbf16> to vector<16x64xbf16>
    %cst_77 = arith.constant dense<0.000000e+00> : vector<16x128xf32>
    %131 = tpu.matmul %130, %128, %cst_77 {dimension_numbers = #tpu.dot_dimension_numbers<[1], [0], [0], [1], [0, 0, 1, 1], [], []>} : vector<16x64xbf16>, vector<64x128xbf16>, vector<16x128xf32> -> vector<16x128xf32>
    %c4_78 = arith.constant 4 : index
    %c0_79 = arith.constant 0 : index
    %c0_80 = arith.constant 0 : index
    %132 = vector.load %arg5[%c4_78, %c0_79, %c0_80] : memref<8x16x1xf32, #tpu.memory_space<vmem>>, vector<1x16x1xf32>
    %133 = vector.shape_cast %132 : vector<1x16x1xf32> to vector<16x1xf32>
    %134 = vector.broadcast %133 : vector<16x1xf32> to vector<16x128xf32>
    %135 = arith.addf %131, %134 : vector<16x128xf32>
    %cst_81 = arith.constant 0.000000e+00 : f32
    %136 = vector.broadcast %cst_81 : f32 to vector<16x128xf32>
    %137 = arith.cmpf ogt, %135, %136 : vector<16x128xf32>
    %cst_82 = arith.constant 0.000000e+00 : f32
    %138 = vector.broadcast %cst_82 : f32 to vector<16x128xf32>
    %139 = arith.minimumf %135, %138 : vector<16x128xf32>
    %140 = math.exp %139 : vector<16x128xf32>
    %cst_83 = arith.constant 1.000000e+00 : f32
    %141 = vector.broadcast %cst_83 : f32 to vector<16x128xf32>
    %142 = arith.subf %140, %141 : vector<16x128xf32>
    %143 = arith.select %137, %135, %142 : vector<16x128xi1>, vector<16x128xf32>
    %144 = vector.extract_strided_slice %143 {offsets = [0, 0], sizes = [8, 128], strides = [1, 1]} : vector<16x128xf32> to vector<8x128xf32>
    %145 = arith.truncf %144 : vector<8x128xf32> to vector<8x128xbf16>
    %c8 = arith.constant 8 : index
    %c0_84 = arith.constant 0 : index
    %c0_85 = arith.constant 0 : index
    %146 = vector.load %arg6[%c8, %c0_84, %c0_85] : memref<16x128x272xbf16, #tpu.memory_space<vmem>>, vector<1x128x272xbf16>
    %147 = vector.shape_cast %146 : vector<1x128x272xbf16> to vector<128x272xbf16>
    %cst_86 = arith.constant dense<0.000000e+00> : vector<8x272xf32>
    %148 = tpu.matmul %145, %147, %cst_86 {dimension_numbers = #tpu.dot_dimension_numbers<[1], [0], [0], [1], [0, 0, 1, 1], [], []>} : vector<8x128xbf16>, vector<128x272xbf16>, vector<8x272xf32> -> vector<8x272xf32>
    %149 = arith.addf %127, %148 : vector<8x272xf32>
    %150 = vector.extract_strided_slice %143 {offsets = [8, 0], sizes = [8, 128], strides = [1, 1]} : vector<16x128xf32> to vector<8x128xf32>
    %151 = arith.truncf %150 : vector<8x128xf32> to vector<8x128xbf16>
    %c9 = arith.constant 9 : index
    %c0_87 = arith.constant 0 : index
    %c0_88 = arith.constant 0 : index
    %152 = vector.load %arg6[%c9, %c0_87, %c0_88] : memref<16x128x272xbf16, #tpu.memory_space<vmem>>, vector<1x128x272xbf16>
    %153 = vector.shape_cast %152 : vector<1x128x272xbf16> to vector<128x272xbf16>
    %cst_89 = arith.constant dense<0.000000e+00> : vector<8x272xf32>
    %154 = tpu.matmul %151, %153, %cst_89 {dimension_numbers = #tpu.dot_dimension_numbers<[1], [0], [0], [1], [0, 0, 1, 1], [], []>} : vector<8x128xbf16>, vector<128x272xbf16>, vector<8x272xf32> -> vector<8x272xf32>
    %155 = arith.addf %149, %154 : vector<8x272xf32>
    %156 = vector.extract_strided_slice %14 {offsets = [0, 640], sizes = [64, 128], strides = [1, 1]} : vector<64x1024xbf16> to vector<64x128xbf16>
    %c5_90 = arith.constant 5 : index
    %c0_91 = arith.constant 0 : index
    %c0_92 = arith.constant 0 : index
    %157 = vector.load %arg4[%c5_90, %c0_91, %c0_92] : memref<8x16x64xbf16, #tpu.memory_space<vmem>>, vector<1x16x64xbf16>
    %158 = vector.shape_cast %157 : vector<1x16x64xbf16> to vector<16x64xbf16>
    %cst_93 = arith.constant dense<0.000000e+00> : vector<16x128xf32>
    %159 = tpu.matmul %158, %156, %cst_93 {dimension_numbers = #tpu.dot_dimension_numbers<[1], [0], [0], [1], [0, 0, 1, 1], [], []>} : vector<16x64xbf16>, vector<64x128xbf16>, vector<16x128xf32> -> vector<16x128xf32>
    %c5_94 = arith.constant 5 : index
    %c0_95 = arith.constant 0 : index
    %c0_96 = arith.constant 0 : index
    %160 = vector.load %arg5[%c5_94, %c0_95, %c0_96] : memref<8x16x1xf32, #tpu.memory_space<vmem>>, vector<1x16x1xf32>
    %161 = vector.shape_cast %160 : vector<1x16x1xf32> to vector<16x1xf32>
    %162 = vector.broadcast %161 : vector<16x1xf32> to vector<16x128xf32>
    %163 = arith.addf %159, %162 : vector<16x128xf32>
    %cst_97 = arith.constant 0.000000e+00 : f32
    %164 = vector.broadcast %cst_97 : f32 to vector<16x128xf32>
    %165 = arith.cmpf ogt, %163, %164 : vector<16x128xf32>
    %cst_98 = arith.constant 0.000000e+00 : f32
    %166 = vector.broadcast %cst_98 : f32 to vector<16x128xf32>
    %167 = arith.minimumf %163, %166 : vector<16x128xf32>
    %168 = math.exp %167 : vector<16x128xf32>
    %cst_99 = arith.constant 1.000000e+00 : f32
    %169 = vector.broadcast %cst_99 : f32 to vector<16x128xf32>
    %170 = arith.subf %168, %169 : vector<16x128xf32>
    %171 = arith.select %165, %163, %170 : vector<16x128xi1>, vector<16x128xf32>
    %172 = vector.extract_strided_slice %171 {offsets = [0, 0], sizes = [8, 128], strides = [1, 1]} : vector<16x128xf32> to vector<8x128xf32>
    %173 = arith.truncf %172 : vector<8x128xf32> to vector<8x128xbf16>
    %c10 = arith.constant 10 : index
    %c0_100 = arith.constant 0 : index
    %c0_101 = arith.constant 0 : index
    %174 = vector.load %arg6[%c10, %c0_100, %c0_101] : memref<16x128x272xbf16, #tpu.memory_space<vmem>>, vector<1x128x272xbf16>
    %175 = vector.shape_cast %174 : vector<1x128x272xbf16> to vector<128x272xbf16>
    %cst_102 = arith.constant dense<0.000000e+00> : vector<8x272xf32>
    %176 = tpu.matmul %173, %175, %cst_102 {dimension_numbers = #tpu.dot_dimension_numbers<[1], [0], [0], [1], [0, 0, 1, 1], [], []>} : vector<8x128xbf16>, vector<128x272xbf16>, vector<8x272xf32> -> vector<8x272xf32>
    %177 = arith.addf %155, %176 : vector<8x272xf32>
    %178 = vector.extract_strided_slice %171 {offsets = [8, 0], sizes = [8, 128], strides = [1, 1]} : vector<16x128xf32> to vector<8x128xf32>
    %179 = arith.truncf %178 : vector<8x128xf32> to vector<8x128xbf16>
    %c11 = arith.constant 11 : index
    %c0_103 = arith.constant 0 : index
    %c0_104 = arith.constant 0 : index
    %180 = vector.load %arg6[%c11, %c0_103, %c0_104] : memref<16x128x272xbf16, #tpu.memory_space<vmem>>, vector<1x128x272xbf16>
    %181 = vector.shape_cast %180 : vector<1x128x272xbf16> to vector<128x272xbf16>
    %cst_105 = arith.constant dense<0.000000e+00> : vector<8x272xf32>
    %182 = tpu.matmul %179, %181, %cst_105 {dimension_numbers = #tpu.dot_dimension_numbers<[1], [0], [0], [1], [0, 0, 1, 1], [], []>} : vector<8x128xbf16>, vector<128x272xbf16>, vector<8x272xf32> -> vector<8x272xf32>
    %183 = arith.addf %177, %182 : vector<8x272xf32>
    %184 = vector.extract_strided_slice %14 {offsets = [0, 768], sizes = [64, 128], strides = [1, 1]} : vector<64x1024xbf16> to vector<64x128xbf16>
    %c6_106 = arith.constant 6 : index
    %c0_107 = arith.constant 0 : index
    %c0_108 = arith.constant 0 : index
    %185 = vector.load %arg4[%c6_106, %c0_107, %c0_108] : memref<8x16x64xbf16, #tpu.memory_space<vmem>>, vector<1x16x64xbf16>
    %186 = vector.shape_cast %185 : vector<1x16x64xbf16> to vector<16x64xbf16>
    %cst_109 = arith.constant dense<0.000000e+00> : vector<16x128xf32>
    %187 = tpu.matmul %186, %184, %cst_109 {dimension_numbers = #tpu.dot_dimension_numbers<[1], [0], [0], [1], [0, 0, 1, 1], [], []>} : vector<16x64xbf16>, vector<64x128xbf16>, vector<16x128xf32> -> vector<16x128xf32>
    %c6_110 = arith.constant 6 : index
    %c0_111 = arith.constant 0 : index
    %c0_112 = arith.constant 0 : index
    %188 = vector.load %arg5[%c6_110, %c0_111, %c0_112] : memref<8x16x1xf32, #tpu.memory_space<vmem>>, vector<1x16x1xf32>
    %189 = vector.shape_cast %188 : vector<1x16x1xf32> to vector<16x1xf32>
    %190 = vector.broadcast %189 : vector<16x1xf32> to vector<16x128xf32>
    %191 = arith.addf %187, %190 : vector<16x128xf32>
    %cst_113 = arith.constant 0.000000e+00 : f32
    %192 = vector.broadcast %cst_113 : f32 to vector<16x128xf32>
    %193 = arith.cmpf ogt, %191, %192 : vector<16x128xf32>
    %cst_114 = arith.constant 0.000000e+00 : f32
    %194 = vector.broadcast %cst_114 : f32 to vector<16x128xf32>
    %195 = arith.minimumf %191, %194 : vector<16x128xf32>
    %196 = math.exp %195 : vector<16x128xf32>
    %cst_115 = arith.constant 1.000000e+00 : f32
    %197 = vector.broadcast %cst_115 : f32 to vector<16x128xf32>
    %198 = arith.subf %196, %197 : vector<16x128xf32>
    %199 = arith.select %193, %191, %198 : vector<16x128xi1>, vector<16x128xf32>
    %200 = vector.extract_strided_slice %199 {offsets = [0, 0], sizes = [8, 128], strides = [1, 1]} : vector<16x128xf32> to vector<8x128xf32>
    %201 = arith.truncf %200 : vector<8x128xf32> to vector<8x128xbf16>
    %c12 = arith.constant 12 : index
    %c0_116 = arith.constant 0 : index
    %c0_117 = arith.constant 0 : index
    %202 = vector.load %arg6[%c12, %c0_116, %c0_117] : memref<16x128x272xbf16, #tpu.memory_space<vmem>>, vector<1x128x272xbf16>
    %203 = vector.shape_cast %202 : vector<1x128x272xbf16> to vector<128x272xbf16>
    %cst_118 = arith.constant dense<0.000000e+00> : vector<8x272xf32>
    %204 = tpu.matmul %201, %203, %cst_118 {dimension_numbers = #tpu.dot_dimension_numbers<[1], [0], [0], [1], [0, 0, 1, 1], [], []>} : vector<8x128xbf16>, vector<128x272xbf16>, vector<8x272xf32> -> vector<8x272xf32>
    %205 = arith.addf %183, %204 : vector<8x272xf32>
    %206 = vector.extract_strided_slice %199 {offsets = [8, 0], sizes = [8, 128], strides = [1, 1]} : vector<16x128xf32> to vector<8x128xf32>
    %207 = arith.truncf %206 : vector<8x128xf32> to vector<8x128xbf16>
    %c13 = arith.constant 13 : index
    %c0_119 = arith.constant 0 : index
    %c0_120 = arith.constant 0 : index
    %208 = vector.load %arg6[%c13, %c0_119, %c0_120] : memref<16x128x272xbf16, #tpu.memory_space<vmem>>, vector<1x128x272xbf16>
    %209 = vector.shape_cast %208 : vector<1x128x272xbf16> to vector<128x272xbf16>
    %cst_121 = arith.constant dense<0.000000e+00> : vector<8x272xf32>
    %210 = tpu.matmul %207, %209, %cst_121 {dimension_numbers = #tpu.dot_dimension_numbers<[1], [0], [0], [1], [0, 0, 1, 1], [], []>} : vector<8x128xbf16>, vector<128x272xbf16>, vector<8x272xf32> -> vector<8x272xf32>
    %211 = arith.addf %205, %210 : vector<8x272xf32>
    %212 = vector.extract_strided_slice %14 {offsets = [0, 896], sizes = [64, 128], strides = [1, 1]} : vector<64x1024xbf16> to vector<64x128xbf16>
    %c7_122 = arith.constant 7 : index
    %c0_123 = arith.constant 0 : index
    %c0_124 = arith.constant 0 : index
    %213 = vector.load %arg4[%c7_122, %c0_123, %c0_124] : memref<8x16x64xbf16, #tpu.memory_space<vmem>>, vector<1x16x64xbf16>
    %214 = vector.shape_cast %213 : vector<1x16x64xbf16> to vector<16x64xbf16>
    %cst_125 = arith.constant dense<0.000000e+00> : vector<16x128xf32>
    %215 = tpu.matmul %214, %212, %cst_125 {dimension_numbers = #tpu.dot_dimension_numbers<[1], [0], [0], [1], [0, 0, 1, 1], [], []>} : vector<16x64xbf16>, vector<64x128xbf16>, vector<16x128xf32> -> vector<16x128xf32>
    %c7_126 = arith.constant 7 : index
    %c0_127 = arith.constant 0 : index
    %c0_128 = arith.constant 0 : index
    %216 = vector.load %arg5[%c7_126, %c0_127, %c0_128] : memref<8x16x1xf32, #tpu.memory_space<vmem>>, vector<1x16x1xf32>
    %217 = vector.shape_cast %216 : vector<1x16x1xf32> to vector<16x1xf32>
    %218 = vector.broadcast %217 : vector<16x1xf32> to vector<16x128xf32>
    %219 = arith.addf %215, %218 : vector<16x128xf32>
    %cst_129 = arith.constant 0.000000e+00 : f32
    %220 = vector.broadcast %cst_129 : f32 to vector<16x128xf32>
    %221 = arith.cmpf ogt, %219, %220 : vector<16x128xf32>
    %cst_130 = arith.constant 0.000000e+00 : f32
    %222 = vector.broadcast %cst_130 : f32 to vector<16x128xf32>
    %223 = arith.minimumf %219, %222 : vector<16x128xf32>
    %224 = math.exp %223 : vector<16x128xf32>
    %cst_131 = arith.constant 1.000000e+00 : f32
    %225 = vector.broadcast %cst_131 : f32 to vector<16x128xf32>
    %226 = arith.subf %224, %225 : vector<16x128xf32>
    %227 = arith.select %221, %219, %226 : vector<16x128xi1>, vector<16x128xf32>
    %228 = vector.extract_strided_slice %227 {offsets = [0, 0], sizes = [8, 128], strides = [1, 1]} : vector<16x128xf32> to vector<8x128xf32>
    %229 = arith.truncf %228 : vector<8x128xf32> to vector<8x128xbf16>
    %c14 = arith.constant 14 : index
    %c0_132 = arith.constant 0 : index
    %c0_133 = arith.constant 0 : index
    %230 = vector.load %arg6[%c14, %c0_132, %c0_133] : memref<16x128x272xbf16, #tpu.memory_space<vmem>>, vector<1x128x272xbf16>
    %231 = vector.shape_cast %230 : vector<1x128x272xbf16> to vector<128x272xbf16>
    %cst_134 = arith.constant dense<0.000000e+00> : vector<8x272xf32>
    %232 = tpu.matmul %229, %231, %cst_134 {dimension_numbers = #tpu.dot_dimension_numbers<[1], [0], [0], [1], [0, 0, 1, 1], [], []>} : vector<8x128xbf16>, vector<128x272xbf16>, vector<8x272xf32> -> vector<8x272xf32>
    %233 = arith.addf %211, %232 : vector<8x272xf32>
    %234 = vector.extract_strided_slice %227 {offsets = [8, 0], sizes = [8, 128], strides = [1, 1]} : vector<16x128xf32> to vector<8x128xf32>
    %235 = arith.truncf %234 : vector<8x128xf32> to vector<8x128xbf16>
    %c15 = arith.constant 15 : index
    %c0_135 = arith.constant 0 : index
    %c0_136 = arith.constant 0 : index
    %236 = vector.load %arg6[%c15, %c0_135, %c0_136] : memref<16x128x272xbf16, #tpu.memory_space<vmem>>, vector<1x128x272xbf16>
    %237 = vector.shape_cast %236 : vector<1x128x272xbf16> to vector<128x272xbf16>
    %cst_137 = arith.constant dense<0.000000e+00> : vector<8x272xf32>
    %238 = tpu.matmul %235, %237, %cst_137 {dimension_numbers = #tpu.dot_dimension_numbers<[1], [0], [0], [1], [0, 0, 1, 1], [], []>} : vector<8x128xbf16>, vector<128x272xbf16>, vector<8x272xf32> -> vector<8x272xf32>
    %239 = arith.addf %233, %238 : vector<8x272xf32>
    %c0_138 = arith.constant 0 : index
    %c0_139 = arith.constant 0 : index
    %240 = vector.load %arg7[%c0_138, %c0_139] : memref<1x272xf32, #tpu.memory_space<vmem>>, vector<1x272xf32>
    %241 = vector.broadcast %240 : vector<1x272xf32> to vector<8x272xf32>
    %242 = arith.addf %239, %241 : vector<8x272xf32>
    %cst_140 = arith.constant 0.000000e+00 : f32
    %243 = vector.broadcast %cst_140 : f32 to vector<8x272xf32>
    %244 = arith.cmpf ogt, %242, %243 : vector<8x272xf32>
    %cst_141 = arith.constant 0.000000e+00 : f32
    %245 = vector.broadcast %cst_141 : f32 to vector<8x272xf32>
    %246 = arith.minimumf %242, %245 : vector<8x272xf32>
    %247 = math.exp %246 : vector<8x272xf32>
    %cst_142 = arith.constant 1.000000e+00 : f32
    %248 = vector.broadcast %cst_142 : f32 to vector<8x272xf32>
    %249 = arith.subf %247, %248 : vector<8x272xf32>
    %250 = arith.select %244, %242, %249 : vector<8x272xi1>, vector<8x272xf32>
    %251 = arith.truncf %250 : vector<8x272xf32> to vector<8x272xbf16>
    %c0_143 = arith.constant 0 : index
    %c0_144 = arith.constant 0 : index
    %252 = vector.load %arg8[%c0_143, %c0_144] : memref<272x128xbf16, #tpu.memory_space<vmem>>, vector<272x128xbf16>
    %cst_145 = arith.constant dense<0.000000e+00> : vector<8x128xf32>
    %253 = tpu.matmul %251, %252, %cst_145 {dimension_numbers = #tpu.dot_dimension_numbers<[1], [0], [0], [1], [0, 0, 1, 1], [], []>} : vector<8x272xbf16>, vector<272x128xbf16>, vector<8x128xf32> -> vector<8x128xf32>
    %c0_146 = arith.constant 0 : index
    %c0_147 = arith.constant 0 : index
    %254 = vector.load %arg9[%c0_146, %c0_147] : memref<1x128xf32, #tpu.memory_space<vmem>>, vector<1x128xf32>
    %255 = vector.broadcast %254 : vector<1x128xf32> to vector<8x128xf32>
    %256 = arith.addf %253, %255 : vector<8x128xf32>
    %c0_148 = arith.constant 0 : index
    %c0_149 = arith.constant 0 : index
    %257 = vector.load %arg10[%c0_148, %c0_149] : memref<8x128xf32, #tpu.memory_space<vmem>>, vector<8x128xf32>
    tpu.vector_store %arg10[%c0_148, %c0_149], %256 {strides = array<i32>} : memref<8x128xf32, #tpu.memory_space<vmem>>, vector<8x128xf32>,
    return
  }
  func.func @transform_0(%arg0: i32) -> (i32, i32) {
    %c0_i32 = arith.constant 0 : i32
    %c0_i32_0 = arith.constant 0 : i32
    return %arg0, %c0_i32 : i32, i32
  }
  func.func @transform_1(%arg0: i32) -> (i32, i32) {
    %c0_i32 = arith.constant 0 : i32
    %c0_i32_0 = arith.constant 0 : i32
    %c0_i32_1 = arith.constant 0 : i32
    return %c0_i32, %c0_i32_0 : i32, i32
  }
  func.func @transform_2(%arg0: i32) -> (i32, i32) {
    %c0_i32 = arith.constant 0 : i32
    %c0_i32_0 = arith.constant 0 : i32
    %c0_i32_1 = arith.constant 0 : i32
    return %c0_i32, %c0_i32_0 : i32, i32
  }
  func.func @transform_3(%arg0: i32) -> (i32, i32, i32) {
    %c0_i32 = arith.constant 0 : i32
    %c0_i32_0 = arith.constant 0 : i32
    %c0_i32_1 = arith.constant 0 : i32
    %c0_i32_2 = arith.constant 0 : i32
    return %c0_i32, %c0_i32_0, %c0_i32_1 : i32, i32, i32
  }
  func.func @transform_4(%arg0: i32) -> (i32, i32, i32) {
    %c0_i32 = arith.constant 0 : i32
    %c0_i32_0 = arith.constant 0 : i32
    %c0_i32_1 = arith.constant 0 : i32
    %c0_i32_2 = arith.constant 0 : i32
    return %c0_i32, %c0_i32_0, %c0_i32_1 : i32, i32, i32
  }
  func.func @transform_5(%arg0: i32) -> (i32, i32, i32) {
    %c0_i32 = arith.constant 0 : i32
    %c0_i32_0 = arith.constant 0 : i32
    %c0_i32_1 = arith.constant 0 : i32
    %c0_i32_2 = arith.constant 0 : i32
    return %c0_i32, %c0_i32_0, %c0_i32_1 : i32, i32, i32
  }
  func.func @transform_6(%arg0: i32) -> (i32, i32) {
    %c0_i32 = arith.constant 0 : i32
    %c0_i32_0 = arith.constant 0 : i32
    %c0_i32_1 = arith.constant 0 : i32
    return %c0_i32, %c0_i32_0 : i32, i32
  }
  func.func @transform_7(%arg0: i32) -> (i32, i32) {
    %c0_i32 = arith.constant 0 : i32
    %c0_i32_0 = arith.constant 0 : i32
    %c0_i32_1 = arith.constant 0 : i32
    return %c0_i32, %c0_i32_0 : i32, i32
  }
  func.func @transform_8(%arg0: i32) -> (i32, i32) {
    %c0_i32 = arith.constant 0 : i32
    %c0_i32_0 = arith.constant 0 : i32
    %c0_i32_1 = arith.constant 0 : i32
    return %c0_i32, %c0_i32_0 : i32, i32
  }
  func.func @transform_9(%arg0: i32) -> (i32, i32) {
    %c0_i32 = arith.constant 0 : i32
    %c0_i32_0 = arith.constant 0 : i32
    return %arg0, %c0_i32 : i32, i32
  }
}

</mosaic_0001>

<bundles_post_ra>
// kernel: tpu_custom_call.1
= control target key start
LH: loop header
LB: loop body
LE: loop exit
PB: predicated region body
PF: predicated region fallthrough
CT: control target
= control target key end

     0   :  { %v10841_v6 = vmov 0   ;;  %vm296_vm0 = vcmask 523264   ;;  %v10843_v37 = vmov 0.0   ;;  %vm8278_vm1 = vmmov 0   ;;  %s10828_s0 = inlined_call_operand.vmem [shape: bf16[64,64], index: 0, kind: input, shape index: {}]   ;;  %s10829_s1 = inlined_call_operand.vmem [shape: bf16[64,1024], index: 1, kind: input, shape index: {}]   ;;  %s10830_s2 = inlined_call_operand.vmem [shape: f32[1,1024], index: 2, kind: input, shape index: {}]   ;;  %s10831_s3 = inlined_call_operand.vmem [shape: bf16[8,16,64], index: 3, kind: input, shape index: {}]   ;;  %s10832_s4 = inlined_call_operand.vmem [shape: f32[8,16,1], index: 4, kind: input, shape index: {}]   ;;  %s10833_s5 = inlined_call_operand.vmem [shape: bf16[16,128,272], index: 5, kind: input, shape index: {}]   ;;  %s10834_s6 = inlined_call_operand.vmem [shape: f32[1,272], index: 6, kind: input, shape index: {}]   ;;  %s10835_s7 = inlined_call_operand.vmem [shape: bf16[272,128], index: 7, kind: input, shape index: {}]   ;;  %s10836_s8 = inlined_call_operand.vmem [shape: f32[1,128], index: 8, kind: input, shape index: {}]   ;;  %s10837_s9 = inlined_call_operand.hbm [shape: f32[8,128], index: 9, kind: output, shape index: {}]  }
   0x1   :  { %v42_v0 = vld [vmem:[%s10829_s1] sm:$0xff]  ;;  %341 = vmatprep.mubr.bf16.mxu0 %v10841_v6  ;;  %7539 = vset.pattern.permute.xlu0 %v10841_v6  ;;  %v44_v15 = vld [vmem:[%s10829_s1 + $0x10] sm:$0xff]  ;;  %v7542_v28 = vld [vmem:[%s10828_s0 + $0x8] sm:$0xff]  }
   0x2   :  { %v46_v1 = vld [vmem:[%s10829_s1 + $0x20] sm:$0xff]  ;;  %414 = vmatprep.mubr.bf16.mxu1 %v10841_v6  ;;  %7540 = vset.pattern.permute.xlu1 %v10841_v6  ;;  %v48_v16 = vld [vmem:[%s10829_s1 + $0x30] sm:$0xff]  ;;  %v7544_v32 = vld [vmem:[%s10828_s0 + $0x18] sm:$0xff]  }
   0x3   :  { %v50_v2 = vld [vmem:[%s10829_s1 + $0x40] sm:$0xff]  ;;  %v5848_v3 = vcombine.high %v42_v0, %v46_v1  ;;  %v5847_v4 = vcombine.low %v42_v0, %v46_v1  ;;  %v52_v19 = vld [vmem:[%s10829_s1 + $0x50] sm:$0xff]  ;;  %v5852_v22 = vcombine.high %v44_v15, %v48_v16  ;;  %v5851_v23 = vcombine.low %v44_v15, %v48_v16  ;;  %v1020_v38 = vld [vmem:[%s10832_s4 + $0x8] sm:$0xff] }
   0x4   :  { %v54_v5 = vld [vmem:[%s10829_s1 + $0x60] sm:$0xff]  ;;  %v56_v20 = vld [vmem:[%s10829_s1 + $0x70] sm:$0xff]  ;;  %1028 = vperm.xlu0 %7539, %v1020_v38   ;;  %v43_v40 = vld [vmem:[%s10829_s1 + $0x8] sm:$0xff] }
   0x5   :  { %v5856_v7 = vcombine.high %v50_v2, %v54_v5  ;;  %v58_v8 = vld [vmem:[%s10829_s1 + $0x80] sm:$0xff]  ;;  %309 = vmatprep.subr.bf16.mxu0 %v5848_v3  ;;  %v5855_v10 = vcombine.low %v50_v2, %v54_v5  ;;  %v60_v24 = vld [vmem:[%s10829_s1 + $0x90] sm:$0xff]  ;;  %v5860_v26 = vcombine.high %v52_v19, %v56_v20  ;;  %v5859_v27 = vcombine.low %v52_v19, %v56_v20  ;;  %v47_v41 = vld [vmem:[%s10829_s1 + $0x28] sm:$0xff] }
   0x6   :  { %v62_v9 = vld [vmem:[%s10829_s1 + $0xa0] sm:$0xff]  ;;  %310 = vmatpush1.bf16.msra.mxu0 %v5847_v4  ;;  %v64_v25 = vld [vmem:[%s10829_s1 + $0xb0] sm:$0xff]  ;;  %v51_v42 = vld [vmem:[%s10829_s1 + $0x48] sm:$0xff]  ;;  %v5850_v45 = vcombine.high %v43_v40, %v47_v41  ;;  %v5849_v46 = vcombine.low %v43_v40, %v47_v41 }
   0x7   :  { %311 = vmatprep.subr.bf16.mxu0 %v5856_v7  ;;  %v5864_v11 = vcombine.high %v58_v8, %v62_v9  ;;  %v66_v12 = vld [vmem:[%s10829_s1 + $0xc0] sm:$0xff]  ;;  %v5863_v14 = vcombine.low %v58_v8, %v62_v9  ;;  %v5868_v29 = vcombine.high %v60_v24, %v64_v25  ;;  %v5867_v30 = vcombine.low %v60_v24, %v64_v25  ;;  %v7543_v31 = vld [vmem:[%s10828_s0 + $0x10] sm:$0xff]   ;;  %v55_v43 = vld [vmem:[%s10829_s1 + $0x68] sm:$0xff] }
   0x8   :  { %v70_v13 = vld [vmem:[%s10829_s1 + $0xe0] sm:$0xff]  ;;  %v68_v33 = vld [vmem:[%s10829_s1 + $0xd0] sm:$0xff]  ;;  %v5858_v47 = vcombine.high %v51_v42, %v55_v43  ;;  %v59_v48 = vld [vmem:[%s10829_s1 + $0x88] sm:$0xff]  ;;  %382 = vmatprep.subr.bf16.mxu1 %v5850_v45  ;;  %v5857_v50 = vcombine.low %v51_v42, %v55_v43 }
   0x9   :  { %v5872_v17 = vcombine.high %v66_v12, %v70_v13  ;;  %v5871_v18 = vcombine.low %v66_v12, %v70_v13  ;;  %v7541_v21 = vld [vmem:[%s10828_s0] sm:$0xff]   ;;  %v72_v34 = vld [vmem:[%s10829_s1 + $0xf0] sm:$0xff]  ;;  %v63_v49 = vld [vmem:[%s10829_s1 + $0xa8] sm:$0xff]  ;;  %383 = vmatpush1.bf16.msra.mxu1 %v5849_v46 }
   0xa   :  { %312 = vmatpush1.bf16.msra.mxu0 %v5855_v10  ;;  %v5876_v35 = vcombine.high %v68_v33, %v72_v34  ;;  %v5875_v36 = vcombine.low %v68_v33, %v72_v34  ;;  %v1019_v39 = vld [vmem:[%s10832_s4] sm:$0xff]  ;;  %v67_v51 = vld [vmem:[%s10829_s1 + $0xc8] sm:$0xff]  ;;  %v6285_v53 = vld [vmem:[%s10832_s4 + $0x30] sm:$0xff]  ;;  %384 = vmatprep.subr.bf16.mxu1 %v5858_v47  ;;  %v5866_v54 = vcombine.high %v59_v48, %v63_v49 }
   0xb   :  { %313 = vmatprep.subr.bf16.mxu0 %v5864_v11  ;;  %v6165_v44 = vld [vmem:[%s10832_s4 + $0x20] sm:$0xff]  ;;  %1023 = vperm.xlu0 %7539, %v1019_v39   ;;  %v71_v52 = vld [vmem:[%s10829_s1 + $0xe8] sm:$0xff]  ;;  %v5865_v55 = vcombine.low %v59_v48, %v63_v49  ;;  %v6525_v59 = vld [vmem:[%s10832_s4 + $0x50] sm:$0xff] }
   0xc   :  { %v6405_v56 = vld [vmem:[%s10832_s4 + $0x40] sm:$0xff]  ;;  %v5874_v57 = vcombine.high %v67_v51, %v71_v52  ;;  %v5873_v58 = vcombine.low %v67_v51, %v71_v52  ;;  %v6765_v62 = vld [vmem:[%s10832_s4 + $0x70] sm:$0xff]  ;;  %v8468_v63 = vld [vmem:[%s10828_s0 + $0x8] sm:$0xff]  }
   0xd   :  { %385 = vmatpush1.bf16.msra.mxu1 %v5857_v50  ;;  %v6645_v60 = vld [vmem:[%s10832_s4 + $0x60] sm:$0xff]  ;;  %v8476_v0 = vld [vmem:[%s10828_s0 + $0x10] sm:$0xff]  }
   0xe   :  { %314 = vmatpush1.bf16.msra.mxu0 %v5863_v14  ;;  %386 = vmatprep.subr.bf16.mxu1 %v5866_v54  ;;  %v8248_v61 = vld [vmem:[%s10828_s0] sm:$0xff]  }
   0xf   :  { %315 = vmatprep.subr.bf16.mxu0 %v5872_v17  ;;  %2154 = vperm.xlu0 %7539, %v6165_v44  }
  0x11   :  { %387 = vmatpush1.bf16.msra.mxu1 %v5865_v55 }
  0x12   :  { %316 = vmatpush1.bf16.msra.mxu0 %v5871_v18  ;;  %388 = vmatprep.subr.bf16.mxu1 %v5874_v57 }
  0x13   :  { %455 = vmatprep.subr.bf16.mxu0 %v5852_v22  ;;  %2723 = vperm.xlu0 %7539, %v6285_v53  }
  0x15   :  { %5879 = vmatmul.mubr.msk.bf16.vlgmr.msra.gmra.mrb[0].mxu0 %vm296_vm0, %v7541_v21  ;;  %389 = vmatpush1.bf16.msra.mxu1 %v5873_v58 }
  0x16   :  { %351 = vmatprep.mubr.bf16.mxu0 %v10841_v6  ;;  %456 = vmatpush1.bf16.msra.mxu0 %v5851_v23 }
  0x17   :  { %457 = vmatprep.subr.bf16.mxu0 %v5860_v26  ;;  %3292 = vperm.xlu0 %7539, %v6405_v56  }
  0x18   :  { %5883 = vmatmul.mubr.msk.bf16.vlgmr.msra.gmra.mrb[0].mxu1 %vm296_vm0, %v8248_v61 }
  0x19   :  { %424 = vmatprep.mubr.bf16.mxu1 %v10841_v6 }
  0x1a   :  { %458 = vmatpush1.bf16.msra.mxu0 %v5859_v27 }
  0x1b   :  { %459 = vmatprep.subr.bf16.mxu0 %v5868_v29  ;;  %3861 = vperm.xlu0 %7539, %v6525_v59  }
  0x1d   :  { %5880 = vmatmul.mubr.msk.bf16.gmra.mrb[4].mxu0 %vm296_vm0, %v7542_v28 }
  0x1e   :  { %361 = vmatprep.mubr.bf16.mxu0 %v10841_v6  ;;  %460 = vmatpush1.bf16.msra.mxu0 %v5867_v30 }
  0x1f   :  { %461 = vmatprep.subr.bf16.mxu0 %v5876_v35  ;;  %4430 = vperm.xlu0 %7539, %v6645_v60  }
  0x20   :  { %5884 = vmatmul.mubr.msk.bf16.gmra.mrb[4].mxu1 %vm296_vm0, %v8468_v63 }
  0x21   :  { %434 = vmatprep.mubr.bf16.mxu1 %v10841_v6 }
  0x22   :  { %462 = vmatpush1.bf16.msra.mxu0 %v5875_v36 }
  0x23   :  { %7113 = vmatprep.subr.bf16.mxu0 %v10843_v37  ;;  %4999 = vperm.xlu0 %7539, %v6765_v62  }
  0x25   :  { %5881 = vmatmul.mubr.msk.bf16.gmra.mrb[8].mxu0 %vm296_vm0, %v7543_v31 }
  0x26   :  { %371 = vmatprep.mubr.bf16.mxu0 %v10841_v6 }
  0x28   :  { %5885 = vmatmul.mubr.msk.bf16.gmra.mrb[8].mxu1 %vm296_vm0, %v8476_v0 }
  0x29   :  { %444 = vmatprep.mubr.bf16.mxu1 %v10841_v6 }
  0x2d   :  { %5882 = vmatmul.mubr.msk.bf16.gmra.mrb[12].mxu0 %vm296_vm0, %v7544_v32 }
  0x2e   :  { %487 = vmatprep.mubr.bf16.mxu0 %v10841_v6 }
  0x35   :  { %5887 = vmatmul.mubr.msk.bf16.vlgmr.msra.gmra.mrb[16].mxu0 %vm296_vm0, %v7541_v21 }
  0x36   :  { %497 = vmatprep.mubr.bf16.mxu0 %v10841_v6 }
  0x3d   :  { %5888 = vmatmul.mubr.msk.bf16.gmra.mrb[20].mxu0 %vm296_vm0, %v7542_v28 }
  0x3e   :  { %507 = vmatprep.mubr.bf16.mxu0 %v10841_v6 }
  0x45   :  { %5889 = vmatmul.mubr.msk.bf16.gmra.mrb[24].mxu0 %vm296_vm0, %v7543_v31 }
  0x46   :  { %517 = vmatprep.mubr.bf16.mxu0 %v10841_v6 }
  0x4d   :  { %5890 = vmatmul.mubr.msk.bf16.gmra.mrb[28].mxu0 %vm296_vm0, %v7544_v32 }
  0x4e   :  { %7121 = vmatprep.mubr.msk.bf16.mxu0 %vm8278_vm1, %v10843_v37 }
  0x4f   :  { %14 = vsyncpa [#allocation3], 0  ;;  %v8484_v1 = vld [vmem:[%s10828_s0 + $0x18] sm:$0xff]   ;;  %v76_v4 = vlaneseq  ;;  %v8513_v18 = vld [vmem:[%s10830_s2] sm:$0xff]  ;;  %s8279_s26 = smov [#allocation2]  }
  0x50   :  { %5886 = vmatmul.mubr.msk.bf16.gmra.mrb[12].mxu1 %vm296_vm0, %v8484_v1  ;;  %v45_v2 = vld [vmem:[%s10829_s1 + $0x18] sm:$0xff]  ;;  %v7546_v41 = vld [vmem:[%s10833_s5 + $0xc0] ss:$12 sps:$4 sm:$0xff]   ;;  %v7548_v43 = vld [vmem:[%s10833_s5 + $0xc4] ss:$12 sps:$4 sm:$0xff]   ;;  %s5835_s27 = sshll.u32 %s8279_s26, 4  ;;  %s5836_s27 = int_to_ptr.vmem [resolvable:$true] %s5835_s27 }
  0x51   :  { %560 = vmatprep.mubr.bf16.mxu1 %v10841_v6  ;;  %v49_v3 = vld [vmem:[%s10829_s1 + $0x38] sm:$0xff]  ;;  %v8501_v12 = vshrl.u32 %v76_v4, 7  ;;  %s8252_s28 = scalar_lea.vmem %s5836_s27, 128  ;;  %p8257_p1 = scmp.lt.s32.totalorder %s5836_s27, %s5836_s27 }
  0x52   :  { %v5853_v5 = vcombine.low %v45_v2, %v49_v3  ;;  %v5854_v7 = vcombine.high %v45_v2, %v49_v3  ;;  %v53_v8 = vld [vmem:[%s10829_s1 + $0x58] sm:$0xff]  ;;  %p8253_p0 = scmp.ne.s32.totalorder %s5836_s27, %s8252_s28  ;;  %p8258_p2 = scmp.lt.s32.totalorder %s8252_s28, %s8252_s28 }
  0x53   :  { %v57_v9 = vld [vmem:[%s10829_s1 + $0x78] sm:$0xff]  ;;  %10858 = vst [vmem:[#allocation5_spill] sm:$0xff] %v8501_v12  ;;  %v10840_v15 = vsub.s32 0, %v8501_v12  ;;  %v10838_v19 = vsub.s32 1, %v8501_v12 }
  0x54   :  { %528 = vmatprep.subr.bf16.mxu1 %v5854_v7  ;;  %v5861_v10 = vcombine.low %v53_v8, %v57_v9  ;;  %v5862_v11 = vcombine.high %v53_v8, %v57_v9  ;;  %v61_v13 = vld [vmem:[%s10829_s1 + $0x98] sm:$0xff]  ;;  %p8259_p3 = por %p8258_p2, %p8257_p1 }
  0x55   :  { %529 = vmatpush1.bf16.msra.mxu1 %v5853_v5  ;;  %v65_v14 = vld [vmem:[%s10829_s1 + $0xb8] sm:$0xff]  ;;  %v8519_v20 = vrot.slane %v8513_v18, %v10840_v15  ;;  %v8524_v21 = vrot.slane %v8513_v18, %v10838_v19 }
  0x56   :  { %530 = vmatprep.subr.bf16.mxu1 %v5862_v11  ;;  %v5869_v16 = vcombine.low %v61_v13, %v65_v14  ;;  %v5870_v17 = vcombine.high %v61_v13, %v65_v14  ;;  %v69_v22 = vld [vmem:[%s10829_s1 + $0xd8] sm:$0xff]  ;;  %p8260_p4 = pnand %p8259_p3, %p8253_p0 }
  0x57   :  { %v73_v23 = vld [vmem:[%s10829_s1 + $0xf8] sm:$0xff] }
  0x58   :  { %v5877_v24 = vcombine.low %v69_v22, %v73_v23  ;;  %v5878_v25 = vcombine.high %v69_v22, %v73_v23  ;;  %v7552_v48 = vld [vmem:[%s10833_s5 + $0xdc] ss:$12 sps:$4 sm:$0xff]   ;;  %v7550_v51 = vld [vmem:[%s10833_s5 + $0xd8] ss:$12 sps:$4 sm:$0xff]  }
  0x59   :  { %531 = vmatpush1.bf16.msra.mxu1 %v5861_v10 }
  0x5a   :  { %532 = vmatprep.subr.bf16.mxu1 %v5870_v17 }
  0x5d   :  { %533 = vmatpush1.bf16.msra.mxu1 %v5869_v16 }
  0x5e   :  { %534 = vmatprep.subr.bf16.mxu1 %v5878_v25 }
  0x61   :  { %535 = vmatpush1.bf16.msra.mxu1 %v5877_v24 }
  0x62   :  { %1287 = vmatprep.subr.bf16.mxu1 %v7548_v43 }
  0x64   :  { %5891 = vmatmul.mubr.msk.bf16.vlgmr.msra.gmra.mrb[16].mxu1 %vm296_vm0, %v8248_v61 }
  0x65   :  { %570 = vmatprep.mubr.bf16.mxu1 %v10841_v6  ;;  %1288 = vmatpush1.bf16.msra.mxu1 %v7546_v41 }
  0x66   :  { %1289 = vmatprep.subr.bf16.mxu1 %v7552_v48 }
  0x69   :  { %1290 = vmatpush1.bf16.msra.mxu1 %v7550_v51 }
  0x6c   :  { %5892 = vmatmul.mubr.msk.bf16.gmra.mrb[20].mxu1 %vm296_vm0, %v8468_v63 }
  0x6d   :  { %580 = vmatprep.mubr.bf16.mxu1 %v10841_v6 }
  0x74   :  { %5893 = vmatmul.mubr.msk.bf16.gmra.mrb[24].mxu1 %vm296_vm0, %v8476_v0 }
  0x75   :  { %590 = vmatprep.mubr.bf16.mxu1 %v10841_v6 }
  0x7c   :  { %5894 = vmatmul.mubr.msk.bf16.gmra.mrb[28].mxu1 %vm296_vm0, %v8484_v1 }
  0x7d   :  { %1319 = vmatprep.mubr.bf16.mxu1 %v10841_v6 }
  0xe8   :  { %v343_v26 = vpop.f32.mrb[0].mxu0 }
  0xe9   :  { %v8533_v27 = vadd.f32 %v343_v26, %v8519_v20  ;;  %v345_v28 = vpop.f32.mrb[1].mxu0 }
  0xea   :  { %v8536_v29 = vadd.f32 %v345_v28, %v8524_v21  ;;  %v347_v30 = vpop.f32.mrb[2].mxu0 }
  0xeb   :  { %v665_v31 = vmin.f32 %v8533_v27, 0.0  ;;  %v8540_v32 = vadd.f32 %v347_v30, %v8519_v20  ;;  %v349_v33 = vpop.f32.mrb[3].mxu0  ;;  %vm601_vm2 = vcmp.gt.f32.partialorder %v8533_v27, 0.0 }
  0xec   :  { %v666_v34 = vmin.f32 %v8536_v29, 0.0  ;;  %v8544_v35 = vadd.f32 %v349_v33, %v8524_v21  ;;  %vm602_vm3 = vcmp.gt.f32.partialorder %v8536_v29, 0.0 }
  0xed   :  { %v729_v36 = vmul.f32 1.442695, %v665_v31  ;;  %v673_v38 = vmin.f32 %v8540_v32, 0.0  ;;  %vm609_vm4 = vcmp.gt.f32.partialorder %v8540_v32, 0.0 }
  0xee   :  { %v731_v39 = vmul.f32 1.442695, %v666_v34  ;;  %v674_v40 = vmin.f32 %v8544_v35, 0.0  ;;  %vm610_vm5 = vcmp.gt.f32.partialorder %v8544_v35, 0.0 }
  0xef   :  { %8082 = vpow2.f32 %v729_v36  ;;  %v745_v42 = vmul.f32 1.442695, %v673_v38 }
  0xf0   :  { %8084 = vpow2.f32 %v731_v39  ;;  %v747_v44 = vmul.f32 1.442695, %v674_v40  ;;  %v353_v45 = vpop.f32.mrb[4].mxu0 }
  0xf1   :  { %8086 = vpow2.f32 %v745_v42  ;;  %v8557_v46 = vadd.f32 %v353_v45, %v8519_v20  ;;  %v355_v47 = vpop.f32.mrb[5].mxu0 }
  0xf2   :  { %8088 = vpow2.f32 %v747_v44  ;;  %v8563_v49 = vadd.f32 %v355_v47, %v8524_v21  ;;  %v357_v50 = vpop.f32.mrb[6].mxu0 }
  0xf3   :  { %v681_v52 = vmin.f32 %v8557_v46, 0.0  ;;  %v8570_v53 = vadd.f32 %v357_v50, %v8519_v20  ;;  %v359_v54 = vpop.f32.mrb[7].mxu0  ;;  %vm617_vm6 = vcmp.gt.f32.partialorder %v8557_v46, 0.0 }
  0xf4   :  { %v682_v55 = vmin.f32 %v8563_v49, 0.0  ;;  %v8574_v56 = vadd.f32 %v359_v54, %v8524_v21  ;;  %vm618_vm7 = vcmp.gt.f32.partialorder %v8563_v49, 0.0 }
  0xf5   :  { %v761_v57 = vmul.f32 1.442695, %v681_v52  ;;  %v689_v58 = vmin.f32 %v8570_v53, 0.0  ;;  %vm625_vm8 = vcmp.gt.f32.partialorder %v8570_v53, 0.0 }
  0xf6   :  { %v763_v59 = vmul.f32 1.442695, %v682_v55  ;;  %v690_v60 = vmin.f32 %v8574_v56, 0.0  ;;  %vm626_vm9 = vcmp.gt.f32.partialorder %v8574_v56, 0.0 }
  0xf7   :  { %8090 = vpow2.f32 %v761_v57  ;;  %v777_v61 = vmul.f32 1.442695, %v689_v58 }
  0xf8   :  { %8092 = vpow2.f32 %v763_v59  ;;  %v779_v62 = vmul.f32 1.442695, %v690_v60  ;;  %v363_v2 = vpop.f32.mrb[8].mxu0 }
  0xf9   :  { %v8083_v3 = vpop.eup %8082  ;;  %8094 = vpow2.f32 %v777_v61  ;;  %v8582_v4 = vadd.f32 %v363_v2, %v8519_v20  ;;  %v365_v5 = vpop.f32.mrb[9].mxu0 }
  0xfa   :  { %v8085_v7 = vpop.eup %8084  ;;  %v5895_v8 = vadd.f32 -1.0, %v8083_v3  ;;  %8096 = vpow2.f32 %v779_v62  ;;  %v8585_v63 = vadd.f32 %v365_v5, %v8524_v21  ;;  %v367_v9 = vpop.f32.mrb[10].mxu0 }
  0xfb   :  { %v8087_v10 = vpop.eup %8086  ;;  %v5896_v11 = vadd.f32 -1.0, %v8085_v7  ;;  %v697_v13 = vmin.f32 %v8582_v4, 0.0  ;;  %v8590_v14 = vadd.f32 %v367_v9, %v8519_v20  ;;  %v369_v16 = vpop.f32.mrb[11].mxu0  ;;  %vm633_vm10 = vcmp.gt.f32.partialorder %v8582_v4, 0.0 }
  0xfc   :  { %v8089_v17 = vpop.eup %8088  ;;  %v5903_v22 = vadd.f32 -1.0, %v8087_v10  ;;  %v698_v23 = vmin.f32 %v8585_v63, 0.0  ;;  %v921_v24 = vsel %vm601_vm2, %v8533_v27, %v5895_v8  ;;  %v8602_v33 = vadd.f32 %v369_v16, %v8524_v21 }
  0xfd   :  { %v5904_v25 = vadd.f32 -1.0, %v8089_v17  ;;  %v793_v26 = vmul.f32 1.442695, %v697_v13  ;;  %v705_v31 = vmin.f32 %v8590_v14, 0.0  ;;  %v8606_v34 = vsel %vm602_vm3, %v8536_v29, %v5896_v11 }
  0xfe   :  { %v929_v28 = vsel %vm609_vm4, %v8540_v32, %v5903_v22  ;;  %v795_v30 = vmul.f32 1.442695, %v698_v23  ;;  %v706_v40 = vmin.f32 %v8602_v33, 0.0  ;;  %vm641_vm11 = vcmp.gt.f32.partialorder %v8590_v14, 0.0 }
  0xff   :  { %v985_v27 = vpack.c.bf16 %v929_v28, %v921_v24  ;;  %v8609_v36 = vsel %vm610_vm5, %v8544_v35, %v5904_v25  ;;  %8098 = vpow2.f32 %v793_v26  ;;  %v809_v32 = vmul.f32 1.442695, %v705_v31 }
 0x100   :  { %v373_v38 = vpop.f32.mrb[12].mxu0  ;;  %8100 = vpow2.f32 %v795_v30  ;;  %v811_v48 = vmul.f32 1.442695, %v706_v40  ;;  %vm634_vm12 = vcmp.gt.f32.partialorder %v8585_v63, 0.0  ;;  %vm642_vm13 = vcmp.gt.f32.partialorder %v8602_v33, 0.0 }
 0x101   :  { %v8091_v39 = vpop.eup %8090  ;;  %v8615_v41 = vadd.f32 %v373_v38, %v8519_v20  ;;  %v375_v42 = vpop.f32.mrb[13].mxu0  ;;  %7114 = vmatpush3.bf16.msra.mxu0 %v985_v27  ;;  %8102 = vpow2.f32 %v809_v32 }
 0x102   :  { %v8093_v29 = vpop.eup %8092  ;;  %v5911_v35 = vadd.f32 -1.0, %v8091_v39  ;;  %v8619_v43 = vadd.f32 %v375_v42, %v8524_v21  ;;  %v377_v44 = vpop.f32.mrb[14].mxu0  ;;  %7115 = vmatprep.subr.bf16.mxu0 %v10843_v37  ;;  %8104 = vpow2.f32 %v811_v48 }
 0x103   :  { %v8095_v45 = vpop.eup %8094  ;;  %v5912_v47 = vadd.f32 -1.0, %v8093_v29  ;;  %v713_v50 = vmin.f32 %v8615_v41, 0.0  ;;  %v379_v51 = vpop.f32.mrb[15].mxu0  ;;  %v378_v62 = vadd.f32 %v377_v44, %v8519_v20  ;;  %vm649_vm14 = vcmp.gt.f32.partialorder %v8615_v41, 0.0 }
 0x104   :  { %v8097_v52 = vpop.eup %8096  ;;  %v5919_v54 = vadd.f32 -1.0, %v8095_v45  ;;  %v714_v55 = vmin.f32 %v8619_v43, 0.0  ;;  %v937_v57 = vsel %vm617_vm6, %v8557_v46, %v5911_v35  ;;  %v380_v2 = vadd.f32 %v379_v51, %v8524_v21  ;;  %v7545_v35 = vld [vmem:[%s10831_s3] sm:$0xff]  }
 0x105   :  { %v5920_v58 = vadd.f32 -1.0, %v8097_v52  ;;  %v825_v59 = vmul.f32 1.442695, %v713_v50  ;;  %v8639_v3 = vsel %vm618_vm7, %v8563_v49, %v5912_v47  ;;  %vm657_vm15 = vcmp.gt.f32.partialorder %v378_v62, 0.0 }
 0x106   :  { %v945_v60 = vsel %vm625_vm8, %v8570_v53, %v5919_v54  ;;  %v827_v61 = vmul.f32 1.442695, %v714_v55  ;;  %v721_v53 = vmin.f32 %v378_v62, 0.0  ;;  %v722_v20 = vmin.f32 %v380_v2, 0.0 }
 0x107   :  { %v993_v46 = vpack.c.bf16 %v945_v60, %v937_v57  ;;  %v8642_v5 = vsel %vm626_vm9, %v8574_v56, %v5920_v58  ;;  %8106 = vpow2.f32 %v825_v59  ;;  %vm650_vm2 = vcmp.gt.f32.partialorder %v8619_v43, 0.0 }
 0x108   :  { %8108 = vpow2.f32 %v827_v61  ;;  %v841_v21 = vmul.f32 1.442695, %v721_v53  ;;  %v843_v49 = vmul.f32 1.442695, %v722_v20  ;;  %vm658_vm3 = vcmp.gt.f32.partialorder %v380_v2, 0.0  ;;  %v489_v50 = vpop.f32.mrb[16].mxu0 }
 0x109   :  { %v8099_v7 = vpop.eup %8098  ;;  %7116 = vmatpush3.bf16.msra.mxu0 %v993_v46  ;;  %v94_v44 = vsub.s32 4, %v8501_v12  ;;  %v98_v45 = vsub.s32 5, %v8501_v12  ;;  %v491_v52 = vpop.f32.mrb[17].mxu0 }
 0x10a   :  { %7117 = vmatprep.subr.bf16.mxu0 %v10843_v37  ;;  %v8101_v8 = vpop.eup %8100  ;;  %v5927_v9 = vadd.f32 -1.0, %v8099_v7  ;;  %8110 = vpow2.f32 %v841_v21  ;;  %v493_v55 = vpop.f32.mrb[18].mxu0 }
 0x10b   :  { %v8103_v10 = vpop.eup %8102  ;;  %8112 = vpow2.f32 %v843_v49  ;;  %v5928_v56 = vadd.f32 -1.0, %v8101_v8  ;;  %v8690_v47 = vrot.slane %v8513_v18, %v94_v44  ;;  %v8693_v48 = vrot.slane %v8513_v18, %v98_v45  ;;  %v495_v59 = vpop.f32.mrb[19].mxu0 }
 0x10c   :  { %v5935_v11 = vadd.f32 -1.0, %v8103_v10  ;;  %v8105_v13 = vpop.eup %8104  ;;  %v953_v16 = vsel %vm633_vm10, %v8582_v4, %v5927_v9 }
 0x10d   :  { %v5936_v23 = vadd.f32 -1.0, %v8105_v13  ;;  %v8654_v25 = vsel %vm634_vm12, %v8585_v63, %v5928_v56  ;;  %v490_v51 = vadd.f32 %v489_v50, %v8690_v47  ;;  %v492_v54 = vadd.f32 %v491_v52, %v8693_v48 }
 0x10e   :  { %v961_v17 = vsel %vm641_vm11, %v8590_v14, %v5935_v11  ;;  %v494_v58 = vadd.f32 %v493_v55, %v8690_v47  ;;  %v496_v61 = vadd.f32 %v495_v59, %v8693_v48 }
 0x10f   :  { %v1001_v22 = vpack.c.bf16 %v961_v17, %v953_v16  ;;  %v8657_v26 = vsel %vm642_vm13, %v8602_v33, %v5936_v23  ;;  %v669_v57 = vmin.f32 %v490_v51, 0.0  ;;  %v670_v60 = vmin.f32 %v492_v54, 0.0 }
 0x110   :  { %v678_v53 = vmin.f32 %v496_v61, 0.0  ;;  %v499_v21 = vpop.f32.mrb[20].mxu0  ;;  %vm605_vm4 = vcmp.gt.f32.partialorder %v490_v51, 0.0  ;;  %vm606_vm5 = vcmp.gt.f32.partialorder %v492_v54, 0.0  ;;  %vm613_vm6 = vcmp.gt.f32.partialorder %v494_v58, 0.0 }
 0x111   :  { %v8107_v24 = vpop.eup %8106  ;;  %7118 = vmatpush3.bf16.msra.mxu0 %v1001_v22  ;;  %v739_v46 = vmul.f32 1.442695, %v670_v60  ;;  %v8700_v8 = vadd.f32 %v499_v21, %v8690_v47  ;;  %v501_v9 = vpop.f32.mrb[21].mxu0  ;;  %vm614_vm7 = vcmp.gt.f32.partialorder %v496_v61, 0.0 }
 0x112   :  { %v8109_v28 = vpop.eup %8108  ;;  %7119 = vmatprep.subr.bf16.mxu0 %v10843_v37  ;;  %v5943_v14 = vadd.f32 -1.0, %v8107_v24  ;;  %v755_v20 = vmul.f32 1.442695, %v678_v53  ;;  %v8703_v49 = vadd.f32 %v501_v9, %v8693_v48  ;;  %v503_v10 = vpop.f32.mrb[22].mxu0 }
 0x113   :  { %v5944_v31 = vadd.f32 -1.0, %v8109_v28  ;;  %v685_v11 = vmin.f32 %v8700_v8, 0.0  ;;  %v8707_v56 = vadd.f32 %v503_v10, %v8690_v47  ;;  %v505_v13 = vpop.f32.mrb[23].mxu0  ;;  %vm621_vm8 = vcmp.gt.f32.partialorder %v8700_v8, 0.0 }
 0x114   :  { %v8111_v30 = vpop.eup %8110  ;;  %v969_v38 = vsel %vm649_vm14, %v8615_v41, %v5943_v14  ;;  %v7549_v41 = vld [vmem:[%s10833_s5 + $0xc8] ss:$12 sps:$4 sm:$0xff]   ;;  %v686_v16 = vmin.f32 %v8703_v49, 0.0  ;;  %v8711_v17 = vadd.f32 %v505_v13, %v8693_v48  ;;  %vm622_vm9 = vcmp.gt.f32.partialorder %v8703_v49, 0.0 }
 0x115   :  { %v8113_v27 = vpop.eup %8112  ;;  %v5951_v32 = vadd.f32 -1.0, %v8111_v30  ;;  %v8666_v39 = vsel %vm650_vm2, %v8619_v43, %v5944_v31  ;;  %v7553_v43 = vld [vmem:[%s10833_s5 + $0xe0] ss:$12 sps:$4 sm:$0xff]   ;;  %v769_v22 = vmul.f32 1.442695, %v685_v11  ;;  %v693_v23 = vmin.f32 %v8707_v56, 0.0 }
 0x116   :  { %v5952_v63 = vadd.f32 -1.0, %v8113_v27  ;;  %v771_v24 = vmul.f32 1.442695, %v686_v16  ;;  %v694_v28 = vmin.f32 %v8711_v17, 0.0  ;;  %vm629_vm10 = vcmp.gt.f32.partialorder %v8707_v56, 0.0 }
 0x117   :  { %v977_v33 = vsel %vm657_vm15, %v378_v62, %v5951_v32  ;;  %v737_v62 = vmul.f32 1.442695, %v669_v57  ;;  %v785_v14 = vmul.f32 1.442695, %v693_v23  ;;  %vm630_vm11 = vcmp.gt.f32.partialorder %v8711_v17, 0.0 }
 0x118   :  { %v1009_v40 = vpack.c.bf16 %v977_v33, %v969_v38  ;;  %v8668_v42 = vsel %vm658_vm3, %v380_v2, %v5952_v63  ;;  %v677_v2 = vmin.f32 %v494_v58, 0.0  ;;  %v787_v30 = vmul.f32 1.442695, %v694_v28  ;;  %v509_v31 = vpop.f32.mrb[24].mxu0 }
 0x119   :  { %8114 = vpow2.f32 %v737_v62  ;;  %v8716_v32 = vadd.f32 %v509_v31, %v8690_v47  ;;  %v511_v63 = vpop.f32.mrb[25].mxu0 }
 0x11a   :  { %7120 = vmatpush3.bf16.msra.mxu0 %v1009_v40  ;;  %v753_v7 = vmul.f32 1.442695, %v677_v2  ;;  %8116 = vpow2.f32 %v739_v46  ;;  %v8719_v40 = vadd.f32 %v511_v63, %v8693_v48 }
 0x11b   :  { %7125 = vmatprep.subr.bf16.mxu0 %v10843_v37  ;;  %v701_v44 = vmin.f32 %v8716_v32, 0.0  ;;  %vm637_vm12 = vcmp.gt.f32.partialorder %v8716_v32, 0.0 }
 0x11c   :  { %8118 = vpow2.f32 %v753_v7  ;;  %v702_v59 = vmin.f32 %v8719_v40, 0.0  ;;  %vm638_vm14 = vcmp.gt.f32.partialorder %v8719_v40, 0.0 }
 0x11d   :  { %7122 = vmatmul.mubr.msk.bf16.vlgmr.msra.gmra.mrb[32].mxu0 %vm296_vm0, %v7545_v35  ;;  %8120 = vpow2.f32 %v755_v20  ;;  %v513_v35 = vpop.f32.mrb[26].mxu0  ;;  %v801_v2 = vmul.f32 1.442695, %v701_v44 }
 0x11e   :  { %7126 = vmatpush3.bf16.msra.mxu0 %v7549_v41  ;;  %7141 = vmatprep.mubr.msk.bf16.mxu0 %vm8278_vm1, %v10843_v37  ;;  %8122 = vpow2.f32 %v769_v22  ;;  %v8723_v45 = vadd.f32 %v513_v35, %v8690_v47  ;;  %v515_v50 = vpop.f32.mrb[27].mxu0  ;;  %v803_v53 = vmul.f32 1.442695, %v702_v59 }
 0x11f   :  { %7127 = vmatprep.subr.bf16.mxu0 %v10843_v37  ;;  %8124 = vpow2.f32 %v771_v24  ;;  %v8735_v20 = vadd.f32 %v515_v50, %v8693_v48 }
 0x120   :  { %8126 = vpow2.f32 %v785_v14  ;;  %v709_v7 = vmin.f32 %v8723_v45, 0.0  ;;  %v519_v10 = vpop.f32.mrb[28].mxu0  ;;  %vm645_vm13 = vcmp.gt.f32.partialorder %v8723_v45, 0.0 }
 0x121   :  { %8128 = vpow2.f32 %v787_v30  ;;  %v710_v11 = vmin.f32 %v8735_v20, 0.0  ;;  %v8746_v13 = vadd.f32 %v519_v10, %v8690_v47  ;;  %v521_v16 = vpop.f32.mrb[29].mxu0  ;;  %vm646_vm15 = vcmp.gt.f32.partialorder %v8735_v20, 0.0 }
 0x122   :  { %7128 = vmatpush3.bf16.msra.mxu0 %v7553_v43  ;;  %8130 = vpow2.f32 %v801_v2  ;;  %v817_v9 = vmul.f32 1.442695, %v709_v7  ;;  %v523_v24 = vpop.f32.mrb[30].mxu0 }
 0x123   :  { %7129 = vmatprep.subr.bf16.mxu0 %v10843_v37  ;;  %v8115_v27 = vpop.eup %8114  ;;  %8132 = vpow2.f32 %v803_v53  ;;  %v819_v30 = vmul.f32 1.442695, %v710_v11  ;;  %v717_v31 = vmin.f32 %v8746_v13, 0.0  ;;  %vm653_vm2 = vcmp.gt.f32.partialorder %v8746_v13, 0.0 }
 0x124   :  { %v8117_v38 = vpop.eup %8116  ;;  %v5899_v33 = vadd.f32 -1.0, %v8115_v27  ;;  %8134 = vpow2.f32 %v817_v9  ;;  %v525_v27 = vpop.f32.mrb[31].mxu0 }
 0x125   :  { %v5900_v43 = vadd.f32 -1.0, %v8117_v38  ;;  %8136 = vpow2.f32 %v819_v30  ;;  %v833_v44 = vmul.f32 1.442695, %v717_v31  ;;  %v6286_v31 = vld [vmem:[%s10832_s4 + $0x38] sm:$0xff] }
 0x126   :  { %v8119_v41 = vpop.eup %8118  ;;  %v8726_v55 = vsel %vm605_vm4, %v490_v51, %v5899_v33 }
 0x127   :  { %v8121_v52 = vpop.eup %8120  ;;  %v5907_v57 = vadd.f32 -1.0, %v8119_v41  ;;  %v8729_v60 = vsel %vm606_vm5, %v492_v54, %v5900_v43  ;;  %8138 = vpow2.f32 %v833_v44 }
 0x128   :  { %10859 = vst [vmem:[#allocation6_spill] sm:$0xff] %v8729_v60  ;;  %v5908_v62 = vadd.f32 -1.0, %v8121_v52 }
 0x129   :  { %v8731_v46 = vsel %vm613_vm6, %v494_v58, %v5907_v57  ;;  %v8123_v58 = vpop.eup %8122  ;;  %v524_v57 = vadd.f32 %v523_v24, %v8690_v47 }
 0x12a   :  { %v8739_v21 = vsel %vm614_vm7, %v496_v61, %v5908_v62  ;;  %v8125_v22 = vpop.eup %8124  ;;  %v5915_v23 = vadd.f32 -1.0, %v8123_v58  ;;  %v8750_v61 = vadd.f32 %v521_v16, %v8693_v48 }
 0x12b   :  { %10860 = vst [vmem:[#allocation7_spill] sm:$0xff] %v8739_v21  ;;  %v8127_v28 = vpop.eup %8126  ;;  %v5916_v14 = vadd.f32 -1.0, %v8125_v22  ;;  %v725_v2 = vmin.f32 %v524_v57, 0.0  ;;  %vm661_vm4 = vcmp.gt.f32.partialorder %v524_v57, 0.0 }
 0x12c   :  { %v8129_v63 = vpop.eup %8128  ;;  %v8757_v38 = vsel %vm621_vm8, %v8700_v8, %v5915_v23  ;;  %v5923_v33 = vadd.f32 -1.0, %v8127_v28  ;;  %v718_v35 = vmin.f32 %v8750_v61, 0.0  ;;  %v526_v8 = vadd.f32 %v525_v27, %v8693_v48 }
 0x12d   :  { %v8762_v41 = vsel %vm622_vm9, %v8703_v49, %v5916_v14  ;;  %v5924_v43 = vadd.f32 -1.0, %v8129_v63  ;;  %v8131_v53 = vpop.eup %8130  ;;  %v849_v9 = vmul.f32 1.442695, %v725_v2  ;;  %vm654_vm3 = vcmp.gt.f32.partialorder %v8750_v61, 0.0 }
 0x12e   :  { %10861 = vst [vmem:[#allocation8_spill] sm:$0xff] %v8762_v41  ;;  %v8765_v50 = vsel %vm629_vm10, %v8707_v56, %v5923_v33  ;;  %v835_v52 = vmul.f32 1.442695, %v718_v35  ;;  %v726_v56 = vmin.f32 %v526_v8, 0.0  ;;  %v8133_v7 = vpop.eup %8132  ;;  %v5931_v47 = vadd.f32 -1.0, %v8131_v53 }
 0x12f   :  { %v8772_v62 = vsel %vm630_vm11, %v8711_v17, %v5924_v43  ;;  %v8135_v10 = vpop.eup %8134  ;;  %v5932_v58 = vadd.f32 -1.0, %v8133_v7  ;;  %vm662_vm5 = vcmp.gt.f32.partialorder %v526_v8, 0.0  ;;  %v7561_v7 = vld [vmem:[%s10833_s5 + $0x110] ss:$12 sps:$4 sm:$0xff]  }
 0x130   :  { %10862 = vst [vmem:[#allocation9_spill] sm:$0xff] %v8772_v62  ;;  %8140 = vpow2.f32 %v835_v52  ;;  %v851_v48 = vmul.f32 1.442695, %v726_v56  ;;  %v8779_v17 = vsel %vm637_vm12, %v8716_v32, %v5931_v47  ;;  %v5939_v11 = vadd.f32 -1.0, %v8135_v10  ;;  %v8137_v16 = vpop.eup %8136  ;;  %v7558_v56 = vld [vmem:[%s10833_s5 + $0x108] ss:$12 sps:$4 sm:$0xff]  }
 0x131   :  { %8142 = vpow2.f32 %v849_v9  ;;  %v8787_v23 = vsel %vm638_vm14, %v8719_v40, %v5932_v58  ;;  %v5940_v28 = vadd.f32 -1.0, %v8137_v16  ;;  %v8139_v14 = vpop.eup %8138  ;;  %v7564_v47 = vld [vmem:[%s10833_s5 + $0x124] ss:$12 sps:$4 sm:$0xff]   ;;  %v7562_v9 = vld [vmem:[%s10833_s5 + $0x120] ss:$12 sps:$4 sm:$0xff]  }
 0x132   :  { %8144 = vpow2.f32 %v851_v48  ;;  %v8783_v22 = vsel %vm645_vm13, %v8723_v45, %v5939_v11  ;;  %10863 = vst [vmem:[#allocation10_spill] sm:$0xff] %v8787_v23  ;;  %v5947_v27 = vadd.f32 -1.0, %v8139_v14  ;;  %v7565_v48 = vld [vmem:[%s10833_s5 + $0x128] ss:$12 sps:$4 sm:$0xff]   ;;  %v7566_v58 = vld [vmem:[%s10833_s5 + $0x138] ss:$12 sps:$4 sm:$0xff]  }
 0x133   :  { %v8792_v30 = vsel %vm646_vm15, %v8735_v20, %v5940_v28  ;;  %v7568_v10 = vld [vmem:[%s10833_s5 + $0x13c] ss:$12 sps:$4 sm:$0xff]   ;;  %v7569_v11 = vld [vmem:[%s10833_s5 + $0x140] ss:$12 sps:$4 sm:$0xff]   ;;  %v7573_v14 = vld [vmem:[%s10833_s5 + $0x158] ss:$12 sps:$4 sm:$0xff]  }
 0x134   :  { %10864 = vst [vmem:[#allocation11_spill] sm:$0xff] %v8792_v30  ;;  %v8799_v33 = vsel %vm653_vm2, %v8746_v13, %v5947_v27  ;;  %v7556_v13 = vld [vmem:[%s10833_s5 + $0xf4] ss:$12 sps:$4 sm:$0xff]   ;;  %v7570_v28 = vld [vmem:[%s10833_s5 + $0x150] ss:$12 sps:$4 sm:$0xff]  }
 0x135   :  { %10865 = vst [vmem:[#allocation12_spill] sm:$0xff] %v8799_v33  ;;  %1291 = vmatprep.subr.bf16.mxu1 %v7556_v13  ;;  %v7572_v16 = vld [vmem:[%s10833_s5 + $0x154] ss:$12 sps:$4 sm:$0xff]   ;;  %v90_v13 = vsub.s32 3, %v8501_v12 }
 0x136   :  { %v7574_v27 = vld [vmem:[%s10833_s5 + $0x168] ss:$12 sps:$4 sm:$0xff]  }
 0x13a   :  { %v8141_v32 = vpop.eup %8140 }
 0x13b   :  { %v5948_v45 = vadd.f32 -1.0, %v8141_v32  ;;  %v8143_v40 = vpop.eup %8142  ;;  %v7576_v32 = vld [vmem:[%s10833_s5 + $0x16c] ss:$12 sps:$4 sm:$0xff]  }
 0x13c   :  { %v8145_v63 = vpop.eup %8144  ;;  %v5955_v35 = vadd.f32 -1.0, %v8143_v40  ;;  %v7580_v40 = vld [vmem:[%s10833_s5 + $0x4] ss:$12 sps:$4 sm:$0xff]  }
 0x13d   :  { %v8802_v20 = vsel %vm654_vm3, %v8750_v61, %v5948_v45  ;;  %v5956_v43 = vadd.f32 -1.0, %v8145_v63  ;;  %v7554_v61 = vld [vmem:[%s10833_s5 + $0xf0] ss:$12 sps:$4 sm:$0xff]  }
 0x13e   :  { %10866 = vst [vmem:[#allocation13_spill] sm:$0xff] %v8802_v20  ;;  %v8804_v44 = vsel %vm661_vm4, %v524_v57, %v5955_v35  ;;  %v7557_v57 = vld [vmem:[%s10833_s5 + $0xf8] ss:$12 sps:$4 sm:$0xff]   ;;  %1292 = vmatpush1.bf16.msra.mxu1 %v7554_v61  ;;  %v7577_v45 = vld [vmem:[%s10833_s5 + $0x170] ss:$12 sps:$4 sm:$0xff]   ;;  %v10839_v35 = vsub.s32 2, %v8501_v12 }
 0x13f   :  { %v8808_v2 = vsel %vm662_vm5, %v526_v8, %v5956_v43  ;;  %7130 = vmatpush3.bf16.msra.mxu0 %v7557_v57  ;;  %v7560_v8 = vld [vmem:[%s10833_s5 + $0x10c] ss:$12 sps:$4 sm:$0xff]   ;;  %v6045_v63 = vld [vmem:[%s10832_s4 + $0x10] sm:$0xff]  ;;  %v416_v43 = vpop.f32.mrb[0].mxu1 }
 0x140   :  { %10867 = vst [vmem:[#allocation14_spill] sm:$0xff] %v8808_v2  ;;  %7131 = vmatprep.subr.bf16.mxu0 %v10843_v37  ;;  %1293 = vmatprep.subr.bf16.mxu1 %v7560_v8  ;;  %v418_v61 = vpop.f32.mrb[1].mxu1  ;;  %v6046_v57 = vld [vmem:[%s10832_s4 + $0x18] sm:$0xff]  ;;  %v8886_v8 = vrot.slane %v8513_v18, %v10839_v35 }
 0x141   :  { %1585 = vperm.xlu1 %7540, %v6045_v63  }
 0x142   :  { %1294 = vmatpush1.bf16.msra.mxu1 %v7558_v56  ;;  %v8889_v56 = vrot.slane %v8513_v18, %v90_v13  ;;  %v102_v13 = vsub.s32 6, %v8501_v12 }
 0x143   :  { %7132 = vmatpush3.bf16.msra.mxu0 %v7561_v7  ;;  %1295 = vmatprep.subr.bf16.mxu1 %v7564_v47  ;;  %v420_v7 = vpop.f32.mrb[2].mxu1 }
 0x144   :  { %7133 = vmatprep.subr.bf16.mxu0 %v10843_v37  ;;  %v422_v47 = vpop.f32.mrb[3].mxu1 }
 0x145   :  { %1590 = vperm.xlu1 %7540, %v6046_v57  }
 0x146   :  { %1296 = vmatpush1.bf16.msra.mxu1 %v7562_v9  ;;  %v8892_v9 = vadd.f32 %v416_v43, %v8886_v8 }
 0x147   :  { %7134 = vmatpush3.bf16.msra.mxu0 %v7565_v48  ;;  %1297 = vmatprep.subr.bf16.mxu1 %v7568_v10  ;;  %v8895_v48 = vadd.f32 %v418_v61, %v8889_v56  ;;  %v8898_v10 = vadd.f32 %v420_v7, %v8886_v8  ;;  %v106_v61 = vsub.s32 7, %v8501_v12 }
 0x148   :  { %7135 = vmatprep.subr.bf16.mxu0 %v10843_v37  ;;  %vm603_vm6 = vcmp.gt.f32.partialorder %v8892_v9, 0.0 }
 0x149   :  { %vm604_vm7 = vcmp.gt.f32.partialorder %v8895_v48, 0.0  ;;  %vm611_vm8 = vcmp.gt.f32.partialorder %v8898_v10, 0.0 }
 0x14a   :  { %1298 = vmatpush1.bf16.msra.mxu1 %v7566_v58  ;;  %v8901_v58 = vadd.f32 %v422_v47, %v8889_v56 }
 0x14b   :  { %7136 = vmatpush3.bf16.msra.mxu0 %v7569_v11  ;;  %1299 = vmatprep.subr.bf16.mxu1 %v7572_v16  ;;  %v426_v11 = vpop.f32.mrb[4].mxu1 }
 0x14c   :  { %7137 = vmatprep.subr.bf16.mxu0 %v10843_v37  ;;  %v8904_v16 = vadd.f32 %v426_v11, %v8886_v8  ;;  %v676_v63 = vmin.f32 %v8901_v58, 0.0  ;;  %vm612_vm9 = vcmp.gt.f32.partialorder %v8901_v58, 0.0 }
 0x14e   :  { %1300 = vmatpush1.bf16.msra.mxu1 %v7570_v28  ;;  %v428_v28 = vpop.f32.mrb[5].mxu1  ;;  %v683_v47 = vmin.f32 %v8904_v16, 0.0  ;;  %v751_v19 = vmul.f32 1.442695, %v676_v63  ;;  %v8936_v63 = vrot.slane %v8513_v18, %v106_v61  ;;  %vm619_vm10 = vcmp.gt.f32.partialorder %v8904_v16, 0.0 }
 0x14f   :  { %7138 = vmatpush3.bf16.msra.mxu0 %v7573_v14  ;;  %1301 = vmatprep.subr.bf16.mxu1 %v7576_v32  ;;  %v6166_v14 = vld [vmem:[%s10832_s4 + $0x28] sm:$0xff]  ;;  %v667_v32 = vmin.f32 %v8892_v9, 0.0  ;;  %v8917_v35 = vadd.f32 %v428_v28, %v8889_v56 }
 0x150   :  { %7139 = vmatprep.subr.bf16.mxu0 %v10843_v37  ;;  %2159 = vperm.xlu1 %7540, %v6166_v14   ;;  %v765_v49 = vmul.f32 1.442695, %v683_v47 }
 0x151   :  { %v733_v57 = vmul.f32 1.442695, %v667_v32  ;;  %v684_v28 = vmin.f32 %v8917_v35, 0.0  ;;  %vm620_vm11 = vcmp.gt.f32.partialorder %v8917_v35, 0.0 }
 0x152   :  { %1302 = vmatpush1.bf16.msra.mxu1 %v7574_v27  ;;  %v668_v27 = vmin.f32 %v8895_v48, 0.0 }
 0x153   :  { %7140 = vmatpush3.bf16.msra.mxu0 %v7577_v45  ;;  %1496 = vmatprep.subr.bf16.mxu1 %v7580_v40  ;;  %v430_v45 = vpop.f32.mrb[6].mxu1  ;;  %v675_v40 = vmin.f32 %v8898_v10, 0.0  ;;  %8146 = vpow2.f32 %v733_v57 }
 0x154   :  { %7145 = vmatprep.subr.bf16.mxu0 %v10843_v37  ;;  %v432_v43 = vpop.f32.mrb[7].mxu1  ;;  %v735_v7 = vmul.f32 1.442695, %v668_v27  ;;  %v8920_v15 = vadd.f32 %v430_v45, %v8886_v8  ;;  %v8933_v45 = vrot.slane %v8513_v18, %v102_v13  ;;  %2728 = vperm.xlu1 %7540, %v6286_v31   ;;  %v6406_v18 = vld [vmem:[%s10832_s4 + $0x48] sm:$0xff] }
 0x155   :  { %v749_v11 = vmul.f32 1.442695, %v675_v40  ;;  %v436_v53 = vpop.f32.mrb[8].mxu1  ;;  %v8926_v32 = vadd.f32 %v432_v43, %v8889_v56 }
 0x156   :  { %v8929_v14 = vadd.f32 %v436_v53, %v8886_v8  ;;  %v438_v27 = vpop.f32.mrb[9].mxu1  ;;  %8148 = vpow2.f32 %v735_v7  ;;  %v691_v43 = vmin.f32 %v8920_v15, 0.0  ;;  %v767_v7 = vmul.f32 1.442695, %v684_v28 }
 0x157   :  { %v440_v40 = vpop.f32.mrb[10].mxu1  ;;  %8150 = vpow2.f32 %v749_v11  ;;  %v692_v57 = vmin.f32 %v8926_v32, 0.0  ;;  %v8947_v54 = vadd.f32 %v438_v27, %v8889_v56  ;;  %vm627_vm12 = vcmp.gt.f32.partialorder %v8920_v15, 0.0 }
 0x158   :  { %v442_v53 = vpop.f32.mrb[11].mxu1  ;;  %8152 = vpow2.f32 %v751_v19  ;;  %v699_v47 = vmin.f32 %v8929_v14, 0.0  ;;  %v781_v61 = vmul.f32 1.442695, %v691_v43  ;;  %v8950_v24 = vadd.f32 %v440_v40, %v8886_v8  ;;  %3297 = vperm.xlu1 %7540, %v6406_v18  }
 0x159   :  { %v446_v13 = vpop.f32.mrb[12].mxu1  ;;  %8154 = vpow2.f32 %v765_v49  ;;  %v783_v11 = vmul.f32 1.442695, %v692_v57  ;;  %v8953_v19 = vadd.f32 %v442_v53, %v8889_v56  ;;  %v700_v49 = vmin.f32 %v8947_v54, 0.0  ;;  %v6526_v53 = vld [vmem:[%s10832_s4 + $0x58] sm:$0xff] }
 0x15a   :  { %v448_v52 = vpop.f32.mrb[13].mxu1  ;;  %8156 = vpow2.f32 %v767_v7  ;;  %v797_v31 = vmul.f32 1.442695, %v699_v47  ;;  %v8958_v43 = vadd.f32 %v446_v13, %v8886_v8  ;;  %v707_v40 = vmin.f32 %v8950_v24, 0.0 }
 0x15b   :  { %v450_v28 = vpop.f32.mrb[14].mxu1  ;;  %8158 = vpow2.f32 %v781_v61  ;;  %v799_v7 = vmul.f32 1.442695, %v700_v49  ;;  %v708_v47 = vmin.f32 %v8953_v19, 0.0  ;;  %vm628_vm13 = vcmp.gt.f32.partialorder %v8926_v32, 0.0 }
 0x15c   :  { %v452_v27 = vpop.f32.mrb[15].mxu1  ;;  %8160 = vpow2.f32 %v783_v11  ;;  %v813_v18 = vmul.f32 1.442695, %v707_v40  ;;  %v715_v61 = vmin.f32 %v8958_v43, 0.0  ;;  %v8972_v11 = vadd.f32 %v448_v52, %v8889_v56  ;;  %3866 = vperm.xlu1 %7540, %v6526_v53  }
 0x15d   :  { %v562_v57 = vpop.f32.mrb[16].mxu1  ;;  %8162 = vpow2.f32 %v797_v31  ;;  %v8975_v59 = vadd.f32 %v450_v28, %v8886_v8  ;;  %v8147_v29 = vpop.eup %8146  ;;  %v815_v31 = vmul.f32 1.442695, %v708_v47  ;;  %vm635_vm14 = vcmp.gt.f32.partialorder %v8929_v14, 0.0 }
 0x15e   :  { %v8968_v13 = vpop.f32.mrb[17].mxu1  ;;  %8164 = vpow2.f32 %v799_v7  ;;  %v5897_v4 = vadd.f32 -1.0, %v8147_v29  ;;  %v829_v52 = vmul.f32 1.442695, %v715_v61  ;;  %v8985_v8 = vadd.f32 %v452_v27, %v8889_v56  ;;  %v6646_v7 = vld [vmem:[%s10832_s4 + $0x68] sm:$0xff] }
 0x15f   :  { %v8977_v51 = vpop.f32.mrb[18].mxu1  ;;  %8166 = vpow2.f32 %v813_v18  ;;  %vm636_vm15 = vcmp.gt.f32.partialorder %v8947_v54, 0.0  ;;  %v716_v29 = vmin.f32 %v8972_v11, 0.0  ;;  %v723_v61 = vmin.f32 %v8975_v59, 0.0 }
 0x160   :  { %v8981_v49 = vpop.f32.mrb[19].mxu1  ;;  %v8149_v40 = vpop.eup %8148  ;;  %8168 = vpow2.f32 %v815_v31  ;;  %v8999_v56 = vsel %vm603_vm6, %v8892_v9, %v5897_v4  ;;  %v9010_v12 = vadd.f32 %v562_v57, %v8933_v45  ;;  %4435 = vperm.xlu1 %7540, %v6646_v7   ;;  %v724_v2 = vmin.f32 %v8985_v8, 0.0 }
 0x161   :  { %v8987_v28 = vpop.f32.mrb[20].mxu1  ;;  %v8151_v1 = vpop.eup %8150  ;;  %v5898_v47 = vadd.f32 -1.0, %v8149_v40  ;;  %8170 = vpow2.f32 %v829_v52  ;;  %v831_v37 = vmul.f32 1.442695, %v716_v29  ;;  %v845_v52 = vmul.f32 1.442695, %v723_v61 }
 0x162   :  { %v8994_v53 = vpop.f32.mrb[21].mxu1  ;;  %v8153_v18 = vpop.eup %8152  ;;  %v5905_v27 = vadd.f32 -1.0, %v8151_v1  ;;  %vm643_vm2 = vcmp.gt.f32.partialorder %v8950_v24, 0.0  ;;  %v847_v23 = vmul.f32 1.442695, %v724_v2  ;;  %vm644_vm3 = vcmp.gt.f32.partialorder %v8953_v19, 0.0 }
 0x163   :  { %v9002_v0 = vpop.f32.mrb[22].mxu1  ;;  %v8155_v40 = vpop.eup %8154  ;;  %v9007_v31 = vsel %vm604_vm7, %v8895_v48, %v5898_v47  ;;  %v5906_v6 = vadd.f32 -1.0, %v8153_v18  ;;  %8172 = vpow2.f32 %v831_v37  ;;  %vm651_vm4 = vcmp.gt.f32.partialorder %v8958_v43, 0.0 }
 0x164   :  { %v9012_v20 = vpop.f32.mrb[23].mxu1  ;;  %v8157_v4 = vpop.eup %8156  ;;  %v9017_v1 = vsel %vm611_vm8, %v8898_v10, %v5905_v27  ;;  %v5913_v9 = vadd.f32 -1.0, %v8155_v40  ;;  %v6766_v10 = vld [vmem:[%s10832_s4 + $0x78] sm:$0xff]  ;;  %8174 = vpow2.f32 %v845_v52  ;;  %v671_v52 = vmin.f32 %v9010_v12, 0.0 }
 0x165   :  { %v9020_v48 = vpop.f32.mrb[24].mxu1  ;;  %v8159_v47 = vpop.eup %8158  ;;  %v9027_v29 = vsel %vm612_vm9, %v8901_v58, %v5906_v6  ;;  %v5914_v7 = vadd.f32 -1.0, %v8157_v4  ;;  %5004 = vperm.xlu1 %7540, %v6766_v10   ;;  %8176 = vpow2.f32 %v847_v23  ;;  %v9103_v60 = vadd.f32 %v8981_v49, %v8936_v63 }
 0x166   :  { %v9032_v18 = vpop.f32.mrb[25].mxu1  ;;  %v8161_v27 = vpop.eup %8160  ;;  %v9039_v40 = vsel %vm619_vm10, %v8904_v16, %v5913_v9  ;;  %v5921_v57 = vadd.f32 -1.0, %v8159_v47  ;;  %v9059_v47 = vadd.f32 %v8968_v13, %v8936_v63  ;;  %v741_v2 = vmul.f32 1.442695, %v671_v52 }
 0x167   :  { %v9041_v6 = vpop.f32.mrb[26].mxu1  ;;  %v8163_v58 = vpop.eup %8162  ;;  %v9046_v37 = vsel %vm620_vm11, %v8917_v35, %v5914_v7  ;;  %v5922_v4 = vadd.f32 -1.0, %v8161_v27  ;;  %vm652_vm5 = vcmp.gt.f32.partialorder %v8972_v11, 0.0  ;;  %vm659_vm6 = vcmp.gt.f32.partialorder %v8975_v59, 0.0 }
 0x168   :  { %v9049_v61 = vpop.f32.mrb[27].mxu1  ;;  %v9054_v16 = vsel %vm627_vm12, %v8920_v15, %v5921_v57  ;;  %v5929_v9 = vadd.f32 -1.0, %v8163_v58  ;;  %v8165_v7 = vpop.eup %8164  ;;  %v9072_v15 = vadd.f32 %v8977_v51, %v8933_v45  ;;  %8178 = vpow2.f32 %v741_v2 }
 0x169   :  { %v9061_v35 = vpop.f32.mrb[28].mxu1  ;;  %v9068_v10 = vsel %vm628_vm13, %v8926_v32, %v5922_v4  ;;  %v8167_v13 = vpop.eup %8166  ;;  %v5930_v58 = vadd.f32 -1.0, %v8165_v7  ;;  %v672_v32 = vmin.f32 %v9059_v47, 0.0  ;;  %v9114_v2 = vadd.f32 %v8987_v28, %v8933_v45 }
 0x16a   :  { %v9074_v57 = vpop.f32.mrb[29].mxu1  ;;  %v8169_v41 = vpop.eup %8168  ;;  %v9084_v23 = vsel %vm635_vm14, %v8929_v14, %v5929_v9  ;;  %v5937_v51 = vadd.f32 -1.0, %v8167_v13  ;;  %v679_v62 = vmin.f32 %v9072_v15, 0.0  ;;  %v680_v28 = vmin.f32 %v9103_v60, 0.0 }
 0x16b   :  { %v9079_v30 = vpop.f32.mrb[30].mxu1  ;;  %v8171_v27 = vpop.eup %8170  ;;  %v9093_v52 = vsel %vm636_vm15, %v8947_v54, %v5930_v58  ;;  %v5938_v7 = vadd.f32 -1.0, %v8169_v41  ;;  %v743_v13 = vmul.f32 1.442695, %v672_v32  ;;  %v9129_v32 = vadd.f32 %v8994_v53, %v8936_v63 }
 0x16c   :  { %v9088_v4 = vpop.f32.mrb[31].mxu1  ;;  %v9099_v14 = vsel %vm643_vm2, %v8950_v24, %v5937_v51  ;;  %v5945_v9 = vadd.f32 -1.0, %v8171_v27  ;;  %v757_v41 = vmul.f32 1.442695, %v679_v62  ;;  %v687_v51 = vmin.f32 %v9114_v2, 0.0 }
 0x16d   :  { %v9110_v54 = vsel %vm644_vm3, %v8953_v19, %v5938_v7  ;;  %v8173_v24 = vpop.eup %8172  ;;  %8180 = vpow2.f32 %v743_v13  ;;  %v9133_v7 = vadd.f32 %v9002_v0, %v8933_v45  ;;  %v759_v13 = vmul.f32 1.442695, %v680_v28 }
 0x16e   :  { %v8175_v49 = vpop.eup %8174  ;;  %v9123_v19 = vsel %vm651_vm4, %v8958_v43, %v5945_v9  ;;  %v5946_v62 = vadd.f32 -1.0, %v8173_v24  ;;  %8182 = vpow2.f32 %v757_v41  ;;  %v9137_v43 = vadd.f32 %v9012_v20, %v8936_v63 }
 0x16f   :  { %v5953_v58 = vadd.f32 -1.0, %v8175_v49  ;;  %v9141_v9 = vadd.f32 %v9020_v48, %v8933_v45  ;;  %v8177_v41 = vpop.eup %8176  ;;  %vm660_vm7 = vcmp.gt.f32.partialorder %v8985_v8, 0.0  ;;  %v773_v53 = vmul.f32 1.442695, %v687_v51 }
 0x170   :  { %v688_v49 = vmin.f32 %v9129_v32, 0.0  ;;  %v9151_v0 = vsel %vm652_vm5, %v8972_v11, %v5946_v62  ;;  %v5954_v28 = vadd.f32 -1.0, %v8177_v41  ;;  %8184 = vpow2.f32 %v759_v13 }
 0x171   :  { %v9144_v24 = vsel %vm659_vm6, %v8975_v59, %v5953_v58  ;;  %8186 = vpow2.f32 %v773_v53  ;;  %v695_v59 = vmin.f32 %v9133_v7, 0.0  ;;  %vm607_vm8 = vcmp.gt.f32.partialorder %v9010_v12, 0.0 }
 0x172   :  { %v775_v48 = vmul.f32 1.442695, %v688_v49  ;;  %v8179_v58 = vpop.eup %8178  ;;  %v9157_v27 = vsel %vm660_vm7, %v8985_v8, %v5954_v28  ;;  %v696_v51 = vmin.f32 %v9137_v43, 0.0  ;;  %v703_v11 = vmin.f32 %v9141_v9, 0.0 }
 0x173   :  { %v5901_v20 = vadd.f32 -1.0, %v8179_v58  ;;  %v789_v13 = vmul.f32 1.442695, %v695_v59  ;;  %v9166_v49 = vadd.f32 %v9032_v18, %v8936_v63  ;;  %v9170_v8 = vadd.f32 %v9041_v6, %v8933_v45 }
 0x174   :  { %8188 = vpow2.f32 %v775_v48  ;;  %v791_v41 = vmul.f32 1.442695, %v696_v51  ;;  %v805_v53 = vmul.f32 1.442695, %v703_v11  ;;  %vm608_vm9 = vcmp.gt.f32.partialorder %v9059_v47, 0.0 }
 0x175   :  { %8190 = vpow2.f32 %v789_v13  ;;  %v9175_v62 = vadd.f32 %v9049_v61, %v8936_v63  ;;  %v9179_v48 = vadd.f32 %v9061_v35, %v8933_v45  ;;  %vm615_vm10 = vcmp.gt.f32.partialorder %v9072_v15, 0.0 }
 0x176   :  { %8192 = vpow2.f32 %v791_v41  ;;  %v704_v18 = vmin.f32 %v9166_v49, 0.0  ;;  %v9186_v6 = vsel %vm607_vm8, %v9010_v12, %v5901_v20  ;;  %v711_v61 = vmin.f32 %v9170_v8, 0.0 }
 0x177   :  { %v8181_v28 = vpop.eup %8180  ;;  %10868 = vst [vmem:[#allocation15_spill] sm:$0xff] %v9186_v6  ;;  %8194 = vpow2.f32 %v805_v53  ;;  %vm616_vm11 = vcmp.gt.f32.partialorder %v9103_v60, 0.0  ;;  %v712_v11 = vmin.f32 %v9175_v62, 0.0  ;;  %v719_v12 = vmin.f32 %v9179_v48, 0.0 }
 0x178   :  { %v8183_v59 = vpop.eup %8182  ;;  %v5902_v58 = vadd.f32 -1.0, %v8181_v28  ;;  %v807_v35 = vmul.f32 1.442695, %v704_v18  ;;  %v821_v28 = vmul.f32 1.442695, %v711_v61  ;;  %v9204_v18 = vadd.f32 %v9074_v57, %v8936_v63 }
 0x179   :  { %v5909_v51 = vadd.f32 -1.0, %v8183_v59  ;;  %v823_v59 = vmul.f32 1.442695, %v712_v11  ;;  %vm623_vm12 = vcmp.gt.f32.partialorder %v9114_v2, 0.0  ;;  %vm624_vm13 = vcmp.gt.f32.partialorder %v9129_v32, 0.0 }
 0x17a   :  { %v9194_v13 = vsel %vm608_vm9, %v9059_v47, %v5902_v58  ;;  %v8185_v20 = vpop.eup %8184  ;;  %8196 = vpow2.f32 %v807_v35  ;;  %v837_v47 = vmul.f32 1.442695, %v719_v12  ;;  %vm631_vm14 = vcmp.gt.f32.partialorder %v9133_v7, 0.0 }
 0x17b   :  { %10869 = vst [vmem:[#allocation16_spill] sm:$0xff] %v9194_v13  ;;  %v9197_v41 = vsel %vm615_vm10, %v9072_v15, %v5909_v51  ;;  %v8187_v21 = vpop.eup %8186  ;;  %v5910_v33 = vadd.f32 -1.0, %v8185_v20  ;;  %8198 = vpow2.f32 %v821_v28  ;;  %v9208_v15 = vadd.f32 %v9079_v30, %v8933_v45  ;;  %v1029_v20 = vpop.permute.xlu0 %1028 }
 0x17c   :  { %v5917_v58 = vadd.f32 -1.0, %v8187_v21  ;;  %8200 = vpow2.f32 %v823_v59  ;;  %v720_v51 = vmin.f32 %v9204_v18, 0.0  ;;  %v9229_v6 = vadd.f32 %v9088_v4, %v8936_v63 }
 0x17d   :  { %v9214_v35 = vsel %vm616_vm11, %v9103_v60, %v5910_v33  ;;  %8202 = vpow2.f32 %v837_v47  ;;  %v727_v57 = vmin.f32 %v9208_v15, 0.0  ;;  %vm632_vm15 = vcmp.gt.f32.partialorder %v9137_v43, 0.0 }
 0x17e   :  { %v8189_v61 = vpop.eup %8188  ;;  %v839_v45 = vmul.f32 1.442695, %v720_v51  ;;  %v9225_v47 = vsel %vm623_vm12, %v9114_v2, %v5917_v58  ;;  %vm639_vm2 = vcmp.gt.f32.partialorder %v9141_v9, 0.0  ;;  %vm640_vm3 = vcmp.gt.f32.partialorder %v9166_v49, 0.0 }
 0x17f   :  { %v5918_v21 = vadd.f32 -1.0, %v8189_v61  ;;  %v8191_v28 = vpop.eup %8190  ;;  %v853_v60 = vmul.f32 1.442695, %v727_v57  ;;  %vm647_vm4 = vcmp.gt.f32.partialorder %v9170_v8, 0.0  ;;  %vm648_vm5 = vcmp.gt.f32.partialorder %v9175_v62, 0.0 }
 0x180   :  { %v8193_v33 = vpop.eup %8192  ;;  %v5925_v53 = vadd.f32 -1.0, %v8191_v28  ;;  %8204 = vpow2.f32 %v839_v45  ;;  %vm655_vm6 = vcmp.gt.f32.partialorder %v9179_v48, 0.0  ;;  %vm663_vm7 = vcmp.gt.f32.partialorder %v9208_v15, 0.0 }
 0x181   :  { %v8195_v61 = vpop.eup %8194  ;;  %v9233_v57 = vsel %vm624_vm13, %v9129_v32, %v5918_v21  ;;  %8206 = vpow2.f32 %v853_v60  ;;  %v728_v32 = vmin.f32 %v9229_v6, 0.0  ;;  %vm656_vm8 = vcmp.gt.f32.partialorder %v9204_v18, 0.0 }
 0x182   :  { %v9236_v13 = vsel %vm631_vm14, %v9133_v7, %v5925_v53  ;;  %v5933_v2 = vadd.f32 -1.0, %v8195_v61  ;;  %vm664_vm9 = vcmp.gt.f32.partialorder %v9229_v6, 0.0 }
 0x183   :  { %v999_v63 = vpack.c.bf16 %v9236_v13, %v9225_v47  ;;  %v7936_v13 = vld [vmem:[%s10833_s5 + $0x900] ss:$12 sps:$4 sm:$0xff]   ;;  %v7938_v47 = vld [vmem:[%s10833_s5 + $0x904] ss:$12 sps:$4 sm:$0xff]  }
 0x184   :  { %v8197_v4 = vpop.eup %8196  ;;  %v9250_v60 = vsel %vm639_vm2, %v9141_v9, %v5933_v2 }
 0x185   :  { %v8199_v21 = vpop.eup %8198  ;;  %v5934_v53 = vadd.f32 -1.0, %v8197_v4 }
 0x186   :  { %v8201_v28 = vpop.eup %8200 }
 0x187   :  { %v5942_v61 = vadd.f32 -1.0, %v8201_v28 }
 0x189   :  { %v9262_v9 = vsel %vm648_vm5, %v9175_v62, %v5942_v61  ;;  %v1024_v61 = vpop.permute.xlu0 %1023 }
 0x1f0   :  { %v9218_v11 = vpop.f32.mrb[32].mxu0 }
 0x1f1   :  { %v7123_v12 = vpop.f32.mrb[33].mxu0 }
 0x1f2   :  { %v1076_v59 = vpop.f32.mrb[34].mxu0  ;;  %v5926_v12 = vadd.f32 -1.0, %v8193_v33  ;;  %v5941_v33 = vadd.f32 -1.0, %v8199_v21 }
 0x1f3   :  { %v1077_v51 = vadd.f32 %v1076_v59, %v1029_v20  ;;  %v7124_v30 = vpop.f32.mrb[35].mxu0  ;;  %v8203_v20 = vpop.eup %8202  ;;  %v9254_v59 = vsel %vm640_vm3, %v9166_v49, %v5934_v53 }
 0x1f4   :  { %v9242_v30 = vsel %vm632_vm15, %v9137_v43, %v5926_v12  ;;  %v855_v43 = vmul.f32 1.442695, %v728_v32  ;;  %v9257_v12 = vsel %vm647_vm4, %v9170_v8, %v5941_v33  ;;  %v5949_v2 = vadd.f32 -1.0, %v8203_v20  ;;  %v8205_v32 = vpop.eup %8204 }
 0x1f5   :  { %v1083_v58 = vmin.f32 %v1077_v51, 0.0  ;;  %v8207_v49 = vpop.eup %8206  ;;  %vm1081_vm10 = vcmp.gt.f32.partialorder %v1077_v51, 0.0 }
 0x1f6   :  { %v9269_v8 = vsel %vm655_vm6, %v9179_v48, %v5949_v2  ;;  %v5957_v21 = vadd.f32 -1.0, %v8207_v49  ;;  %v9288_v49 = vadd.f32 %v9218_v11, %v1024_v61  ;;  %v7582_v11 = vld [vmem:[%s10833_s5 + $0x18] ss:$12 sps:$4 sm:$0xff]   ;;  %v7586_v61 = vld [vmem:[%s10833_s5 + $0x30] ss:$12 sps:$4 sm:$0xff]  }
 0x1f7   :  { %v1086_v45 = vmul.f32 1.442695, %v1083_v58  ;;  %v1007_v58 = vpack.c.bf16 %v9257_v12, %v9250_v60  ;;  %v7942_v60 = vld [vmem:[%s10833_s5 + $0x91c] ss:$12 sps:$4 sm:$0xff]   ;;  %v7943_v12 = vld [vmem:[%s10833_s5 + $0x920] ss:$12 sps:$4 sm:$0xff]  }
 0x1f8   :  { %v9272_v53 = vsel %vm663_vm7, %v9208_v15, %v5957_v21  ;;  %v7578_v15 = vld [vmem:[%s10833_s5] ss:$12 sps:$4 sm:$0xff]   ;;  %vm1080_vm11 = vcmp.gt.f32.partialorder %v9288_v49, 0.0 }
 0x1f9   :  { %8208 = vpow2.f32 %v1086_v45  ;;  %v5950_v45 = vadd.f32 -1.0, %v8205_v32  ;;  %v1015_v62 = vpack.c.bf16 %v9272_v53, %v9269_v8  ;;  %v7581_v32 = vld [vmem:[%s10833_s5 + $0x8] ss:$12 sps:$4 sm:$0xff]   ;;  %v7947_v53 = vld [vmem:[%s10833_s5 + $0x938] ss:$12 sps:$4 sm:$0xff]  }
 0x1fa   :  { %8210 = vpow2.f32 %v855_v43  ;;  %v7946_v8 = vld [vmem:[%s10833_s5 + $0x934] ss:$12 sps:$4 sm:$0xff]  }
 0x1fb   :  { %v9279_v20 = vsel %vm656_vm8, %v9204_v18, %v5950_v45  ;;  %v7584_v18 = vld [vmem:[%s10833_s5 + $0x1c] ss:$12 sps:$4 sm:$0xff]  }
 0x203   :  { %v8209_v28 = vpop.eup %8208 }
 0x204   :  { %v8211_v33 = vpop.eup %8210  ;;  %v5962_v43 = vadd.f32 -1.0, %v8209_v28  ;;  %v7585_v28 = vld [vmem:[%s10833_s5 + $0x20] ss:$12 sps:$4 sm:$0xff]  }
 0x205   :  { %v5958_v48 = vadd.f32 -1.0, %v8211_v33  ;;  %v1082_v33 = vmin.f32 %v9288_v49, 0.0 }
 0x206   :  { %v1091_v2 = vsel %vm1081_vm10, %v1077_v51, %v5962_v43  ;;  %v7588_v43 = vld [vmem:[%s10833_s5 + $0x34] ss:$12 sps:$4 sm:$0xff]   ;;  %v1586_v51 = vpop.permute.xlu1 %1585 }
 0x207   :  { %v1125_v21 = vpack.c.bf16 %v1091_v2, %v1091_v2  ;;  %v9294_v45 = vsel %vm664_vm9, %v9229_v6, %v5958_v48  ;;  %v10870_v6 = vmov 0.0   ;;  %v10871_v48 = vmov 0   ;;  %v7589_v2 = vld [vmem:[%s10833_s5 + $0x38] ss:$12 sps:$4 sm:$0xff]  }
 0x209   :  { %1320 = vmatmul.mubr.bf16.vlgmr.msra.gmra.mrb[32].mxu1 %v1125_v21  ;;  %7142 = vmatmul.mubr.bf16.vlgmr.msra.gmra.mrb[36].mxu0 %v1125_v21  ;;  %v7590_v21 = vld [vmem:[%s10833_s5 + $0x48] ss:$12 sps:$4 sm:$0xff]  }
 0x20a   :  { %1497 = vmatpush1.bf16.msra.mxu1 %v7578_v15  ;;  %7146 = vmatpush3.bf16.msra.mxu0 %v7581_v32  ;;  %v1084_v15 = vmul.f32 1.442695, %v1082_v33  ;;  %v7592_v32 = vld [vmem:[%s10833_s5 + $0x4c] ss:$12 sps:$4 sm:$0xff]   ;;  %v7597_v33 = vld [vmem:[%s10833_s5 + $0x68] ss:$12 sps:$4 sm:$0xff]  }
 0x20b   :  { %1498 = vmatprep.subr.bf16.mxu1 %v7584_v18  ;;  %7147 = vmatprep.subr.bf16.mxu0 %v10870_v6  ;;  %v7593_v18 = vld [vmem:[%s10833_s5 + $0x50] ss:$12 sps:$4 sm:$0xff]  }
 0x20c   :  { %1528 = vmatprep.mubr.bf16.mxu1 %v10871_v48  ;;  %7161 = vmatprep.mubr.msk.bf16.mxu0 %vm8278_vm1, %v10870_v6  ;;  %8212 = vpow2.f32 %v1084_v15  ;;  %v7604_v15 = vld [vmem:[%s10833_s5 + $0x94] ss:$12 sps:$4 sm:$0xff]  }
 0x20e   :  { %1499 = vmatpush1.bf16.msra.mxu1 %v7582_v11  ;;  %7148 = vmatpush3.bf16.msra.mxu0 %v7585_v28  ;;  %v7596_v11 = vld [vmem:[%s10833_s5 + $0x64] ss:$12 sps:$4 sm:$0xff]   ;;  %v7594_v28 = vld [vmem:[%s10833_s5 + $0x60] ss:$12 sps:$4 sm:$0xff]  }
 0x20f   :  { %1500 = vmatprep.subr.bf16.mxu1 %v7588_v43  ;;  %7149 = vmatprep.subr.bf16.mxu0 %v10870_v6  ;;  %v7600_v43 = vld [vmem:[%s10833_s5 + $0x7c] ss:$12 sps:$4 sm:$0xff]  }
 0x212   :  { %1501 = vmatpush1.bf16.msra.mxu1 %v7586_v61  ;;  %7150 = vmatpush3.bf16.msra.mxu0 %v7589_v2  ;;  %v7598_v61 = vld [vmem:[%s10833_s5 + $0x78] ss:$12 sps:$4 sm:$0xff]   ;;  %v7601_v2 = vld [vmem:[%s10833_s5 + $0x80] ss:$12 sps:$4 sm:$0xff]  }
 0x213   :  { %1502 = vmatprep.subr.bf16.mxu1 %v7592_v32  ;;  %7151 = vmatprep.subr.bf16.mxu0 %v10870_v6 }
 0x216   :  { %1503 = vmatpush1.bf16.msra.mxu1 %v7590_v21  ;;  %7152 = vmatpush3.bf16.msra.mxu0 %v7593_v18  ;;  %v8213_v32 = vpop.eup %8212  ;;  %v7602_v21 = vld [vmem:[%s10833_s5 + $0x90] ss:$12 sps:$4 sm:$0xff]   ;;  %v7605_v18 = vld [vmem:[%s10833_s5 + $0x98] ss:$12 sps:$4 sm:$0xff]  }
 0x217   :  { %1504 = vmatprep.subr.bf16.mxu1 %v7596_v11  ;;  %7153 = vmatprep.subr.bf16.mxu0 %v10870_v6  ;;  %v7608_v11 = vld [vmem:[%s10833_s5 + $0xac] ss:$12 sps:$4 sm:$0xff]  }
 0x21a   :  { %1505 = vmatpush1.bf16.msra.mxu1 %v7594_v28  ;;  %7154 = vmatpush3.bf16.msra.mxu0 %v7597_v33  ;;  %v5961_v28 = vadd.f32 -1.0, %v8213_v32  ;;  %v7606_v33 = vld [vmem:[%s10833_s5 + $0xa8] ss:$12 sps:$4 sm:$0xff]   ;;  %v10874_v32 = vpack.c.bf16 %v8657_v26, %v8654_v25 }
 0x21b   :  { %1506 = vmatprep.subr.bf16.mxu1 %v7600_v43  ;;  %7155 = vmatprep.subr.bf16.mxu0 %v10870_v6  ;;  %v7609_v43 = vld [vmem:[%s10833_s5 + $0xb0] ss:$12 sps:$4 sm:$0xff]   ;;  %v7614_v25 = vld [vmem:[%s10833_s5 + $0x188] ss:$12 sps:$4 sm:$0xff]  }
 0x21c   :  { %v7617_v26 = vld [vmem:[%s10833_s5 + $0x19c] ss:$12 sps:$4 sm:$0xff]  }
 0x21e   :  { %1507 = vmatpush1.bf16.msra.mxu1 %v7598_v61  ;;  %7156 = vmatpush3.bf16.msra.mxu0 %v7601_v2  ;;  %v1090_v61 = vsel %vm1080_vm11, %v9288_v49, %v5961_v28  ;;  %v10873_v49 = vpack.c.bf16 %v8642_v5, %v8639_v3  ;;  %v7611_v3 = vld [vmem:[%s10833_s5 + $0x180] ss:$12 sps:$4 sm:$0xff]   ;;  %v7613_v5 = vld [vmem:[%s10833_s5 + $0x184] ss:$12 sps:$4 sm:$0xff]  }
 0x21f   :  { %1508 = vmatprep.subr.bf16.mxu1 %v7604_v15  ;;  %7157 = vmatprep.subr.bf16.mxu0 %v10870_v6  ;;  %v1092_v2 = vpack.c.bf16 %v1090_v61, %v1090_v61  ;;  %v10872_v15 = vpack.c.bf16 %v8609_v36, %v8606_v34  ;;  %v7610_v34 = vld [vmem:[%s10831_s3 + $0x8] sm:$0xff]   ;;  %v10875_v36 = vpack.c.bf16 %v8668_v42, %v8666_v39  ;;  %v7615_v42 = vld [vmem:[%s10833_s5 + $0x198] ss:$12 sps:$4 sm:$0xff]  }
 0x220   :  { %v7618_v39 = vld [vmem:[%s10833_s5 + $0x1a0] ss:$12 sps:$4 sm:$0xff]   ;;  %v7629_v61 = vld [vmem:[%s10833_s5 + $0x1e4] ss:$12 sps:$4 sm:$0xff]  }
 0x221   :  { %v7625_v28 = vld [vmem:[%s10833_s5 + $0x1cc] ss:$12 sps:$4 sm:$0xff]  }
 0x222   :  { %1509 = vmatpush1.bf16.msra.mxu1 %v7602_v21  ;;  %7158 = vmatpush3.bf16.msra.mxu0 %v7605_v18  ;;  %v7621_v21 = vld [vmem:[%s10833_s5 + $0x1b4] ss:$12 sps:$4 sm:$0xff]   ;;  %v7622_v18 = vld [vmem:[%s10833_s5 + $0x1b8] ss:$12 sps:$4 sm:$0xff]  }
 0x223   :  { %1510 = vmatprep.subr.bf16.mxu1 %v7608_v11  ;;  %7159 = vmatprep.subr.bf16.mxu0 %v10870_v6  ;;  %v7619_v11 = vld [vmem:[%s10833_s5 + $0x1b0] ss:$12 sps:$4 sm:$0xff]  }
 0x226   :  { %1511 = vmatpush1.bf16.msra.mxu1 %v7606_v33  ;;  %7160 = vmatpush3.bf16.msra.mxu0 %v7609_v43  ;;  %v7623_v33 = vld [vmem:[%s10833_s5 + $0x1c8] ss:$12 sps:$4 sm:$0xff]   ;;  %v7626_v43 = vld [vmem:[%s10833_s5 + $0x1d0] ss:$12 sps:$4 sm:$0xff]  }
 0x227   :  { %7165 = vmatprep.subr.bf16.mxu1 %v10870_v6  ;;  %7177 = vmatprep.subr.bf16.mxu0 %v10870_v6 }
 0x229   :  { %1529 = vmatmul.mubr.bf16.vlgmr.msra.gmra.mrb[36].mxu1 %v1092_v2  ;;  %7162 = vmatmul.mubr.bf16.vlgmr.msra.gmra.mrb[40].mxu0 %v1092_v2  ;;  %v7627_v2 = vld [vmem:[%s10833_s5 + $0x1e0] ss:$12 sps:$4 sm:$0xff]  }
 0x22a   :  { %7166 = vmatpush3.bf16.msra.mxu1 %v10872_v15  ;;  %7173 = vmatprep.mubr.msk.bf16.mxu1 %vm8278_vm1, %v10870_v6  ;;  %v7630_v15 = vld [vmem:[%s10833_s5 + $0x1e8] ss:$12 sps:$4 sm:$0xff]  }
 0x22b   :  { %7167 = vmatprep.subr.bf16.mxu1 %v10870_v6  ;;  %7193 = vmatprep.mubr.msk.bf16.mxu0 %vm8278_vm1, %v10870_v6 }
 0x22c   :  { %7178 = vmatpush3.bf16.msra.mxu0 %v7614_v25  ;;  %v7641_v25 = vld [vmem:[%s10833_s5 + $0x22c] ss:$12 sps:$4 sm:$0xff]  }
 0x22d   :  { %7179 = vmatprep.subr.bf16.mxu0 %v10870_v6 }
 0x22e   :  { %7168 = vmatpush3.bf16.msra.mxu1 %v10873_v49  ;;  %v7633_v49 = vld [vmem:[%s10833_s5 + $0x1fc] ss:$12 sps:$4 sm:$0xff]  }
 0x22f   :  { %7169 = vmatprep.subr.bf16.mxu1 %v10870_v6 }
 0x230   :  { %7180 = vmatpush3.bf16.msra.mxu0 %v7618_v39  ;;  %v7642_v39 = vld [vmem:[%s10833_s5 + $0x230] ss:$12 sps:$4 sm:$0xff]  }
 0x231   :  { %7181 = vmatprep.subr.bf16.mxu0 %v10870_v6 }
 0x232   :  { %7170 = vmatpush3.bf16.msra.mxu1 %v10874_v32  ;;  %v7631_v32 = vld [vmem:[%s10833_s5 + $0x1f8] ss:$12 sps:$4 sm:$0xff]  }
 0x233   :  { %7171 = vmatprep.subr.bf16.mxu1 %v10870_v6 }
 0x234   :  { %7182 = vmatpush3.bf16.msra.mxu0 %v7622_v18 }
 0x235   :  { %7183 = vmatprep.subr.bf16.mxu0 %v10870_v6 }
 0x236   :  { %7172 = vmatpush3.bf16.msra.mxu1 %v10875_v36  ;;  %v7637_v36 = vld [vmem:[%s10833_s5 + $0x214] ss:$12 sps:$4 sm:$0xff]  }
 0x237   :  { %1816 = vmatprep.subr.bf16.mxu1 %v7613_v5  ;;  %v7638_v5 = vld [vmem:[%s10833_s5 + $0x218] ss:$12 sps:$4 sm:$0xff]  }
 0x238   :  { %7184 = vmatpush3.bf16.msra.mxu0 %v7626_v43 }
 0x239   :  { %7174 = vmatmul.mubr.msk.bf16.vlgmr.msra.gmra.mrb[40].mxu1 %vm296_vm0, %v7610_v34  ;;  %7185 = vmatprep.subr.bf16.mxu0 %v10870_v6  ;;  %v7634_v34 = vld [vmem:[%s10833_s5 + $0x200] ss:$12 sps:$4 sm:$0xff]  }
 0x23a   :  { %1848 = vmatprep.mubr.bf16.mxu1 %v10871_v48  ;;  %1817 = vmatpush1.bf16.msra.mxu1 %v7611_v3  ;;  %v7635_v3 = vld [vmem:[%s10833_s5 + $0x210] ss:$12 sps:$4 sm:$0xff]  }
 0x23b   :  { %1818 = vmatprep.subr.bf16.mxu1 %v7617_v26  ;;  %v7639_v26 = vld [vmem:[%s10833_s5 + $0x228] ss:$12 sps:$4 sm:$0xff]  }
 0x23c   :  { %7186 = vmatpush3.bf16.msra.mxu0 %v7630_v15 }
 0x23d   :  { %7187 = vmatprep.subr.bf16.mxu0 %v10870_v6 }
 0x23e   :  { %1819 = vmatpush1.bf16.msra.mxu1 %v7615_v42  ;;  %v7645_v42 = vld [vmem:[%s10833_s5 + $0x244] ss:$12 sps:$4 sm:$0xff]  }
 0x23f   :  { %1820 = vmatprep.subr.bf16.mxu1 %v7621_v21 }
 0x240   :  { %7188 = vmatpush3.bf16.msra.mxu0 %v7634_v34 }
 0x241   :  { %7189 = vmatprep.subr.bf16.mxu0 %v10870_v6 }
 0x242   :  { %1821 = vmatpush1.bf16.msra.mxu1 %v7619_v11 }
 0x243   :  { %1822 = vmatprep.subr.bf16.mxu1 %v7625_v28 }
 0x244   :  { %7190 = vmatpush3.bf16.msra.mxu0 %v7638_v5 }
 0x245   :  { %7191 = vmatprep.subr.bf16.mxu0 %v10870_v6 }
 0x246   :  { %1823 = vmatpush1.bf16.msra.mxu1 %v7623_v33 }
 0x247   :  { %1824 = vmatprep.subr.bf16.mxu1 %v7629_v61 }
 0x248   :  { %7192 = vmatpush3.bf16.msra.mxu0 %v7642_v39 }
 0x249   :  { %7197 = vmatprep.subr.bf16.mxu0 %v10870_v6 }
 0x24a   :  { %1825 = vmatpush1.bf16.msra.mxu1 %v7627_v2 }
 0x24b   :  { %1826 = vmatprep.subr.bf16.mxu1 %v7633_v49 }
 0x24e   :  { %1827 = vmatpush1.bf16.msra.mxu1 %v7631_v32 }
 0x24f   :  { %1828 = vmatprep.subr.bf16.mxu1 %v7637_v36 }
 0x252   :  { %1829 = vmatpush1.bf16.msra.mxu1 %v7635_v3 }
 0x253   :  { %1830 = vmatprep.subr.bf16.mxu1 %v7641_v25 }
 0x256   :  { %1831 = vmatpush1.bf16.msra.mxu1 %v7639_v26 }
 0x257   :  { %2062 = vmatprep.subr.bf16.mxu1 %v7645_v42 }
 0x2dc   :  { %v1321_v21 = vpop.f32.mrb[32].mxu1  ;;  %v1362_v18 = vpop.f32.mrb[36].mxu0 }
 0x2dd   :  { %v1323_v11 = vpop.f32.mrb[33].mxu1  ;;  %v7143_v28 = vpop.f32.mrb[37].mxu0 }
 0x2de   :  { %v1325_v33 = vpop.f32.mrb[34].mxu1  ;;  %v1365_v43 = vpop.f32.mrb[38].mxu0 }
 0x2df   :  { %v1326_v61 = vpop.f32.mrb[35].mxu1  ;;  %v7144_v2 = vpop.f32.mrb[39].mxu0 }
 0x2fc   :  { %v1530_v15 = vpop.f32.mrb[36].mxu1  ;;  %v1571_v49 = vpop.f32.mrb[40].mxu0 }
 0x2fd   :  { %v9480_v32 = vadd.f32 %v1530_v15, %v1321_v21  ;;  %v9482_v34 = vadd.f32 %v1571_v49, %v1362_v18  ;;  %v1532_v36 = vpop.f32.mrb[37].mxu1  ;;  %v7163_v3 = vpop.f32.mrb[41].mxu0 }
 0x2fe   :  { %v9484_v5 = vadd.f32 %v1532_v36, %v1323_v11  ;;  %v1534_v25 = vpop.f32.mrb[38].mxu1  ;;  %v1574_v26 = vpop.f32.mrb[42].mxu0  ;;  %v7643_v11 = vld [vmem:[%s10833_s5 + $0x240] ss:$12 sps:$4 sm:$0xff]   ;;  %v7646_v36 = vld [vmem:[%s10833_s5 + $0x248] ss:$12 sps:$4 sm:$0xff]  }
 0x2ff   :  { %v1535_v39 = vpop.f32.mrb[39].mxu1  ;;  %v7164_v42 = vpop.f32.mrb[43].mxu0  ;;  %v7650_v25 = vld [vmem:[%s10833_s5 + $0x260] ss:$12 sps:$4 sm:$0xff]  }
 0x300   :  { %v1591_v15 = vpop.permute.xlu1 %1590  ;;  %v7653_v39 = vld [vmem:[%s10833_s5 + $0x274] ss:$12 sps:$4 sm:$0xff]   ;;  %v7651_v42 = vld [vmem:[%s10833_s5 + $0x270] ss:$12 sps:$4 sm:$0xff]  }
 0x30c   :  { %v1635_v28 = vpop.f32.mrb[40].mxu1 }
 0x30d   :  { %v1636_v33 = vadd.f32 %v1635_v28, %v1586_v51  ;;  %v7175_v43 = vpop.f32.mrb[41].mxu1  ;;  %v7654_v28 = vld [vmem:[%s10833_s5 + $0x278] ss:$12 sps:$4 sm:$0xff]  }
 0x30e   :  { %v1638_v61 = vpop.f32.mrb[42].mxu1  ;;  %v7657_v43 = vld [vmem:[%s10833_s5 + $0x28c] ss:$12 sps:$4 sm:$0xff]  }
 0x30f   :  { %v1644_v2 = vmin.f32 %v1636_v33, 0.0  ;;  %v7176_v4 = vpop.f32.mrb[43].mxu1  ;;  %vm1642_vm12 = vcmp.gt.f32.partialorder %v1636_v33, 0.0  ;;  %v1639_v3 = vadd.f32 %v1638_v61, %v1591_v15  ;;  %v7655_v61 = vld [vmem:[%s10833_s5 + $0x288] ss:$12 sps:$4 sm:$0xff]  }
 0x310   :  { %v7649_v4 = vld [vmem:[%s10833_s5 + $0x25c] ss:$12 sps:$4 sm:$0xff]  }
 0x311   :  { %v1646_v7 = vmul.f32 1.442695, %v1644_v2  ;;  %v1645_v26 = vmin.f32 %v1639_v3, 0.0  ;;  %v7658_v2 = vld [vmem:[%s10833_s5 + $0x290] ss:$12 sps:$4 sm:$0xff]   ;;  %vm1643_vm13 = vcmp.gt.f32.partialorder %v1639_v3, 0.0 }
 0x312   :  { %v7662_v15 = vld [vmem:[%s10833_s5 + $0x2a8] ss:$12 sps:$4 sm:$0xff]  }
 0x313   :  { %8214 = vpow2.f32 %v1646_v7  ;;  %v7647_v7 = vld [vmem:[%s10833_s5 + $0x258] ss:$12 sps:$4 sm:$0xff]  }
 0x31d   :  { %v8215_v21 = vpop.eup %8214 }
 0x31e   :  { %v6049_v18 = vadd.f32 -1.0, %v8215_v21  ;;  %v7661_v21 = vld [vmem:[%s10833_s5 + $0x2a4] ss:$12 sps:$4 sm:$0xff]  }
 0x320   :  { %v1652_v49 = vsel %vm1642_vm12, %v1636_v33, %v6049_v18  ;;  %v1648_v33 = vmul.f32 1.442695, %v1645_v26  ;;  %v7659_v18 = vld [vmem:[%s10833_s5 + $0x2a0] ss:$12 sps:$4 sm:$0xff]   ;;  %vm5744_vm12 = vcmask 130048  }
 0x321   :  { %v1654_v51 = vpack.c.bf16 %v1652_v49, %v1652_v49  ;;  %v7665_v49 = vld [vmem:[%s10833_s5 + $0x2bc] ss:$12 sps:$4 sm:$0xff]   ;;  %v7673_v26 = vld [vmem:[%s10833_s5 + $0x2ec] ss:$12 sps:$4 sm:$0xff]  }
 0x322   :  { %8216 = vpow2.f32 %v1648_v33 }
 0x323   :  { %1849 = vmatmul.mubr.bf16.vlgmr.msra.gmra.mrb[44].mxu1 %v1654_v51  ;;  %7194 = vmatmul.mubr.bf16.vlgmr.msra.gmra.mrb[44].mxu0 %v1654_v51  ;;  %v7669_v51 = vld [vmem:[%s10833_s5 + $0x2d4] ss:$12 sps:$4 sm:$0xff]  }
 0x324   :  { %2063 = vmatpush1.bf16.msra.mxu1 %v7643_v11  ;;  %7198 = vmatpush3.bf16.msra.mxu0 %v7646_v36  ;;  %v7663_v11 = vld [vmem:[%s10833_s5 + $0x2b8] ss:$12 sps:$4 sm:$0xff]   ;;  %v7666_v36 = vld [vmem:[%s10833_s5 + $0x2c0] ss:$12 sps:$4 sm:$0xff]  }
 0x325   :  { %2064 = vmatprep.subr.bf16.mxu1 %v7649_v4  ;;  %7199 = vmatprep.subr.bf16.mxu0 %v10870_v6 }
 0x326   :  { %2094 = vmatprep.mubr.bf16.mxu1 %v10871_v48  ;;  %7213 = vmatprep.mubr.msk.bf16.mxu0 %vm8278_vm1, %v10870_v6 }
 0x328   :  { %2065 = vmatpush1.bf16.msra.mxu1 %v7647_v7  ;;  %7200 = vmatpush3.bf16.msra.mxu0 %v7650_v25  ;;  %v7667_v7 = vld [vmem:[%s10833_s5 + $0x2d0] ss:$12 sps:$4 sm:$0xff]   ;;  %v7670_v25 = vld [vmem:[%s10833_s5 + $0x2d8] ss:$12 sps:$4 sm:$0xff]  }
 0x329   :  { %2066 = vmatprep.subr.bf16.mxu1 %v7653_v39  ;;  %7201 = vmatprep.subr.bf16.mxu0 %v10870_v6 }
 0x32c   :  { %2067 = vmatpush1.bf16.msra.mxu1 %v7651_v42  ;;  %7202 = vmatpush3.bf16.msra.mxu0 %v7654_v28  ;;  %v8217_v4 = vpop.eup %8216  ;;  %v7671_v42 = vld [vmem:[%s10833_s5 + $0x2e8] ss:$12 sps:$4 sm:$0xff]   ;;  %v7674_v28 = vld [vmem:[%s10833_s5 + $0x2f0] ss:$12 sps:$4 sm:$0xff]  }
 0x32d   :  { %2068 = vmatprep.subr.bf16.mxu1 %v7657_v43  ;;  %7203 = vmatprep.subr.bf16.mxu0 %v10870_v6  ;;  %v6050_v39 = vadd.f32 -1.0, %v8217_v4  ;;  %v7692_v4 = vld [vmem:[%s10833_s5 + $0x360] ss:$12 sps:$4 sm:$0xff]  }
 0x32f   :  { %v1653_v33 = vsel %vm1643_vm13, %v1639_v3, %v6050_v39  ;;  %v10877_v3 = vpack.c.bf16 %v9054_v16, %v9039_v40  ;;  %v7676_v40 = vld [vmem:[%s10833_s5 + $0x300] ss:$12 sps:$4 sm:$0xff]   ;;  %v7678_v16 = vld [vmem:[%s10833_s5 + $0x304] ss:$12 sps:$4 sm:$0xff]  }
 0x330   :  { %2069 = vmatpush1.bf16.msra.mxu1 %v7655_v61  ;;  %7204 = vmatpush3.bf16.msra.mxu0 %v7658_v2  ;;  %v1900_v43 = vpack.c.bf16 %v1653_v33, %v1653_v33  ;;  %v10876_v61 = vpack.c.bf16 %v9017_v1, %v8999_v56  ;;  %v10878_v2 = vpack.c.bf16 %v9099_v14, %v9084_v23  ;;  %v7675_v56 = vld [vmem:[%s10831_s3 + $0x10] sm:$0xff]   ;;  %v7682_v14 = vld [vmem:[%s10833_s5 + $0x31c] ss:$12 sps:$4 sm:$0xff]   ;;  %v7699_v39 = vld [vmem:[%s10833_s5 + $0x380] ss:$12 sps:$4 sm:$0xff]  }
 0x331   :  { %2070 = vmatprep.subr.bf16.mxu1 %v7661_v21  ;;  %7205 = vmatprep.subr.bf16.mxu0 %v10870_v6  ;;  %v10879_v1 = vpack.c.bf16 %v9144_v24, %v9123_v19  ;;  %v7679_v23 = vld [vmem:[%s10833_s5 + $0x308] ss:$12 sps:$4 sm:$0xff]   ;;  %v7683_v19 = vld [vmem:[%s10833_s5 + $0x320] ss:$12 sps:$4 sm:$0xff]   ;;  %v7680_v24 = vld [vmem:[%s10833_s5 + $0x318] ss:$12 sps:$4 sm:$0xff]  }
 0x332   :  { %v7686_v21 = vld [vmem:[%s10833_s5 + $0x334] ss:$12 sps:$4 sm:$0xff]   ;;  %v7703_v33 = vld [vmem:[%s10833_s5 + $0x398] ss:$12 sps:$4 sm:$0xff]  }
 0x334   :  { %2071 = vmatpush1.bf16.msra.mxu1 %v7659_v18  ;;  %7206 = vmatpush3.bf16.msra.mxu0 %v7662_v15  ;;  %v7687_v18 = vld [vmem:[%s10833_s5 + $0x338] ss:$12 sps:$4 sm:$0xff]   ;;  %v7684_v15 = vld [vmem:[%s10833_s5 + $0x330] ss:$12 sps:$4 sm:$0xff]  }
 0x335   :  { %2072 = vmatprep.subr.bf16.mxu1 %v7665_v49  ;;  %7207 = vmatprep.subr.bf16.mxu0 %v10870_v6  ;;  %v7690_v49 = vld [vmem:[%s10833_s5 + $0x34c] ss:$12 sps:$4 sm:$0xff]  }
 0x338   :  { %2073 = vmatpush1.bf16.msra.mxu1 %v7663_v11  ;;  %7208 = vmatpush3.bf16.msra.mxu0 %v7666_v36  ;;  %v7688_v11 = vld [vmem:[%s10833_s5 + $0x348] ss:$12 sps:$4 sm:$0xff]   ;;  %v7691_v36 = vld [vmem:[%s10833_s5 + $0x350] ss:$12 sps:$4 sm:$0xff]  }
 0x339   :  { %2074 = vmatprep.subr.bf16.mxu1 %v7669_v51  ;;  %7209 = vmatprep.subr.bf16.mxu0 %v10870_v6  ;;  %v7694_v51 = vld [vmem:[%s10833_s5 + $0x364] ss:$12 sps:$4 sm:$0xff]  }
 0x33c   :  { %2075 = vmatpush1.bf16.msra.mxu1 %v7667_v7  ;;  %7210 = vmatpush3.bf16.msra.mxu0 %v7670_v25  ;;  %v7695_v7 = vld [vmem:[%s10833_s5 + $0x368] ss:$12 sps:$4 sm:$0xff]  }
 0x33d   :  { %2076 = vmatprep.subr.bf16.mxu1 %v7673_v26  ;;  %7211 = vmatprep.subr.bf16.mxu0 %v10870_v6  ;;  %v7698_v25 = vld [vmem:[%s10833_s5 + $0x37c] ss:$12 sps:$4 sm:$0xff]   ;;  %v7696_v26 = vld [vmem:[%s10833_s5 + $0x378] ss:$12 sps:$4 sm:$0xff]  }
 0x340   :  { %2077 = vmatpush1.bf16.msra.mxu1 %v7671_v42  ;;  %7212 = vmatpush3.bf16.msra.mxu0 %v7674_v28  ;;  %v7702_v42 = vld [vmem:[%s10833_s5 + $0x394] ss:$12 sps:$4 sm:$0xff]   ;;  %v7700_v28 = vld [vmem:[%s10833_s5 + $0x390] ss:$12 sps:$4 sm:$0xff]  }
 0x341   :  { %7217 = vmatprep.subr.bf16.mxu1 %v10870_v6  ;;  %2385 = vmatprep.subr.bf16.mxu0 %v7678_v16 }
 0x343   :  { %2095 = vmatmul.mubr.bf16.vlgmr.msra.gmra.mrb[48].mxu1 %v1900_v43  ;;  %7214 = vmatmul.mubr.bf16.vlgmr.msra.gmra.mrb[48].mxu0 %v1900_v43  ;;  %v7706_v43 = vld [vmem:[%s10833_s5 + $0x3ac] ss:$12 sps:$4 sm:$0xff]  }
 0x344   :  { %7218 = vmatpush3.bf16.msra.mxu1 %v10876_v61  ;;  %7225 = vmatprep.mubr.msk.bf16.mxu1 %vm8278_vm1, %v10870_v6  ;;  %v7704_v61 = vld [vmem:[%s10833_s5 + $0x3a8] ss:$12 sps:$4 sm:$0xff]  }
 0x345   :  { %7219 = vmatprep.subr.bf16.mxu1 %v10870_v6  ;;  %2417 = vmatprep.mubr.bf16.mxu0 %v10871_v48 }
 0x346   :  { %2386 = vmatpush1.bf16.msra.mxu0 %v7676_v40 }
 0x347   :  { %2387 = vmatprep.subr.bf16.mxu0 %v7682_v14 }
 0x348   :  { %7220 = vmatpush3.bf16.msra.mxu1 %v10877_v3  ;;  %v7707_v3 = vld [vmem:[%s10833_s5 + $0x3b0] ss:$12 sps:$4 sm:$0xff]  }
 0x349   :  { %7221 = vmatprep.subr.bf16.mxu1 %v10870_v6 }
 0x34a   :  { %2388 = vmatpush1.bf16.msra.mxu0 %v7680_v24 }
 0x34b   :  { %2389 = vmatprep.subr.bf16.mxu0 %v7686_v21 }
 0x34c   :  { %7222 = vmatpush3.bf16.msra.mxu1 %v10878_v2  ;;  %v7710_v2 = vld [vmem:[%s10833_s5 + $0x3c4] ss:$12 sps:$4 sm:$0xff]  }
 0x34d   :  { %7223 = vmatprep.subr.bf16.mxu1 %v10870_v6 }
 0x34e   :  { %2390 = vmatpush1.bf16.msra.mxu0 %v7684_v15 }
 0x34f   :  { %2391 = vmatprep.subr.bf16.mxu0 %v7690_v49 }
 0x350   :  { %7224 = vmatpush3.bf16.msra.mxu1 %v10879_v1 }
 0x351   :  { %7229 = vmatprep.subr.bf16.mxu1 %v10870_v6 }
 0x352   :  { %2392 = vmatpush1.bf16.msra.mxu0 %v7688_v11 }
 0x353   :  { %7226 = vmatmul.mubr.msk.bf16.vlgmr.msra.gmra.mrb[52].mxu1 %vm296_vm0, %v7675_v56  ;;  %2393 = vmatprep.subr.bf16.mxu0 %v7694_v51 }
 0x354   :  { %7245 = vmatprep.mubr.msk.bf16.mxu1 %vm8278_vm1, %v10870_v6  ;;  %7230 = vmatpush3.bf16.msra.mxu1 %v7679_v23 }
 0x355   :  { %7231 = vmatprep.subr.bf16.mxu1 %v10870_v6 }
 0x356   :  { %2394 = vmatpush1.bf16.msra.mxu0 %v7692_v4 }
 0x357   :  { %2395 = vmatprep.subr.bf16.mxu0 %v7698_v25 }
 0x358   :  { %7232 = vmatpush3.bf16.msra.mxu1 %v7683_v19 }
 0x359   :  { %7233 = vmatprep.subr.bf16.mxu1 %v10870_v6 }
 0x35a   :  { %2396 = vmatpush1.bf16.msra.mxu0 %v7696_v26 }
 0x35b   :  { %2397 = vmatprep.subr.bf16.mxu0 %v7702_v42  ;;  %v2155_v42 = vpop.permute.xlu0 %2154 }
 0x35c   :  { %7234 = vmatpush3.bf16.msra.mxu1 %v7687_v18 }
 0x35d   :  { %7235 = vmatprep.subr.bf16.mxu1 %v10870_v6 }
 0x35e   :  { %2398 = vmatpush1.bf16.msra.mxu0 %v7700_v28 }
 0x35f   :  { %2399 = vmatprep.subr.bf16.mxu0 %v7706_v43 }
 0x360   :  { %7236 = vmatpush3.bf16.msra.mxu1 %v7691_v36 }
 0x361   :  { %7237 = vmatprep.subr.bf16.mxu1 %v10870_v6 }
 0x362   :  { %2400 = vmatpush1.bf16.msra.mxu0 %v7704_v61 }
 0x363   :  { %2631 = vmatprep.subr.bf16.mxu0 %v7710_v2 }
 0x364   :  { %7238 = vmatpush3.bf16.msra.mxu1 %v7695_v7 }
 0x365   :  { %7239 = vmatprep.subr.bf16.mxu1 %v10870_v6 }
 0x368   :  { %7240 = vmatpush3.bf16.msra.mxu1 %v7699_v39 }
 0x369   :  { %7241 = vmatprep.subr.bf16.mxu1 %v10870_v6 }
 0x36c   :  { %7242 = vmatpush3.bf16.msra.mxu1 %v7703_v33 }
 0x36d   :  { %7243 = vmatprep.subr.bf16.mxu1 %v10870_v6 }
 0x370   :  { %7244 = vmatpush3.bf16.msra.mxu1 %v7707_v3 }
 0x371   :  { %7249 = vmatprep.subr.bf16.mxu1 %v10870_v6 }
 0x3f6   :  { %v1850_v56 = vpop.f32.mrb[44].mxu1  ;;  %v1891_v1 = vpop.f32.mrb[44].mxu0 }
 0x3f7   :  { %v1897_v40 = vadd.f32 %v1850_v56, %v9480_v32  ;;  %v1899_v16 = vadd.f32 %v1891_v1, %v9482_v34  ;;  %v1852_v23 = vpop.f32.mrb[45].mxu1  ;;  %v7195_v14 = vpop.f32.mrb[45].mxu0 }
 0x3f8   :  { %v1898_v19 = vadd.f32 %v1852_v23, %v9484_v5  ;;  %v1854_v24 = vpop.f32.mrb[46].mxu1  ;;  %v1894_v21 = vpop.f32.mrb[46].mxu0  ;;  %v7708_v23 = vld [vmem:[%s10833_s5 + $0x3c0] ss:$12 sps:$4 sm:$0xff]   ;;  %v7711_v14 = vld [vmem:[%s10833_s5 + $0x3c8] ss:$12 sps:$4 sm:$0xff]  }
 0x3f9   :  { %v1855_v18 = vpop.f32.mrb[47].mxu1  ;;  %v7196_v15 = vpop.f32.mrb[47].mxu0  ;;  %v7714_v21 = vld [vmem:[%s10833_s5 + $0x3dc] ss:$12 sps:$4 sm:$0xff]  }
 0x3fa   :  { %v7712_v18 = vld [vmem:[%s10833_s5 + $0x3d8] ss:$12 sps:$4 sm:$0xff]   ;;  %v7715_v15 = vld [vmem:[%s10833_s5 + $0x3e0] ss:$12 sps:$4 sm:$0xff]  }
 0x416   :  { %v2096_v49 = vpop.f32.mrb[48].mxu1  ;;  %v2137_v11 = vpop.f32.mrb[48].mxu0 }
 0x417   :  { %v9677_v36 = vadd.f32 %v2096_v49, %v1897_v40  ;;  %v9679_v51 = vadd.f32 %v2137_v11, %v1899_v16  ;;  %v2098_v4 = vpop.f32.mrb[49].mxu1  ;;  %v7215_v7 = vpop.f32.mrb[49].mxu0  ;;  %v7718_v11 = vld [vmem:[%s10833_s5 + $0x3f4] ss:$12 sps:$4 sm:$0xff]  }
 0x418   :  { %v9681_v25 = vadd.f32 %v2098_v4, %v1898_v19  ;;  %v2100_v32 = vpop.f32.mrb[50].mxu1  ;;  %v2140_v34 = vpop.f32.mrb[50].mxu0  ;;  %v7716_v4 = vld [vmem:[%s10833_s5 + $0x3f0] ss:$12 sps:$4 sm:$0xff]   ;;  %v7719_v7 = vld [vmem:[%s10833_s5 + $0x3f8] ss:$12 sps:$4 sm:$0xff]  }
 0x419   :  { %v2101_v26 = vpop.f32.mrb[51].mxu1  ;;  %v7216_v39 = vpop.f32.mrb[51].mxu0  ;;  %v7722_v34 = vld [vmem:[%s10833_s5 + $0x40c] ss:$12 sps:$4 sm:$0xff]  }
 0x41a   :  { %v2160_v40 = vpop.permute.xlu1 %2159  ;;  %v7720_v26 = vld [vmem:[%s10833_s5 + $0x408] ss:$12 sps:$4 sm:$0xff]   ;;  %v7723_v39 = vld [vmem:[%s10833_s5 + $0x410] ss:$12 sps:$4 sm:$0xff]  }
 0x426   :  { %v2204_v5 = vpop.f32.mrb[52].mxu1 }
 0x427   :  { %v2205_v28 = vadd.f32 %v2204_v5, %v2155_v42  ;;  %v7227_v33 = vpop.f32.mrb[53].mxu1  ;;  %v7726_v42 = vld [vmem:[%s10833_s5 + $0x424] ss:$12 sps:$4 sm:$0xff]   ;;  %v7724_v5 = vld [vmem:[%s10833_s5 + $0x420] ss:$12 sps:$4 sm:$0xff]  }
 0x428   :  { %v2207_v43 = vpop.f32.mrb[54].mxu1  ;;  %v7730_v33 = vld [vmem:[%s10833_s5 + $0x43c] ss:$12 sps:$4 sm:$0xff]  }
 0x429   :  { %v2213_v61 = vmin.f32 %v2205_v28, 0.0  ;;  %v7228_v3 = vpop.f32.mrb[55].mxu1  ;;  %vm2211_vm14 = vcmp.gt.f32.partialorder %v2205_v28, 0.0  ;;  %v2208_v24 = vadd.f32 %v2207_v43, %v2160_v40  ;;  %v7728_v43 = vld [vmem:[%s10833_s5 + $0x438] ss:$12 sps:$4 sm:$0xff]  }
 0x42a   :  { %v7734_v3 = vld [vmem:[%s10833_s5 + $0x454] ss:$12 sps:$4 sm:$0xff]   ;;  %v7738_v40 = vld [vmem:[%s10833_s5 + $0x46c] ss:$12 sps:$4 sm:$0xff]  }
 0x42b   :  { %v2215_v2 = vmul.f32 1.442695, %v2213_v61  ;;  %v2214_v49 = vmin.f32 %v2208_v24, 0.0  ;;  %v7731_v61 = vld [vmem:[%s10833_s5 + $0x440] ss:$12 sps:$4 sm:$0xff]   ;;  %vm2212_vm15 = vcmp.gt.f32.partialorder %v2208_v24, 0.0 }
 0x42d   :  { %8218 = vpow2.f32 %v2215_v2  ;;  %v2217_v32 = vmul.f32 1.442695, %v2214_v49  ;;  %v7751_v49 = vld [vmem:[%s10833_s5 + $0x4b4] ss:$12 sps:$4 sm:$0xff]  }
 0x42f   :  { %8220 = vpow2.f32 %v2217_v32  ;;  %v7753_v32 = vld [vmem:[%s10833_s5 + $0x4c8] ss:$12 sps:$4 sm:$0xff]  }
 0x437   :  { %v8219_v56 = vpop.eup %8218 }
 0x438   :  { %v6169_v1 = vadd.f32 -1.0, %v8219_v56  ;;  %v7732_v56 = vld [vmem:[%s10833_s5 + $0x450] ss:$12 sps:$4 sm:$0xff]  }
 0x439   :  { %v8221_v2 = vpop.eup %8220 }
 0x43a   :  { %v2221_v16 = vsel %vm2211_vm14, %v2205_v28, %v6169_v1  ;;  %v7727_v28 = vld [vmem:[%s10833_s5 + $0x428] ss:$12 sps:$4 sm:$0xff]   ;;  %v7735_v1 = vld [vmem:[%s10833_s5 + $0x458] ss:$12 sps:$4 sm:$0xff]  }
 0x43b   :  { %v2223_v19 = vpack.c.bf16 %v2221_v16, %v2221_v16  ;;  %v6170_v16 = vadd.f32 -1.0, %v8221_v2  ;;  %v7771_v2 = vld [vmem:[%s10833_s5 + $0x52c] ss:$12 sps:$4 sm:$0xff]  }
 0x43d   :  { %2418 = vmatmul.mubr.bf16.vlgmr.msra.gmra.mrb[52].mxu0 %v2223_v19  ;;  %7246 = vmatmul.mubr.bf16.vlgmr.msra.gmra.mrb[56].mxu1 %v2223_v19  ;;  %v2222_v19 = vsel %vm2212_vm15, %v2208_v24, %v6170_v16  ;;  %v10881_v24 = vpack.c.bf16 %v9068_v10, %v9046_v37  ;;  %v7741_v37 = vld [vmem:[%s10833_s5 + $0x480] ss:$12 sps:$4 sm:$0xff]   ;;  %v7743_v10 = vld [vmem:[%s10833_s5 + $0x484] ss:$12 sps:$4 sm:$0xff]  }
 0x43e   :  { %2632 = vmatpush1.bf16.msra.mxu0 %v7708_v23  ;;  %7250 = vmatpush3.bf16.msra.mxu1 %v7711_v14  ;;  %v7736_v23 = vld [vmem:[%s10833_s5 + $0x468] ss:$12 sps:$4 sm:$0xff]   ;;  %v7739_v14 = vld [vmem:[%s10833_s5 + $0x470] ss:$12 sps:$4 sm:$0xff]  }
 0x43f   :  { %2633 = vmatprep.subr.bf16.mxu0 %v7714_v21  ;;  %7251 = vmatprep.subr.bf16.mxu1 %v10870_v6  ;;  %v2469_v21 = vpack.c.bf16 %v2222_v19, %v2222_v19 }
 0x440   :  { %2663 = vmatprep.mubr.bf16.mxu0 %v10871_v48  ;;  %7265 = vmatprep.mubr.msk.bf16.mxu1 %vm8278_vm1, %v10870_v6 }
 0x442   :  { %2634 = vmatpush1.bf16.msra.mxu0 %v7712_v18  ;;  %7252 = vmatpush3.bf16.msra.mxu1 %v7715_v15  ;;  %v10880_v18 = vpack.c.bf16 %v9027_v29, %v9007_v31  ;;  %v10882_v15 = vpack.c.bf16 %v9110_v54, %v9093_v52  ;;  %v7740_v31 = vld [vmem:[%s10831_s3 + $0x18] sm:$0xff]   ;;  %v10883_v29 = vpack.c.bf16 %v9157_v27, %v9151_v0  ;;  %v7744_v52 = vld [vmem:[%s10833_s5 + $0x488] ss:$12 sps:$4 sm:$0xff]   ;;  %v7748_v27 = vld [vmem:[%s10833_s5 + $0x4a0] ss:$12 sps:$4 sm:$0xff]  }
 0x443   :  { %2635 = vmatprep.subr.bf16.mxu0 %v7718_v11  ;;  %7253 = vmatprep.subr.bf16.mxu1 %v10870_v6  ;;  %v7747_v54 = vld [vmem:[%s10833_s5 + $0x49c] ss:$12 sps:$4 sm:$0xff]   ;;  %v7745_v0 = vld [vmem:[%s10833_s5 + $0x498] ss:$12 sps:$4 sm:$0xff]  }
 0x444   :  { %v7752_v11 = vld [vmem:[%s10833_s5 + $0x4b8] ss:$12 sps:$4 sm:$0xff]  }
 0x446   :  { %2636 = vmatpush1.bf16.msra.mxu0 %v7716_v4  ;;  %7254 = vmatpush3.bf16.msra.mxu1 %v7719_v7  ;;  %v7749_v4 = vld [vmem:[%s10833_s5 + $0x4b0] ss:$12 sps:$4 sm:$0xff]   ;;  %v7755_v7 = vld [vmem:[%s10833_s5 + $0x4cc] ss:$12 sps:$4 sm:$0xff]  }
 0x447   :  { %2637 = vmatprep.subr.bf16.mxu0 %v7722_v34  ;;  %7255 = vmatprep.subr.bf16.mxu1 %v10870_v6  ;;  %v7756_v34 = vld [vmem:[%s10833_s5 + $0x4d0] ss:$12 sps:$4 sm:$0xff]  }
 0x44a   :  { %2638 = vmatpush1.bf16.msra.mxu0 %v7720_v26  ;;  %7256 = vmatpush3.bf16.msra.mxu1 %v7723_v39  ;;  %v7759_v26 = vld [vmem:[%s10833_s5 + $0x4e4] ss:$12 sps:$4 sm:$0xff]   ;;  %v7757_v39 = vld [vmem:[%s10833_s5 + $0x4e0] ss:$12 sps:$4 sm:$0xff]  }
 0x44b   :  { %2639 = vmatprep.subr.bf16.mxu0 %v7726_v42  ;;  %7257 = vmatprep.subr.bf16.mxu1 %v10870_v6  ;;  %v7760_v42 = vld [vmem:[%s10833_s5 + $0x4e8] ss:$12 sps:$4 sm:$0xff]  }
 0x44e   :  { %2640 = vmatpush1.bf16.msra.mxu0 %v7724_v5  ;;  %7258 = vmatpush3.bf16.msra.mxu1 %v7727_v28  ;;  %v7763_v5 = vld [vmem:[%s10833_s5 + $0x4fc] ss:$12 sps:$4 sm:$0xff]   ;;  %v7761_v28 = vld [vmem:[%s10833_s5 + $0x4f8] ss:$12 sps:$4 sm:$0xff]  }
 0x44f   :  { %2641 = vmatprep.subr.bf16.mxu0 %v7730_v33  ;;  %7259 = vmatprep.subr.bf16.mxu1 %v10870_v6  ;;  %v7764_v33 = vld [vmem:[%s10833_s5 + $0x500] ss:$12 sps:$4 sm:$0xff]  }
 0x452   :  { %2642 = vmatpush1.bf16.msra.mxu0 %v7728_v43  ;;  %7260 = vmatpush3.bf16.msra.mxu1 %v7731_v61  ;;  %v7767_v43 = vld [vmem:[%s10833_s5 + $0x514] ss:$12 sps:$4 sm:$0xff]   ;;  %v7765_v61 = vld [vmem:[%s10833_s5 + $0x510] ss:$12 sps:$4 sm:$0xff]  }
 0x453   :  { %2643 = vmatprep.subr.bf16.mxu0 %v7734_v3  ;;  %7261 = vmatprep.subr.bf16.mxu1 %v10870_v6  ;;  %v7768_v3 = vld [vmem:[%s10833_s5 + $0x518] ss:$12 sps:$4 sm:$0xff]  }
 0x456   :  { %2644 = vmatpush1.bf16.msra.mxu0 %v7732_v56  ;;  %7262 = vmatpush3.bf16.msra.mxu1 %v7735_v1  ;;  %v7769_v56 = vld [vmem:[%s10833_s5 + $0x528] ss:$12 sps:$4 sm:$0xff]   ;;  %v7772_v1 = vld [vmem:[%s10833_s5 + $0x530] ss:$12 sps:$4 sm:$0xff]  }
 0x457   :  { %2645 = vmatprep.subr.bf16.mxu0 %v7738_v40  ;;  %7263 = vmatprep.subr.bf16.mxu1 %v10870_v6  ;;  %v7775_v40 = vld [vmem:[%s10833_s5 + $0x544] ss:$12 sps:$4 sm:$0xff]  }
 0x45a   :  { %2646 = vmatpush1.bf16.msra.mxu0 %v7736_v23  ;;  %7264 = vmatpush3.bf16.msra.mxu1 %v7739_v14 }
 0x45b   :  { %7269 = vmatprep.subr.bf16.mxu0 %v10870_v6  ;;  %2954 = vmatprep.subr.bf16.mxu1 %v7743_v10 }
 0x45d   :  { %2664 = vmatmul.mubr.bf16.vlgmr.msra.gmra.mrb[56].mxu0 %v2469_v21  ;;  %7266 = vmatmul.mubr.bf16.vlgmr.msra.gmra.mrb[60].mxu1 %v2469_v21 }
 0x45e   :  { %7270 = vmatpush3.bf16.msra.mxu0 %v10880_v18  ;;  %7277 = vmatprep.mubr.msk.bf16.mxu0 %vm8278_vm1, %v10870_v6 }
 0x45f   :  { %7271 = vmatprep.subr.bf16.mxu0 %v10870_v6  ;;  %2986 = vmatprep.mubr.bf16.mxu1 %v10871_v48 }
 0x460   :  { %2955 = vmatpush1.bf16.msra.mxu1 %v7741_v37 }
 0x461   :  { %2956 = vmatprep.subr.bf16.mxu1 %v7747_v54 }
 0x462   :  { %7272 = vmatpush3.bf16.msra.mxu0 %v10881_v24 }
 0x463   :  { %7273 = vmatprep.subr.bf16.mxu0 %v10870_v6 }
 0x464   :  { %2957 = vmatpush1.bf16.msra.mxu1 %v7745_v0 }
 0x465   :  { %2958 = vmatprep.subr.bf16.mxu1 %v7751_v49 }
 0x466   :  { %7274 = vmatpush3.bf16.msra.mxu0 %v10882_v15 }
 0x467   :  { %7275 = vmatprep.subr.bf16.mxu0 %v10870_v6 }
 0x468   :  { %2959 = vmatpush1.bf16.msra.mxu1 %v7749_v4 }
 0x469   :  { %2960 = vmatprep.subr.bf16.mxu1 %v7755_v7 }
 0x46a   :  { %7276 = vmatpush3.bf16.msra.mxu0 %v10883_v29 }
 0x46b   :  { %7281 = vmatprep.subr.bf16.mxu0 %v10870_v6 }
 0x46c   :  { %2961 = vmatpush1.bf16.msra.mxu1 %v7753_v32  ;;  %v2724_v32 = vpop.permute.xlu0 %2723 }
 0x46d   :  { %7278 = vmatmul.mubr.msk.bf16.vlgmr.msra.gmra.mrb[60].mxu0 %vm296_vm0, %v7740_v31  ;;  %2962 = vmatprep.subr.bf16.mxu1 %v7759_v26 }
 0x46e   :  { %7297 = vmatprep.mubr.msk.bf16.mxu0 %vm8278_vm1, %v10870_v6  ;;  %7282 = vmatpush3.bf16.msra.mxu0 %v7744_v52 }
 0x46f   :  { %7283 = vmatprep.subr.bf16.mxu0 %v10870_v6 }
 0x470   :  { %2963 = vmatpush1.bf16.msra.mxu1 %v7757_v39 }
 0x471   :  { %2964 = vmatprep.subr.bf16.mxu1 %v7763_v5 }
 0x472   :  { %7284 = vmatpush3.bf16.msra.mxu0 %v7748_v27 }
 0x473   :  { %7285 = vmatprep.subr.bf16.mxu0 %v10870_v6 }
 0x474   :  { %2965 = vmatpush1.bf16.msra.mxu1 %v7761_v28 }
 0x475   :  { %2966 = vmatprep.subr.bf16.mxu1 %v7767_v43 }
 0x476   :  { %7286 = vmatpush3.bf16.msra.mxu0 %v7752_v11 }
 0x477   :  { %7287 = vmatprep.subr.bf16.mxu0 %v10870_v6 }
 0x478   :  { %2967 = vmatpush1.bf16.msra.mxu1 %v7765_v61  ;;  %v2729_v61 = vpop.permute.xlu1 %2728 }
 0x479   :  { %2968 = vmatprep.subr.bf16.mxu1 %v7771_v2  ;;  %v7773_v2 = vld [vmem:[%s10833_s5 + $0x540] ss:$12 sps:$4 sm:$0xff]  }
 0x47a   :  { %7288 = vmatpush3.bf16.msra.mxu0 %v7756_v34 }
 0x47b   :  { %7289 = vmatprep.subr.bf16.mxu0 %v10870_v6 }
 0x47c   :  { %2969 = vmatpush1.bf16.msra.mxu1 %v7769_v56  ;;  %v7776_v56 = vld [vmem:[%s10833_s5 + $0x548] ss:$12 sps:$4 sm:$0xff]  }
 0x47d   :  { %3200 = vmatprep.subr.bf16.mxu1 %v7775_v40 }
 0x47e   :  { %7290 = vmatpush3.bf16.msra.mxu0 %v7760_v42 }
 0x47f   :  { %7291 = vmatprep.subr.bf16.mxu0 %v10870_v6 }
 0x482   :  { %7292 = vmatpush3.bf16.msra.mxu0 %v7764_v33 }
 0x483   :  { %7293 = vmatprep.subr.bf16.mxu0 %v10870_v6 }
 0x486   :  { %7294 = vmatpush3.bf16.msra.mxu0 %v7768_v3 }
 0x487   :  { %7295 = vmatprep.subr.bf16.mxu0 %v10870_v6 }
 0x48a   :  { %7296 = vmatpush3.bf16.msra.mxu0 %v7772_v1 }
 0x48b   :  { %7301 = vmatprep.subr.bf16.mxu0 %v10870_v6 }
 0x510   :  { %v2419_v16 = vpop.f32.mrb[52].mxu0  ;;  %v2460_v23 = vpop.f32.mrb[56].mxu1 }
 0x511   :  { %v2466_v14 = vadd.f32 %v2419_v16, %v9677_v36  ;;  %v2468_v19 = vadd.f32 %v2460_v23, %v9679_v51  ;;  %v2421_v21 = vpop.f32.mrb[53].mxu0  ;;  %v7247_v18 = vpop.f32.mrb[57].mxu1  ;;  %v7779_v16 = vld [vmem:[%s10833_s5 + $0x55c] ss:$12 sps:$4 sm:$0xff]   ;;  %v7777_v23 = vld [vmem:[%s10833_s5 + $0x558] ss:$12 sps:$4 sm:$0xff]  }
 0x512   :  { %v2467_v24 = vadd.f32 %v2421_v21, %v9681_v25  ;;  %v2423_v15 = vpop.f32.mrb[54].mxu0  ;;  %v2463_v31 = vpop.f32.mrb[58].mxu1  ;;  %v7783_v21 = vld [vmem:[%s10833_s5 + $0x574] ss:$12 sps:$4 sm:$0xff]   ;;  %v7781_v18 = vld [vmem:[%s10833_s5 + $0x570] ss:$12 sps:$4 sm:$0xff]  }
 0x513   :  { %v2424_v29 = vpop.f32.mrb[55].mxu0  ;;  %v7248_v37 = vpop.f32.mrb[59].mxu1  ;;  %v7787_v31 = vld [vmem:[%s10833_s5 + $0x58c] ss:$12 sps:$4 sm:$0xff]  }
 0x514   :  { %v7785_v29 = vld [vmem:[%s10833_s5 + $0x588] ss:$12 sps:$4 sm:$0xff]   ;;  %v7788_v37 = vld [vmem:[%s10833_s5 + $0x590] ss:$12 sps:$4 sm:$0xff]  }
 0x530   :  { %v2665_v10 = vpop.f32.mrb[56].mxu0  ;;  %v2706_v52 = vpop.f32.mrb[60].mxu1 }
 0x531   :  { %v9874_v54 = vadd.f32 %v2665_v10, %v2466_v14  ;;  %v9876_v27 = vadd.f32 %v2706_v52, %v2468_v19  ;;  %v2667_v0 = vpop.f32.mrb[57].mxu0  ;;  %v7267_v49 = vpop.f32.mrb[61].mxu1  ;;  %v7780_v14 = vld [vmem:[%s10833_s5 + $0x560] ss:$12 sps:$4 sm:$0xff]   ;;  %v7791_v10 = vld [vmem:[%s10833_s5 + $0x5a4] ss:$12 sps:$4 sm:$0xff]  }
 0x532   :  { %v9878_v11 = vadd.f32 %v2667_v0, %v2467_v24  ;;  %v2669_v36 = vpop.f32.mrb[58].mxu0  ;;  %v2709_v51 = vpop.f32.mrb[62].mxu1  ;;  %v7784_v24 = vld [vmem:[%s10833_s5 + $0x578] ss:$12 sps:$4 sm:$0xff]   ;;  %v7789_v52 = vld [vmem:[%s10833_s5 + $0x5a0] ss:$12 sps:$4 sm:$0xff]  }
 0x533   :  { %v2670_v4 = vpop.f32.mrb[59].mxu0  ;;  %v7268_v7 = vpop.f32.mrb[63].mxu1  ;;  %v7792_v0 = vld [vmem:[%s10833_s5 + $0x5a8] ss:$12 sps:$4 sm:$0xff]   ;;  %v7793_v36 = vld [vmem:[%s10833_s5 + $0x5b8] ss:$12 sps:$4 sm:$0xff]  }
 0x534   :  { %v7795_v49 = vld [vmem:[%s10833_s5 + $0x5bc] ss:$12 sps:$4 sm:$0xff]   ;;  %v7796_v51 = vld [vmem:[%s10833_s5 + $0x5c0] ss:$12 sps:$4 sm:$0xff]  }
 0x535   :  { %v7799_v4 = vld [vmem:[%s10833_s5 + $0x5d4] ss:$12 sps:$4 sm:$0xff]  }
 0x540   :  { %v2773_v25 = vpop.f32.mrb[60].mxu0 }
 0x541   :  { %v2774_v34 = vadd.f32 %v2773_v25, %v2724_v32  ;;  %v7279_v26 = vpop.f32.mrb[61].mxu0  ;;  %v7797_v32 = vld [vmem:[%s10833_s5 + $0x5d0] ss:$12 sps:$4 sm:$0xff]   ;;  %v7800_v25 = vld [vmem:[%s10833_s5 + $0x5d8] ss:$12 sps:$4 sm:$0xff]  }
 0x542   :  { %v2776_v39 = vpop.f32.mrb[62].mxu0 }
 0x543   :  { %v2782_v42 = vmin.f32 %v2774_v34, 0.0  ;;  %v7280_v5 = vpop.f32.mrb[63].mxu0  ;;  %vm2780_vm2 = vcmp.gt.f32.partialorder %v2774_v34, 0.0  ;;  %v2777_v40 = vadd.f32 %v2776_v39, %v2729_v61  ;;  %v7801_v39 = vld [vmem:[%s10833_s5 + $0x5e8] ss:$12 sps:$4 sm:$0xff]   ;;  %v10886_v61 = vpack.c.bf16 %v8783_v22, %v8779_v17 }
 0x544   :  { %v7809_v17 = vld [vmem:[%s10833_s5 + $0x608] ss:$12 sps:$4 sm:$0xff]  }
 0x545   :  { %v2784_v28 = vmul.f32 1.442695, %v2782_v42  ;;  %v2783_v19 = vmin.f32 %v2777_v40, 0.0  ;;  %v7804_v42 = vld [vmem:[%s10833_s5 + $0x5f0] ss:$12 sps:$4 sm:$0xff]   ;;  %vm2781_vm3 = vcmp.gt.f32.partialorder %v2777_v40, 0.0 }
 0x546   :  { %v7812_v22 = vld [vmem:[%s10833_s5 + $0x61c] ss:$12 sps:$4 sm:$0xff]  }
 0x547   :  { %8222 = vpow2.f32 %v2784_v28  ;;  %v2786_v15 = vmul.f32 1.442695, %v2783_v19  ;;  %v7824_v19 = vld [vmem:[%s10833_s5 + $0x664] ss:$12 sps:$4 sm:$0xff]  }
 0x549   :  { %8224 = vpow2.f32 %v2786_v15  ;;  %v7826_v15 = vld [vmem:[%s10833_s5 + $0x678] ss:$12 sps:$4 sm:$0xff]  }
 0x551   :  { %v8223_v33 = vpop.eup %8222 }
 0x552   :  { %v6289_v43 = vadd.f32 -1.0, %v8223_v33  ;;  %v10884_v33 = vpack.c.bf16 %v8731_v46, %v8726_v55  ;;  %v7805_v55 = vld [vmem:[%s10831_s3 + $0x20] sm:$0xff]  }
 0x553   :  { %v8225_v7 = vpop.eup %8224  ;;  %v10887_v46 = vld [vmem:[#allocation12_spill] sm:$0xff] }
 0x554   :  { %v2790_v3 = vsel %vm2780_vm2, %v2774_v34, %v6289_v43  ;;  %v7803_v34 = vld [vmem:[%s10833_s5 + $0x5ec] ss:$12 sps:$4 sm:$0xff]   ;;  %v6290_v26 = vadd.f32 -1.0, %v8225_v7  ;;  %v10885_v43 = vpack.c.bf16 %v8765_v50, %v8757_v38  ;;  %v7808_v50 = vld [vmem:[%s10833_s5 + $0x604] ss:$12 sps:$4 sm:$0xff]  }
 0x555   :  { %v2792_v1 = vpack.c.bf16 %v2790_v3, %v2790_v3  ;;  %v10888_v3 = vpack.c.bf16 %v8804_v44, %v10887_v46  ;;  %v7806_v38 = vld [vmem:[%s10833_s5 + $0x600] ss:$12 sps:$4 sm:$0xff]  }
 0x556   :  { %v2791_v5 = vsel %vm2781_vm3, %v2777_v40, %v6290_v26  ;;  %v7813_v44 = vld [vmem:[%s10833_s5 + $0x620] ss:$12 sps:$4 sm:$0xff]   ;;  %v7814_v40 = vld [vmem:[%s10833_s5 + $0x630] ss:$12 sps:$4 sm:$0xff]  }
 0x557   :  { %2987 = vmatmul.mubr.bf16.vlgmr.msra.gmra.mrb[64].mxu1 %v2792_v1  ;;  %7298 = vmatmul.mubr.bf16.vlgmr.msra.gmra.mrb[64].mxu0 %v2792_v1  ;;  %v3038_v28 = vpack.c.bf16 %v2791_v5, %v2791_v5  ;;  %v7817_v1 = vld [vmem:[%s10833_s5 + $0x638] ss:$12 sps:$4 sm:$0xff]  }
 0x558   :  { %3201 = vmatpush1.bf16.msra.mxu1 %v7773_v2  ;;  %7302 = vmatpush3.bf16.msra.mxu0 %v7776_v56  ;;  %v7810_v2 = vld [vmem:[%s10833_s5 + $0x618] ss:$12 sps:$4 sm:$0xff]   ;;  %v7816_v56 = vld [vmem:[%s10833_s5 + $0x634] ss:$12 sps:$4 sm:$0xff]  }
 0x559   :  { %3202 = vmatprep.subr.bf16.mxu1 %v7779_v16  ;;  %7303 = vmatprep.subr.bf16.mxu0 %v10870_v6  ;;  %v7820_v16 = vld [vmem:[%s10833_s5 + $0x64c] ss:$12 sps:$4 sm:$0xff]  }
 0x55a   :  { %3232 = vmatprep.mubr.bf16.mxu1 %v10871_v48  ;;  %7317 = vmatprep.mubr.msk.bf16.mxu0 %vm8278_vm1, %v10870_v6 }
 0x55c   :  { %3203 = vmatpush1.bf16.msra.mxu1 %v7777_v23  ;;  %7304 = vmatpush3.bf16.msra.mxu0 %v7780_v14  ;;  %v7818_v23 = vld [vmem:[%s10833_s5 + $0x648] ss:$12 sps:$4 sm:$0xff]   ;;  %v7821_v14 = vld [vmem:[%s10833_s5 + $0x650] ss:$12 sps:$4 sm:$0xff]  }
 0x55d   :  { %3204 = vmatprep.subr.bf16.mxu1 %v7783_v21  ;;  %7305 = vmatprep.subr.bf16.mxu0 %v10870_v6  ;;  %v7822_v21 = vld [vmem:[%s10833_s5 + $0x660] ss:$12 sps:$4 sm:$0xff]  }
 0x560   :  { %3205 = vmatpush1.bf16.msra.mxu1 %v7781_v18  ;;  %7306 = vmatpush3.bf16.msra.mxu0 %v7784_v24  ;;  %v7825_v18 = vld [vmem:[%s10833_s5 + $0x668] ss:$12 sps:$4 sm:$0xff]  }
 0x561   :  { %3206 = vmatprep.subr.bf16.mxu1 %v7787_v31  ;;  %7307 = vmatprep.subr.bf16.mxu0 %v10870_v6  ;;  %v7828_v24 = vld [vmem:[%s10833_s5 + $0x67c] ss:$12 sps:$4 sm:$0xff]   ;;  %v7829_v31 = vld [vmem:[%s10833_s5 + $0x680] ss:$12 sps:$4 sm:$0xff]  }
 0x564   :  { %3207 = vmatpush1.bf16.msra.mxu1 %v7785_v29  ;;  %7308 = vmatpush3.bf16.msra.mxu0 %v7788_v37  ;;  %v7832_v29 = vld [vmem:[%s10833_s5 + $0x694] ss:$12 sps:$4 sm:$0xff]   ;;  %v7830_v37 = vld [vmem:[%s10833_s5 + $0x690] ss:$12 sps:$4 sm:$0xff]  }
 0x565   :  { %3208 = vmatprep.subr.bf16.mxu1 %v7791_v10  ;;  %7309 = vmatprep.subr.bf16.mxu0 %v10870_v6  ;;  %v7833_v10 = vld [vmem:[%s10833_s5 + $0x698] ss:$12 sps:$4 sm:$0xff]  }
 0x568   :  { %3209 = vmatpush1.bf16.msra.mxu1 %v7789_v52  ;;  %7310 = vmatpush3.bf16.msra.mxu0 %v7792_v0  ;;  %v7836_v52 = vld [vmem:[%s10833_s5 + $0x6ac] ss:$12 sps:$4 sm:$0xff]   ;;  %v7834_v0 = vld [vmem:[%s10833_s5 + $0x6a8] ss:$12 sps:$4 sm:$0xff]  }
 0x569   :  { %3210 = vmatprep.subr.bf16.mxu1 %v7795_v49  ;;  %7311 = vmatprep.subr.bf16.mxu0 %v10870_v6  ;;  %v7837_v49 = vld [vmem:[%s10833_s5 + $0x6b0] ss:$12 sps:$4 sm:$0xff]  }
 0x56c   :  { %3211 = vmatpush1.bf16.msra.mxu1 %v7793_v36  ;;  %7312 = vmatpush3.bf16.msra.mxu0 %v7796_v51  ;;  %v7840_v36 = vld [vmem:[%s10833_s5 + $0x6c4] ss:$12 sps:$4 sm:$0xff]  }
 0x56d   :  { %3212 = vmatprep.subr.bf16.mxu1 %v7799_v4  ;;  %7313 = vmatprep.subr.bf16.mxu0 %v10870_v6 }
 0x570   :  { %3213 = vmatpush1.bf16.msra.mxu1 %v7797_v32  ;;  %7314 = vmatpush3.bf16.msra.mxu0 %v7800_v25 }
 0x571   :  { %3214 = vmatprep.subr.bf16.mxu1 %v7803_v34  ;;  %7315 = vmatprep.subr.bf16.mxu0 %v10870_v6 }
 0x574   :  { %3215 = vmatpush1.bf16.msra.mxu1 %v7801_v39  ;;  %7316 = vmatpush3.bf16.msra.mxu0 %v7804_v42 }
 0x575   :  { %7321 = vmatprep.subr.bf16.mxu1 %v10870_v6  ;;  %3523 = vmatprep.subr.bf16.mxu0 %v7808_v50 }
 0x577   :  { %3233 = vmatmul.mubr.bf16.vlgmr.msra.gmra.mrb[68].mxu1 %v3038_v28  ;;  %7318 = vmatmul.mubr.bf16.vlgmr.msra.gmra.mrb[68].mxu0 %v3038_v28 }
 0x578   :  { %7322 = vmatpush3.bf16.msra.mxu1 %v10884_v33  ;;  %7329 = vmatprep.mubr.msk.bf16.mxu1 %vm8278_vm1, %v10870_v6 }
 0x579   :  { %7323 = vmatprep.subr.bf16.mxu1 %v10870_v6  ;;  %3555 = vmatprep.mubr.bf16.mxu0 %v10871_v48 }
 0x57a   :  { %3524 = vmatpush1.bf16.msra.mxu0 %v7806_v38 }
 0x57b   :  { %3525 = vmatprep.subr.bf16.mxu0 %v7812_v22  ;;  %v3293_v22 = vpop.permute.xlu0 %3292 }
 0x57c   :  { %7324 = vmatpush3.bf16.msra.mxu1 %v10885_v43 }
 0x57d   :  { %7325 = vmatprep.subr.bf16.mxu1 %v10870_v6 }
 0x57e   :  { %3526 = vmatpush1.bf16.msra.mxu0 %v7810_v2 }
 0x57f   :  { %3527 = vmatprep.subr.bf16.mxu0 %v7816_v56 }
 0x580   :  { %7326 = vmatpush3.bf16.msra.mxu1 %v10886_v61 }
 0x581   :  { %7327 = vmatprep.subr.bf16.mxu1 %v10870_v6 }
 0x582   :  { %3528 = vmatpush1.bf16.msra.mxu0 %v7814_v40 }
 0x583   :  { %3529 = vmatprep.subr.bf16.mxu0 %v7820_v16 }
 0x584   :  { %7328 = vmatpush3.bf16.msra.mxu1 %v10888_v3 }
 0x585   :  { %7333 = vmatprep.subr.bf16.mxu1 %v10870_v6 }
 0x586   :  { %3530 = vmatpush1.bf16.msra.mxu0 %v7818_v23 }
 0x587   :  { %7330 = vmatmul.mubr.msk.bf16.vlgmr.msra.gmra.mrb[72].mxu1 %vm296_vm0, %v7805_v55  ;;  %3531 = vmatprep.subr.bf16.mxu0 %v7824_v19  ;;  %v3298_v19 = vpop.permute.xlu1 %3297 }
 0x588   :  { %7349 = vmatprep.mubr.msk.bf16.mxu1 %vm8278_vm1, %v10870_v6  ;;  %7334 = vmatpush3.bf16.msra.mxu1 %v7809_v17 }
 0x589   :  { %7335 = vmatprep.subr.bf16.mxu1 %v10870_v6 }
 0x58a   :  { %3532 = vmatpush1.bf16.msra.mxu0 %v7822_v21 }
 0x58b   :  { %3533 = vmatprep.subr.bf16.mxu0 %v7828_v24  ;;  %v7841_v24 = vld [vmem:[%s10833_s5 + $0x6c8] ss:$12 sps:$4 sm:$0xff]  }
 0x58c   :  { %7336 = vmatpush3.bf16.msra.mxu1 %v7813_v44 }
 0x58d   :  { %7337 = vmatprep.subr.bf16.mxu1 %v10870_v6 }
 0x58e   :  { %3534 = vmatpush1.bf16.msra.mxu0 %v7826_v15 }
 0x58f   :  { %3535 = vmatprep.subr.bf16.mxu0 %v7832_v29  ;;  %v7844_v29 = vld [vmem:[%s10833_s5 + $0x6dc] ss:$12 sps:$4 sm:$0xff]  }
 0x590   :  { %7338 = vmatpush3.bf16.msra.mxu1 %v7817_v1 }
 0x591   :  { %7339 = vmatprep.subr.bf16.mxu1 %v10870_v6 }
 0x592   :  { %3536 = vmatpush1.bf16.msra.mxu0 %v7830_v37  ;;  %v7842_v37 = vld [vmem:[%s10833_s5 + $0x6d8] ss:$12 sps:$4 sm:$0xff]  }
 0x593   :  { %3537 = vmatprep.subr.bf16.mxu0 %v7836_v52 }
 0x594   :  { %7340 = vmatpush3.bf16.msra.mxu1 %v7821_v14 }
 0x595   :  { %7341 = vmatprep.subr.bf16.mxu1 %v10870_v6 }
 0x596   :  { %3538 = vmatpush1.bf16.msra.mxu0 %v7834_v0  ;;  %v7848_v0 = vld [vmem:[%s10833_s5 + $0x6f4] ss:$12 sps:$4 sm:$0xff]  }
 0x597   :  { %3769 = vmatprep.subr.bf16.mxu0 %v7840_v36  ;;  %v7849_v36 = vld [vmem:[%s10833_s5 + $0x6f8] ss:$12 sps:$4 sm:$0xff]  }
 0x598   :  { %7342 = vmatpush3.bf16.msra.mxu1 %v7825_v18  ;;  %v7838_v18 = vld [vmem:[%s10833_s5 + $0x6c0] ss:$12 sps:$4 sm:$0xff]  }
 0x599   :  { %7343 = vmatprep.subr.bf16.mxu1 %v10870_v6 }
 0x59c   :  { %7344 = vmatpush3.bf16.msra.mxu1 %v7829_v31 }
 0x59d   :  { %7345 = vmatprep.subr.bf16.mxu1 %v10870_v6 }
 0x5a0   :  { %7346 = vmatpush3.bf16.msra.mxu1 %v7833_v10  ;;  %v7845_v10 = vld [vmem:[%s10833_s5 + $0x6e0] ss:$12 sps:$4 sm:$0xff]  }
 0x5a1   :  { %7347 = vmatprep.subr.bf16.mxu1 %v10870_v6 }
 0x5a4   :  { %7348 = vmatpush3.bf16.msra.mxu1 %v7837_v49  ;;  %v7846_v49 = vld [vmem:[%s10833_s5 + $0x6f0] ss:$12 sps:$4 sm:$0xff]  }
 0x5a5   :  { %7353 = vmatprep.subr.bf16.mxu1 %v10870_v6 }
 0x62a   :  { %v2988_v51 = vpop.f32.mrb[64].mxu1  ;;  %v3029_v4 = vpop.f32.mrb[64].mxu0 }
 0x62b   :  { %v3035_v7 = vadd.f32 %v2988_v51, %v9874_v54  ;;  %v3037_v32 = vadd.f32 %v3029_v4, %v9876_v27  ;;  %v2990_v25 = vpop.f32.mrb[65].mxu1  ;;  %v7299_v34 = vpop.f32.mrb[65].mxu0  ;;  %v7852_v4 = vld [vmem:[%s10833_s5 + $0x70c] ss:$12 sps:$4 sm:$0xff]  }
 0x62c   :  { %v3036_v26 = vadd.f32 %v2990_v25, %v9878_v11  ;;  %v2992_v39 = vpop.f32.mrb[66].mxu1  ;;  %v3032_v42 = vpop.f32.mrb[66].mxu0  ;;  %v7856_v25 = vld [vmem:[%s10833_s5 + $0x724] ss:$12 sps:$4 sm:$0xff]   ;;  %v7854_v34 = vld [vmem:[%s10833_s5 + $0x720] ss:$12 sps:$4 sm:$0xff]  }
 0x62d   :  { %v2993_v5 = vpop.f32.mrb[67].mxu1  ;;  %v7300_v28 = vpop.f32.mrb[67].mxu0  ;;  %v7860_v39 = vld [vmem:[%s10833_s5 + $0x73c] ss:$12 sps:$4 sm:$0xff]   ;;  %v7858_v42 = vld [vmem:[%s10833_s5 + $0x738] ss:$12 sps:$4 sm:$0xff]  }
 0x62e   :  { %v7861_v5 = vld [vmem:[%s10833_s5 + $0x740] ss:$12 sps:$4 sm:$0xff]  }
 0x62f   :  { %v7864_v28 = vld [vmem:[%s10833_s5 + $0x754] ss:$12 sps:$4 sm:$0xff]  }
 0x64a   :  { %v3234_v33 = vpop.f32.mrb[68].mxu1  ;;  %v3275_v43 = vpop.f32.mrb[68].mxu0 }
 0x64b   :  { %v10071_v61 = vadd.f32 %v3234_v33, %v3035_v7  ;;  %v10073_v55 = vadd.f32 %v3275_v43, %v3037_v32  ;;  %v3236_v46 = vpop.f32.mrb[69].mxu1  ;;  %v7319_v3 = vpop.f32.mrb[69].mxu0  ;;  %v7850_v7 = vld [vmem:[%s10833_s5 + $0x708] ss:$12 sps:$4 sm:$0xff]   ;;  %v7853_v32 = vld [vmem:[%s10833_s5 + $0x710] ss:$12 sps:$4 sm:$0xff]  }
 0x64c   :  { %v10075_v38 = vadd.f32 %v3236_v46, %v3036_v26  ;;  %v3238_v54 = vpop.f32.mrb[70].mxu1  ;;  %v3278_v27 = vpop.f32.mrb[70].mxu0  ;;  %v7857_v26 = vld [vmem:[%s10833_s5 + $0x728] ss:$12 sps:$4 sm:$0xff]   ;;  %v7862_v43 = vld [vmem:[%s10833_s5 + $0x750] ss:$12 sps:$4 sm:$0xff]  }
 0x64d   :  { %v3239_v50 = vpop.f32.mrb[71].mxu1  ;;  %v7320_v17 = vpop.f32.mrb[71].mxu0  ;;  %v7865_v46 = vld [vmem:[%s10833_s5 + $0x758] ss:$12 sps:$4 sm:$0xff]   ;;  %v7866_v27 = vld [vmem:[%s10833_s5 + $0x768] ss:$12 sps:$4 sm:$0xff]  }
 0x64e   :  { %v7868_v3 = vld [vmem:[%s10833_s5 + $0x76c] ss:$12 sps:$4 sm:$0xff]   ;;  %v7869_v50 = vld [vmem:[%s10833_s5 + $0x770] ss:$12 sps:$4 sm:$0xff]  }
 0x65a   :  { %v3342_v11 = vpop.f32.mrb[72].mxu1 }
 0x65b   :  { %v3343_v44 = vadd.f32 %v3342_v11, %v3293_v22  ;;  %v7331_v2 = vpop.f32.mrb[73].mxu1  ;;  %v10889_v11 = vld [vmem:[#allocation7_spill] sm:$0xff] }
 0x65c   :  { %v3345_v56 = vpop.f32.mrb[74].mxu1 }
 0x65d   :  { %v3351_v1 = vmin.f32 %v3343_v44, 0.0  ;;  %v7332_v40 = vpop.f32.mrb[75].mxu1  ;;  %vm3349_vm4 = vcmp.gt.f32.partialorder %v3343_v44, 0.0  ;;  %v3346_v31 = vadd.f32 %v3345_v56, %v3298_v19  ;;  %v10892_v56 = vld [vmem:[#allocation9_spill] sm:$0xff] }
 0x65e   :  { %v7870_v19 = vld [vmem:[%s10831_s3 + $0x28] sm:$0xff]  }
 0x65f   :  { %v3353_v16 = vmul.f32 1.442695, %v3351_v1  ;;  %v3352_v52 = vmin.f32 %v3346_v31, 0.0  ;;  %vm3350_vm5 = vcmp.gt.f32.partialorder %v3346_v31, 0.0  ;;  %v10893_v1 = vld [vmem:[#allocation8_spill] sm:$0xff] }
 0x660   :  { %v10894_v40 = vpack.c.bf16 %v10892_v56, %v10893_v1 }
 0x661   :  { %8226 = vpow2.f32 %v3353_v16  ;;  %v3355_v51 = vmul.f32 1.442695, %v3352_v52  ;;  %v10895_v16 = vld [vmem:[#allocation11_spill] sm:$0xff] }
 0x662   :  { %v7875_v52 = vld [vmem:[%s10833_s5 + $0x798] ss:$12 sps:$4 sm:$0xff]  }
 0x663   :  { %8228 = vpow2.f32 %v3355_v51  ;;  %v7885_v51 = vld [vmem:[%s10833_s5 + $0x7cc] ss:$12 sps:$4 sm:$0xff]  }
 0x66b   :  { %v8227_v23 = vpop.eup %8226 }
 0x66c   :  { %v6409_v14 = vadd.f32 -1.0, %v8227_v23  ;;  %v10896_v23 = vld [vmem:[#allocation10_spill] sm:$0xff] }
 0x66d   :  { %v8229_v33 = vpop.eup %8228 }
 0x66e   :  { %v3359_v21 = vsel %vm3349_vm4, %v3343_v44, %v6409_v14  ;;  %v6410_v54 = vadd.f32 -1.0, %v8229_v33  ;;  %v10890_v44 = vld [vmem:[#allocation6_spill] sm:$0xff]  ;;  %v10897_v14 = vpack.c.bf16 %v10895_v16, %v10896_v23  ;;  %v7898_v33 = vld [vmem:[%s10833_s5 + $0x818] ss:$12 sps:$4 sm:$0xff]  }
 0x66f   :  { %v3361_v15 = vpack.c.bf16 %v3359_v21, %v3359_v21  ;;  %v10891_v2 = vpack.c.bf16 %v10889_v11, %v10890_v44  ;;  %v10898_v21 = vld [vmem:[#allocation14_spill] sm:$0xff] }
 0x670   :  { %v3360_v17 = vsel %vm3350_vm5, %v3346_v31, %v6410_v54  ;;  %v7873_v31 = vld [vmem:[%s10833_s5 + $0x784] ss:$12 sps:$4 sm:$0xff]  }
 0x671   :  { %3556 = vmatmul.mubr.bf16.vlgmr.msra.gmra.mrb[72].mxu0 %v3361_v15  ;;  %7350 = vmatmul.mubr.bf16.vlgmr.msra.gmra.mrb[76].mxu1 %v3361_v15  ;;  %v3607_v22 = vpack.c.bf16 %v3360_v17, %v3360_v17  ;;  %v7871_v15 = vld [vmem:[%s10833_s5 + $0x780] ss:$12 sps:$4 sm:$0xff]   ;;  %v7905_v54 = vld [vmem:[%s10833_s5 + $0x844] ss:$12 sps:$4 sm:$0xff]  }
 0x672   :  { %3770 = vmatpush1.bf16.msra.mxu0 %v7838_v18  ;;  %7354 = vmatpush3.bf16.msra.mxu1 %v7841_v24  ;;  %v10899_v18 = vld [vmem:[#allocation13_spill] sm:$0xff] }
 0x673   :  { %3771 = vmatprep.subr.bf16.mxu0 %v7844_v29  ;;  %7355 = vmatprep.subr.bf16.mxu1 %v10870_v6  ;;  %v10900_v24 = vpack.c.bf16 %v10898_v21, %v10899_v18  ;;  %v7874_v29 = vld [vmem:[%s10833_s5 + $0x788] ss:$12 sps:$4 sm:$0xff]  }
 0x674   :  { %3801 = vmatprep.mubr.bf16.mxu0 %v10871_v48  ;;  %7369 = vmatprep.mubr.msk.bf16.mxu1 %vm8278_vm1, %v10870_v6 }
 0x676   :  { %3772 = vmatpush1.bf16.msra.mxu0 %v7842_v37  ;;  %7356 = vmatpush3.bf16.msra.mxu1 %v7845_v10  ;;  %v7877_v37 = vld [vmem:[%s10833_s5 + $0x79c] ss:$12 sps:$4 sm:$0xff]   ;;  %v7878_v10 = vld [vmem:[%s10833_s5 + $0x7a0] ss:$12 sps:$4 sm:$0xff]  }
 0x677   :  { %3773 = vmatprep.subr.bf16.mxu0 %v7848_v0  ;;  %7357 = vmatprep.subr.bf16.mxu1 %v10870_v6  ;;  %v7881_v0 = vld [vmem:[%s10833_s5 + $0x7b4] ss:$12 sps:$4 sm:$0xff]  }
 0x67a   :  { %3774 = vmatpush1.bf16.msra.mxu0 %v7846_v49  ;;  %7358 = vmatpush3.bf16.msra.mxu1 %v7849_v36  ;;  %v7882_v49 = vld [vmem:[%s10833_s5 + $0x7b8] ss:$12 sps:$4 sm:$0xff]   ;;  %v7879_v36 = vld [vmem:[%s10833_s5 + $0x7b0] ss:$12 sps:$4 sm:$0xff]  }
 0x67b   :  { %3775 = vmatprep.subr.bf16.mxu0 %v7852_v4  ;;  %7359 = vmatprep.subr.bf16.mxu1 %v10870_v6  ;;  %v7883_v4 = vld [vmem:[%s10833_s5 + $0x7c8] ss:$12 sps:$4 sm:$0xff]  }
 0x67e   :  { %3776 = vmatpush1.bf16.msra.mxu0 %v7850_v7  ;;  %7360 = vmatpush3.bf16.msra.mxu1 %v7853_v32  ;;  %v7886_v7 = vld [vmem:[%s10833_s5 + $0x7d0] ss:$12 sps:$4 sm:$0xff]  }
 0x67f   :  { %3777 = vmatprep.subr.bf16.mxu0 %v7856_v25  ;;  %7361 = vmatprep.subr.bf16.mxu1 %v10870_v6  ;;  %v7889_v32 = vld [vmem:[%s10833_s5 + $0x7e4] ss:$12 sps:$4 sm:$0xff]   ;;  %v7887_v25 = vld [vmem:[%s10833_s5 + $0x7e0] ss:$12 sps:$4 sm:$0xff]  }
 0x682   :  { %3778 = vmatpush1.bf16.msra.mxu0 %v7854_v34  ;;  %7362 = vmatpush3.bf16.msra.mxu1 %v7857_v26  ;;  %v7890_v34 = vld [vmem:[%s10833_s5 + $0x7e8] ss:$12 sps:$4 sm:$0xff]  }
 0x683   :  { %3779 = vmatprep.subr.bf16.mxu0 %v7860_v39  ;;  %7363 = vmatprep.subr.bf16.mxu1 %v10870_v6  ;;  %v7893_v26 = vld [vmem:[%s10833_s5 + $0x7fc] ss:$12 sps:$4 sm:$0xff]   ;;  %v7891_v39 = vld [vmem:[%s10833_s5 + $0x7f8] ss:$12 sps:$4 sm:$0xff]  }
 0x686   :  { %3780 = vmatpush1.bf16.msra.mxu0 %v7858_v42  ;;  %7364 = vmatpush3.bf16.msra.mxu1 %v7861_v5  ;;  %v7894_v42 = vld [vmem:[%s10833_s5 + $0x800] ss:$12 sps:$4 sm:$0xff]  }
 0x687   :  { %3781 = vmatprep.subr.bf16.mxu0 %v7864_v28  ;;  %7365 = vmatprep.subr.bf16.mxu1 %v10870_v6  ;;  %v7897_v5 = vld [vmem:[%s10833_s5 + $0x814] ss:$12 sps:$4 sm:$0xff]   ;;  %v7895_v28 = vld [vmem:[%s10833_s5 + $0x810] ss:$12 sps:$4 sm:$0xff]  }
 0x68a   :  { %3782 = vmatpush1.bf16.msra.mxu0 %v7862_v43  ;;  %7366 = vmatpush3.bf16.msra.mxu1 %v7865_v46  ;;  %v7901_v43 = vld [vmem:[%s10833_s5 + $0x82c] ss:$12 sps:$4 sm:$0xff]   ;;  %v7899_v46 = vld [vmem:[%s10833_s5 + $0x828] ss:$12 sps:$4 sm:$0xff]  }
 0x68b   :  { %3783 = vmatprep.subr.bf16.mxu0 %v7868_v3  ;;  %7367 = vmatprep.subr.bf16.mxu1 %v10870_v6  ;;  %v7902_v3 = vld [vmem:[%s10833_s5 + $0x830] ss:$12 sps:$4 sm:$0xff]  }
 0x68e   :  { %3784 = vmatpush1.bf16.msra.mxu0 %v7866_v27  ;;  %7368 = vmatpush3.bf16.msra.mxu1 %v7869_v50 }
 0x68f   :  { %7373 = vmatprep.subr.bf16.mxu0 %v10870_v6  ;;  %4092 = vmatprep.subr.bf16.mxu1 %v7873_v31 }
 0x691   :  { %3802 = vmatmul.mubr.bf16.vlgmr.msra.gmra.mrb[76].mxu0 %v3607_v22  ;;  %7370 = vmatmul.mubr.bf16.vlgmr.msra.gmra.mrb[80].mxu1 %v3607_v22 }
 0x692   :  { %7374 = vmatpush3.bf16.msra.mxu0 %v10891_v2  ;;  %7381 = vmatprep.mubr.msk.bf16.mxu0 %vm8278_vm1, %v10870_v6 }
 0x693   :  { %7375 = vmatprep.subr.bf16.mxu0 %v10870_v6  ;;  %4124 = vmatprep.mubr.bf16.mxu1 %v10871_v48 }
 0x694   :  { %4093 = vmatpush1.bf16.msra.mxu1 %v7871_v15 }
 0x695   :  { %4094 = vmatprep.subr.bf16.mxu1 %v7877_v37  ;;  %v3862_v37 = vpop.permute.xlu0 %3861 }
 0x696   :  { %7376 = vmatpush3.bf16.msra.mxu0 %v10894_v40 }
 0x697   :  { %7377 = vmatprep.subr.bf16.mxu0 %v10870_v6 }
 0x698   :  { %4095 = vmatpush1.bf16.msra.mxu1 %v7875_v52 }
 0x699   :  { %4096 = vmatprep.subr.bf16.mxu1 %v7881_v0 }
 0x69a   :  { %7378 = vmatpush3.bf16.msra.mxu0 %v10897_v14 }
 0x69b   :  { %7379 = vmatprep.subr.bf16.mxu0 %v10870_v6 }
 0x69c   :  { %4097 = vmatpush1.bf16.msra.mxu1 %v7879_v36 }
 0x69d   :  { %4098 = vmatprep.subr.bf16.mxu1 %v7885_v51 }
 0x69e   :  { %7380 = vmatpush3.bf16.msra.mxu0 %v10900_v24 }
 0x69f   :  { %7385 = vmatprep.subr.bf16.mxu0 %v10870_v6 }
 0x6a0   :  { %4099 = vmatpush1.bf16.msra.mxu1 %v7883_v4 }
 0x6a1   :  { %7382 = vmatmul.mubr.msk.bf16.vlgmr.msra.gmra.mrb[80].mxu0 %vm296_vm0, %v7870_v19  ;;  %4100 = vmatprep.subr.bf16.mxu1 %v7889_v32  ;;  %v3867_v32 = vpop.permute.xlu1 %3866 }
 0x6a2   :  { %7401 = vmatprep.mubr.msk.bf16.mxu0 %vm8278_vm1, %v10870_v6  ;;  %7386 = vmatpush3.bf16.msra.mxu0 %v7874_v29 }
 0x6a3   :  { %7387 = vmatprep.subr.bf16.mxu0 %v10870_v6 }
 0x6a4   :  { %4101 = vmatpush1.bf16.msra.mxu1 %v7887_v25 }
 0x6a5   :  { %4102 = vmatprep.subr.bf16.mxu1 %v7893_v26  ;;  %v7906_v26 = vld [vmem:[%s10833_s5 + $0x848] ss:$12 sps:$4 sm:$0xff]  }
 0x6a6   :  { %7388 = vmatpush3.bf16.msra.mxu0 %v7878_v10 }
 0x6a7   :  { %7389 = vmatprep.subr.bf16.mxu0 %v10870_v6 }
 0x6a8   :  { %4103 = vmatpush1.bf16.msra.mxu1 %v7891_v39 }
 0x6a9   :  { %4104 = vmatprep.subr.bf16.mxu1 %v7897_v5  ;;  %v7909_v5 = vld [vmem:[%s10833_s5 + $0x85c] ss:$12 sps:$4 sm:$0xff]  }
 0x6aa   :  { %7390 = vmatpush3.bf16.msra.mxu0 %v7882_v49 }
 0x6ab   :  { %7391 = vmatprep.subr.bf16.mxu0 %v10870_v6 }
 0x6ac   :  { %4105 = vmatpush1.bf16.msra.mxu1 %v7895_v28  ;;  %v7907_v28 = vld [vmem:[%s10833_s5 + $0x858] ss:$12 sps:$4 sm:$0xff]  }
 0x6ad   :  { %4106 = vmatprep.subr.bf16.mxu1 %v7901_v43 }
 0x6ae   :  { %7392 = vmatpush3.bf16.msra.mxu0 %v7886_v7 }
 0x6af   :  { %7393 = vmatprep.subr.bf16.mxu0 %v10870_v6 }
 0x6b0   :  { %4107 = vmatpush1.bf16.msra.mxu1 %v7899_v46  ;;  %v7913_v46 = vld [vmem:[%s10833_s5 + $0x874] ss:$12 sps:$4 sm:$0xff]  }
 0x6b1   :  { %4338 = vmatprep.subr.bf16.mxu1 %v7905_v54  ;;  %v7914_v54 = vld [vmem:[%s10833_s5 + $0x878] ss:$12 sps:$4 sm:$0xff]  }
 0x6b2   :  { %7394 = vmatpush3.bf16.msra.mxu0 %v7890_v34  ;;  %v7903_v34 = vld [vmem:[%s10833_s5 + $0x840] ss:$12 sps:$4 sm:$0xff]  }
 0x6b3   :  { %7395 = vmatprep.subr.bf16.mxu0 %v10870_v6 }
 0x6b6   :  { %7396 = vmatpush3.bf16.msra.mxu0 %v7894_v42 }
 0x6b7   :  { %7397 = vmatprep.subr.bf16.mxu0 %v10870_v6 }
 0x6ba   :  { %7398 = vmatpush3.bf16.msra.mxu0 %v7898_v33  ;;  %v7910_v33 = vld [vmem:[%s10833_s5 + $0x860] ss:$12 sps:$4 sm:$0xff]  }
 0x6bb   :  { %7399 = vmatprep.subr.bf16.mxu0 %v10870_v6 }
 0x6be   :  { %7400 = vmatpush3.bf16.msra.mxu0 %v7902_v3  ;;  %v7911_v3 = vld [vmem:[%s10833_s5 + $0x870] ss:$12 sps:$4 sm:$0xff]  }
 0x6bf   :  { %7405 = vmatprep.subr.bf16.mxu0 %v10870_v6 }
 0x744   :  { %v3557_v27 = vpop.f32.mrb[72].mxu0  ;;  %v3598_v50 = vpop.f32.mrb[76].mxu1 }
 0x745   :  { %v3604_v17 = vadd.f32 %v3557_v27, %v10071_v61  ;;  %v3606_v22 = vadd.f32 %v3598_v50, %v10073_v55  ;;  %v3559_v11 = vpop.f32.mrb[73].mxu0  ;;  %v7351_v44 = vpop.f32.mrb[77].mxu1  ;;  %v7917_v50 = vld [vmem:[%s10833_s5 + $0x88c] ss:$12 sps:$4 sm:$0xff]  }
 0x746   :  { %v3605_v2 = vadd.f32 %v3559_v11, %v10075_v38  ;;  %v3561_v56 = vpop.f32.mrb[74].mxu0  ;;  %v3601_v1 = vpop.f32.mrb[78].mxu1  ;;  %v7921_v11 = vld [vmem:[%s10833_s5 + $0x8a4] ss:$12 sps:$4 sm:$0xff]   ;;  %v7919_v44 = vld [vmem:[%s10833_s5 + $0x8a0] ss:$12 sps:$4 sm:$0xff]  }
 0x747   :  { %v3562_v40 = vpop.f32.mrb[75].mxu0  ;;  %v7352_v16 = vpop.f32.mrb[79].mxu1  ;;  %v7925_v56 = vld [vmem:[%s10833_s5 + $0x8bc] ss:$12 sps:$4 sm:$0xff]   ;;  %v7923_v1 = vld [vmem:[%s10833_s5 + $0x8b8] ss:$12 sps:$4 sm:$0xff]  }
 0x748   :  { %v7926_v40 = vld [vmem:[%s10833_s5 + $0x8c0] ss:$12 sps:$4 sm:$0xff]  }
 0x749   :  { %v7929_v16 = vld [vmem:[%s10833_s5 + $0x8d4] ss:$12 sps:$4 sm:$0xff]  }
 0x764   :  { %v3803_v23 = vpop.f32.mrb[76].mxu0  ;;  %v3844_v14 = vpop.f32.mrb[80].mxu1 }
 0x765   :  { %v10268_v19 = vadd.f32 %v3803_v23, %v3604_v17  ;;  %v10270_v21 = vadd.f32 %v3844_v14, %v3606_v22  ;;  %v3805_v18 = vpop.f32.mrb[77].mxu0  ;;  %v7371_v24 = vpop.f32.mrb[81].mxu1  ;;  %v7915_v17 = vld [vmem:[%s10833_s5 + $0x888] ss:$12 sps:$4 sm:$0xff]   ;;  %v7918_v22 = vld [vmem:[%s10833_s5 + $0x890] ss:$12 sps:$4 sm:$0xff]  }
 0x766   :  { %v10272_v15 = vadd.f32 %v3805_v18, %v3605_v2  ;;  %v3807_v61 = vpop.f32.mrb[78].mxu0  ;;  %v3847_v55 = vpop.f32.mrb[82].mxu1  ;;  %v7922_v2 = vld [vmem:[%s10833_s5 + $0x8a8] ss:$12 sps:$4 sm:$0xff]   ;;  %v7927_v14 = vld [vmem:[%s10833_s5 + $0x8d0] ss:$12 sps:$4 sm:$0xff]  }
 0x767   :  { %v3808_v31 = vpop.f32.mrb[79].mxu0  ;;  %v7372_v29 = vpop.f32.mrb[83].mxu1  ;;  %v7930_v18 = vld [vmem:[%s10833_s5 + $0x8d8] ss:$12 sps:$4 sm:$0xff]   ;;  %v7931_v55 = vld [vmem:[%s10833_s5 + $0x8e8] ss:$12 sps:$4 sm:$0xff]  }
 0x768   :  { %v7933_v24 = vld [vmem:[%s10833_s5 + $0x8ec] ss:$12 sps:$4 sm:$0xff]   ;;  %v7934_v31 = vld [vmem:[%s10833_s5 + $0x8f0] ss:$12 sps:$4 sm:$0xff]  }
 0x774   :  { %v3911_v38 = vpop.f32.mrb[80].mxu0 }
 0x775   :  { %v3912_v10 = vadd.f32 %v3911_v38, %v3862_v37  ;;  %v7383_v52 = vpop.f32.mrb[81].mxu0  ;;  %v10901_v38 = vld [vmem:[#allocation15_spill] sm:$0xff] }
 0x776   :  { %v3914_v0 = vpop.f32.mrb[82].mxu0  ;;  %v7950_v52 = vld [vmem:[%s10833_s5 + $0x94c] ss:$12 sps:$4 sm:$0xff]  }
 0x777   :  { %v3920_v49 = vmin.f32 %v3912_v10, 0.0  ;;  %v7384_v36 = vpop.f32.mrb[83].mxu0  ;;  %vm3918_vm6 = vcmp.gt.f32.partialorder %v3912_v10, 0.0  ;;  %v3915_v42 = vadd.f32 %v3914_v0, %v3867_v32  ;;  %v7948_v0 = vld [vmem:[%s10833_s5 + $0x948] ss:$12 sps:$4 sm:$0xff]  }
 0x778   :  { %v7954_v36 = vld [vmem:[%s10833_s5 + $0x964] ss:$12 sps:$4 sm:$0xff]  }
 0x779   :  { %v3922_v51 = vmul.f32 1.442695, %v3920_v49  ;;  %v3921_v43 = vmin.f32 %v3915_v42, 0.0  ;;  %vm3919_vm7 = vcmp.gt.f32.partialorder %v3915_v42, 0.0  ;;  %v7951_v49 = vld [vmem:[%s10833_s5 + $0x950] ss:$12 sps:$4 sm:$0xff]  }
 0x77a   :  { %v7956_v32 = vld [vmem:[%s10833_s5 + $0x978] ss:$12 sps:$4 sm:$0xff]  }
 0x77b   :  { %8230 = vpow2.f32 %v3922_v51  ;;  %v3924_v27 = vmul.f32 1.442695, %v3921_v43  ;;  %v7952_v51 = vld [vmem:[%s10833_s5 + $0x960] ss:$12 sps:$4 sm:$0xff]  }
 0x77d   :  { %8232 = vpow2.f32 %v3924_v27 }
 0x785   :  { %v8231_v4 = vpop.eup %8230 }
 0x786   :  { %v6529_v7 = vadd.f32 -1.0, %v8231_v4  ;;  %v7955_v4 = vld [vmem:[%s10833_s5 + $0x968] ss:$12 sps:$4 sm:$0xff]  }
 0x787   :  { %v8233_v23 = vpop.eup %8232 }
 0x788   :  { %v3928_v25 = vsel %vm3918_vm6, %v3912_v10, %v6529_v7  ;;  %v6530_v61 = vadd.f32 -1.0, %v8233_v23  ;;  %v10902_v10 = vpack.c.bf16 %v9197_v41, %v10901_v38  ;;  %v7935_v41 = vld [vmem:[%s10831_s3 + $0x30] sm:$0xff]   ;;  %v7958_v7 = vld [vmem:[%s10833_s5 + $0x97c] ss:$12 sps:$4 sm:$0xff]  }
 0x789   :  { %v3930_v39 = vpack.c.bf16 %v3928_v25, %v3928_v25  ;;  %v7959_v25 = vld [vmem:[%s10833_s5 + $0x980] ss:$12 sps:$4 sm:$0xff]  }
 0x78a   :  { %v3929_v29 = vsel %vm3919_vm7, %v3915_v42, %v6530_v61  ;;  %v7966_v42 = vld [vmem:[%s10833_s5 + $0x9ac] ss:$12 sps:$4 sm:$0xff]  }
 0x78b   :  { %4125 = vmatmul.mubr.bf16.vlgmr.msra.gmra.mrb[84].mxu1 %v3930_v39  ;;  %7402 = vmatmul.mubr.bf16.vlgmr.msra.gmra.mrb[84].mxu0 %v3930_v39  ;;  %v4176_v37 = vpack.c.bf16 %v3929_v29, %v3929_v29  ;;  %v7963_v39 = vld [vmem:[%s10833_s5 + $0x998] ss:$12 sps:$4 sm:$0xff]  }
 0x78c   :  { %4339 = vmatpush1.bf16.msra.mxu1 %v7903_v34  ;;  %7406 = vmatpush3.bf16.msra.mxu0 %v7906_v26  ;;  %v7962_v34 = vld [vmem:[%s10833_s5 + $0x994] ss:$12 sps:$4 sm:$0xff]   ;;  %v7960_v26 = vld [vmem:[%s10833_s5 + $0x990] ss:$12 sps:$4 sm:$0xff]  }
 0x78d   :  { %4340 = vmatprep.subr.bf16.mxu1 %v7909_v5  ;;  %7407 = vmatprep.subr.bf16.mxu0 %v10870_v6  ;;  %v7964_v5 = vld [vmem:[%s10833_s5 + $0x9a8] ss:$12 sps:$4 sm:$0xff]  }
 0x78e   :  { %4370 = vmatprep.mubr.bf16.mxu1 %v10871_v48  ;;  %7421 = vmatprep.mubr.msk.bf16.mxu0 %vm8278_vm1, %v10870_v6 }
 0x790   :  { %4341 = vmatpush1.bf16.msra.mxu1 %v7907_v28  ;;  %7408 = vmatpush3.bf16.msra.mxu0 %v7910_v33  ;;  %v7967_v28 = vld [vmem:[%s10833_s5 + $0x9b0] ss:$12 sps:$4 sm:$0xff]  }
 0x791   :  { %4342 = vmatprep.subr.bf16.mxu1 %v7913_v46  ;;  %7409 = vmatprep.subr.bf16.mxu0 %v10870_v6  ;;  %v7970_v33 = vld [vmem:[%s10833_s5 + $0x9c4] ss:$12 sps:$4 sm:$0xff]  }
 0x794   :  { %4343 = vmatpush1.bf16.msra.mxu1 %v7911_v3  ;;  %7410 = vmatpush3.bf16.msra.mxu0 %v7914_v54 }
 0x795   :  { %4344 = vmatprep.subr.bf16.mxu1 %v7917_v50  ;;  %7411 = vmatprep.subr.bf16.mxu0 %v10870_v6 }
 0x798   :  { %4345 = vmatpush1.bf16.msra.mxu1 %v7915_v17  ;;  %7412 = vmatpush3.bf16.msra.mxu0 %v7918_v22 }
 0x799   :  { %4346 = vmatprep.subr.bf16.mxu1 %v7921_v11  ;;  %7413 = vmatprep.subr.bf16.mxu0 %v10870_v6 }
 0x79c   :  { %4347 = vmatpush1.bf16.msra.mxu1 %v7919_v44  ;;  %7414 = vmatpush3.bf16.msra.mxu0 %v7922_v2 }
 0x79d   :  { %4348 = vmatprep.subr.bf16.mxu1 %v7925_v56  ;;  %7415 = vmatprep.subr.bf16.mxu0 %v10870_v6 }
 0x7a0   :  { %4349 = vmatpush1.bf16.msra.mxu1 %v7923_v1  ;;  %7416 = vmatpush3.bf16.msra.mxu0 %v7926_v40 }
 0x7a1   :  { %4350 = vmatprep.subr.bf16.mxu1 %v7929_v16  ;;  %7417 = vmatprep.subr.bf16.mxu0 %v10870_v6 }
 0x7a4   :  { %4351 = vmatpush1.bf16.msra.mxu1 %v7927_v14  ;;  %7418 = vmatpush3.bf16.msra.mxu0 %v7930_v18 }
 0x7a5   :  { %4352 = vmatprep.subr.bf16.mxu1 %v7933_v24  ;;  %7419 = vmatprep.subr.bf16.mxu0 %v10870_v6 }
 0x7a8   :  { %4353 = vmatpush1.bf16.msra.mxu1 %v7931_v55  ;;  %7420 = vmatpush3.bf16.msra.mxu0 %v7934_v31  ;;  %v4431_v55 = vpop.permute.xlu0 %4430 }
 0x7a9   :  { %7425 = vmatprep.subr.bf16.mxu1 %v10870_v6  ;;  %4661 = vmatprep.subr.bf16.mxu0 %v7938_v47 }
 0x7ab   :  { %4371 = vmatmul.mubr.bf16.vlgmr.msra.gmra.mrb[88].mxu1 %v4176_v37  ;;  %7422 = vmatmul.mubr.bf16.vlgmr.msra.gmra.mrb[88].mxu0 %v4176_v37 }
 0x7ac   :  { %7426 = vmatpush3.bf16.msra.mxu1 %v10902_v10  ;;  %7433 = vmatprep.mubr.msk.bf16.mxu1 %vm8278_vm1, %v10870_v6 }
 0x7ad   :  { %7427 = vmatprep.subr.bf16.mxu1 %v10870_v6  ;;  %4693 = vmatprep.mubr.bf16.mxu0 %v10871_v48 }
 0x7ae   :  { %4662 = vmatpush1.bf16.msra.mxu0 %v7936_v13 }
 0x7af   :  { %4663 = vmatprep.subr.bf16.mxu0 %v7942_v60 }
 0x7b0   :  { %7428 = vmatpush3.bf16.msra.mxu1 %v999_v63  ;;  %v7939_v63 = vld [vmem:[%s10833_s5 + $0x908] ss:$12 sps:$4 sm:$0xff]  }
 0x7b1   :  { %7429 = vmatprep.subr.bf16.mxu1 %v10870_v6 }
 0x7b4   :  { %7430 = vmatpush3.bf16.msra.mxu1 %v1007_v58  ;;  %v7940_v58 = vld [vmem:[%s10833_s5 + $0x918] ss:$12 sps:$4 sm:$0xff]  }
 0x7b5   :  { %7431 = vmatprep.subr.bf16.mxu1 %v10870_v6  ;;  %4664 = vmatpush1.bf16.msra.mxu0 %v7940_v58  ;;  %v7971_v58 = vld [vmem:[%s10833_s5 + $0x9c8] ss:$12 sps:$4 sm:$0xff]  }
 0x7b6   :  { %4665 = vmatprep.subr.bf16.mxu0 %v7946_v8 }
 0x7b8   :  { %7432 = vmatpush3.bf16.msra.mxu1 %v1015_v62  ;;  %v7944_v62 = vld [vmem:[%s10833_s5 + $0x930] ss:$12 sps:$4 sm:$0xff]  }
 0x7b9   :  { %7437 = vmatprep.subr.bf16.mxu1 %v10870_v6  ;;  %4666 = vmatpush1.bf16.msra.mxu0 %v7944_v62  ;;  %v7974_v62 = vld [vmem:[%s10833_s5 + $0x9dc] ss:$12 sps:$4 sm:$0xff]  }
 0x7ba   :  { %4667 = vmatprep.subr.bf16.mxu0 %v7950_v52  ;;  %v7972_v52 = vld [vmem:[%s10833_s5 + $0x9d8] ss:$12 sps:$4 sm:$0xff]  }
 0x7bb   :  { %7434 = vmatmul.mubr.msk.bf16.vlgmr.msra.gmra.mrb[92].mxu1 %vm296_vm0, %v7935_v41 }
 0x7bc   :  { %7453 = vmatprep.mubr.msk.bf16.mxu1 %vm8278_vm1, %v10870_v6  ;;  %7438 = vmatpush3.bf16.msra.mxu1 %v7939_v63  ;;  %v4436_v63 = vpop.permute.xlu1 %4435 }
 0x7bd   :  { %7439 = vmatprep.subr.bf16.mxu1 %v10870_v6  ;;  %4668 = vmatpush1.bf16.msra.mxu0 %v7948_v0  ;;  %v7975_v0 = vld [vmem:[%s10833_s5 + $0x9e0] ss:$12 sps:$4 sm:$0xff]  }
 0x7be   :  { %4669 = vmatprep.subr.bf16.mxu0 %v7954_v36  ;;  %v7978_v36 = vld [vmem:[%s10833_s5 + $0x9f4] ss:$12 sps:$4 sm:$0xff]  }
 0x7c0   :  { %7440 = vmatpush3.bf16.msra.mxu1 %v7943_v12  ;;  %v7968_v12 = vld [vmem:[%s10833_s5 + $0x9c0] ss:$12 sps:$4 sm:$0xff]  }
 0x7c1   :  { %7441 = vmatprep.subr.bf16.mxu1 %v10870_v6  ;;  %4670 = vmatpush1.bf16.msra.mxu0 %v7952_v51  ;;  %v7976_v51 = vld [vmem:[%s10833_s5 + $0x9f0] ss:$12 sps:$4 sm:$0xff]  }
 0x7c2   :  { %4671 = vmatprep.subr.bf16.mxu0 %v7958_v7 }
 0x7c4   :  { %7442 = vmatpush3.bf16.msra.mxu1 %v7947_v53 }
 0x7c5   :  { %7443 = vmatprep.subr.bf16.mxu1 %v10870_v6  ;;  %4672 = vmatpush1.bf16.msra.mxu0 %v7956_v32  ;;  %v7982_v32 = vld [vmem:[%s10833_s5 + $0xa0c] ss:$12 sps:$4 sm:$0xff]  }
 0x7c6   :  { %4673 = vmatprep.subr.bf16.mxu0 %v7962_v34  ;;  %v7983_v34 = vld [vmem:[%s10833_s5 + $0xa10] ss:$12 sps:$4 sm:$0xff]  }
 0x7c8   :  { %7444 = vmatpush3.bf16.msra.mxu1 %v7951_v49 }
 0x7c9   :  { %7445 = vmatprep.subr.bf16.mxu1 %v10870_v6  ;;  %4674 = vmatpush1.bf16.msra.mxu0 %v7960_v26  ;;  %v7986_v26 = vld [vmem:[%s10833_s5 + $0xa24] ss:$12 sps:$4 sm:$0xff]  }
 0x7ca   :  { %4675 = vmatprep.subr.bf16.mxu0 %v7966_v42  ;;  %v7987_v42 = vld [vmem:[%s10833_s5 + $0xa28] ss:$12 sps:$4 sm:$0xff]  }
 0x7cc   :  { %7446 = vmatpush3.bf16.msra.mxu1 %v7955_v4  ;;  %v7979_v4 = vld [vmem:[%s10833_s5 + $0x9f8] ss:$12 sps:$4 sm:$0xff]  }
 0x7cd   :  { %7447 = vmatprep.subr.bf16.mxu1 %v10870_v6  ;;  %4676 = vmatpush1.bf16.msra.mxu0 %v7964_v5  ;;  %v7990_v5 = vld [vmem:[%s10833_s5 + $0xa3c] ss:$12 sps:$4 sm:$0xff]  }
 0x7ce   :  { %4907 = vmatprep.subr.bf16.mxu0 %v7970_v33  ;;  %v7991_v33 = vld [vmem:[%s10833_s5 + $0xa40] ss:$12 sps:$4 sm:$0xff]  }
 0x7d0   :  { %7448 = vmatpush3.bf16.msra.mxu1 %v7959_v25  ;;  %v7980_v25 = vld [vmem:[%s10833_s5 + $0xa08] ss:$12 sps:$4 sm:$0xff]  }
 0x7d1   :  { %7449 = vmatprep.subr.bf16.mxu1 %v10870_v6 }
 0x7d4   :  { %7450 = vmatpush3.bf16.msra.mxu1 %v7963_v39  ;;  %v7984_v39 = vld [vmem:[%s10833_s5 + $0xa20] ss:$12 sps:$4 sm:$0xff]  }
 0x7d5   :  { %7451 = vmatprep.subr.bf16.mxu1 %v10870_v6 }
 0x7d8   :  { %7452 = vmatpush3.bf16.msra.mxu1 %v7967_v28  ;;  %v7988_v28 = vld [vmem:[%s10833_s5 + $0xa38] ss:$12 sps:$4 sm:$0xff]  }
 0x7d9   :  { %7457 = vmatprep.subr.bf16.mxu1 %v10870_v6 }
 0x85e   :  { %v4126_v43 = vpop.f32.mrb[84].mxu1  ;;  %v4167_v46 = vpop.f32.mrb[84].mxu0 }
 0x85f   :  { %v4173_v3 = vadd.f32 %v4126_v43, %v10268_v19  ;;  %v4175_v54 = vadd.f32 %v4167_v46, %v10270_v21  ;;  %v4128_v27 = vpop.f32.mrb[85].mxu1  ;;  %v7403_v50 = vpop.f32.mrb[85].mxu0  ;;  %v7994_v43 = vld [vmem:[%s10833_s5 + $0xa54] ss:$12 sps:$4 sm:$0xff]  }
 0x860   :  { %v4174_v17 = vadd.f32 %v4128_v27, %v10272_v15  ;;  %v4130_v22 = vpop.f32.mrb[86].mxu1  ;;  %v4170_v11 = vpop.f32.mrb[86].mxu0  ;;  %v7998_v27 = vld [vmem:[%s10833_s5 + $0xa6c] ss:$12 sps:$4 sm:$0xff]  }
 0x861   :  { %v4131_v44 = vpop.f32.mrb[87].mxu1  ;;  %v7404_v2 = vpop.f32.mrb[87].mxu0  ;;  %v7999_v22 = vld [vmem:[%s10833_s5 + $0xa70] ss:$12 sps:$4 sm:$0xff]  }
 0x862   :  { %v10903_v2 = vld [vmem:[#allocation16_spill] sm:$0xff] }
 0x87e   :  { %v4372_v56 = vpop.f32.mrb[88].mxu1  ;;  %v4413_v1 = vpop.f32.mrb[88].mxu0 }
 0x87f   :  { %v10465_v40 = vadd.f32 %v4372_v56, %v4173_v3  ;;  %v10467_v16 = vadd.f32 %v4413_v1, %v4175_v54  ;;  %v4374_v23 = vpop.f32.mrb[89].mxu1  ;;  %v7423_v14 = vpop.f32.mrb[89].mxu0  ;;  %v7992_v3 = vld [vmem:[%s10833_s5 + $0xa50] ss:$12 sps:$4 sm:$0xff]   ;;  %v7995_v54 = vld [vmem:[%s10833_s5 + $0xa58] ss:$12 sps:$4 sm:$0xff]   ;;  %v10904_v56 = vpack.c.bf16 %v9214_v35, %v10903_v2  ;;  %v10905_v1 = vpack.c.bf16 %v9242_v30, %v9233_v57 }
 0x880   :  { %v10469_v18 = vadd.f32 %v4374_v23, %v4174_v17  ;;  %v4376_v19 = vpop.f32.mrb[90].mxu1  ;;  %v4416_v21 = vpop.f32.mrb[90].mxu0  ;;  %v7996_v17 = vld [vmem:[%s10833_s5 + $0xa68] ss:$12 sps:$4 sm:$0xff]   ;;  %v10906_v23 = vpack.c.bf16 %v9262_v9, %v9254_v59  ;;  %v8000_v35 = vld [vmem:[%s10831_s3 + $0x38] sm:$0xff]   ;;  %v10907_v14 = vpack.c.bf16 %v9294_v45, %v9279_v20 }
 0x881   :  { %v4377_v24 = vpop.f32.mrb[91].mxu1  ;;  %v7424_v61 = vpop.f32.mrb[91].mxu0  ;;  %v8001_v57 = vld [vmem:[%s10833_s5 + $0xa80] ss:$12 sps:$4 sm:$0xff]   ;;  %v8003_v30 = vld [vmem:[%s10833_s5 + $0xa84] ss:$12 sps:$4 sm:$0xff]  }
 0x882   :  { %v8004_v59 = vld [vmem:[%s10833_s5 + $0xa88] ss:$12 sps:$4 sm:$0xff]   ;;  %v8008_v20 = vld [vmem:[%s10833_s5 + $0xaa0] ss:$12 sps:$4 sm:$0xff]   ;;  %v8005_v45 = vld [vmem:[%s10833_s5 + $0xa98] ss:$12 sps:$4 sm:$0xff]  }
 0x883   :  { %v8007_v9 = vld [vmem:[%s10833_s5 + $0xa9c] ss:$12 sps:$4 sm:$0xff]   ;;  %v8011_v19 = vld [vmem:[%s10833_s5 + $0xab4] ss:$12 sps:$4 sm:$0xff]   ;;  %v8012_v21 = vld [vmem:[%s10833_s5 + $0xab8] ss:$12 sps:$4 sm:$0xff]  }
 0x884   :  { %v8009_v24 = vld [vmem:[%s10833_s5 + $0xab0] ss:$12 sps:$4 sm:$0xff]   ;;  %v8015_v61 = vld [vmem:[%s10833_s5 + $0xacc] ss:$12 sps:$4 sm:$0xff]  }
 0x88e   :  { %v4480_v15 = vpop.f32.mrb[92].mxu1 }
 0x88f   :  { %v4481_v31 = vadd.f32 %v4480_v15, %v4431_v55  ;;  %v7435_v29 = vpop.f32.mrb[93].mxu1  ;;  %v8013_v55 = vld [vmem:[%s10833_s5 + $0xac8] ss:$12 sps:$4 sm:$0xff]   ;;  %v8016_v15 = vld [vmem:[%s10833_s5 + $0xad0] ss:$12 sps:$4 sm:$0xff]  }
 0x890   :  { %v4483_v37 = vpop.f32.mrb[94].mxu1  ;;  %v8017_v29 = vld [vmem:[%s10833_s5 + $0xae0] ss:$12 sps:$4 sm:$0xff]  }
 0x891   :  { %v4489_v38 = vmin.f32 %v4481_v31, 0.0  ;;  %v7436_v10 = vpop.f32.mrb[95].mxu1  ;;  %vm4487_vm8 = vcmp.gt.f32.partialorder %v4481_v31, 0.0  ;;  %v4484_v53 = vadd.f32 %v4483_v37, %v4436_v63  ;;  %v8020_v37 = vld [vmem:[%s10833_s5 + $0xae8] ss:$12 sps:$4 sm:$0xff]  }
 0x892   :  { %v8021_v10 = vld [vmem:[%s10833_s5 + $0xaf8] ss:$12 sps:$4 sm:$0xff]  }
 0x893   :  { %v4491_v41 = vmul.f32 1.442695, %v4489_v38  ;;  %v4490_v49 = vmin.f32 %v4484_v53, 0.0  ;;  %vm4488_vm9 = vcmp.gt.f32.partialorder %v4484_v53, 0.0  ;;  %v8023_v38 = vld [vmem:[%s10833_s5 + $0xafc] ss:$12 sps:$4 sm:$0xff]  }
 0x894   :  { %v8028_v63 = vld [vmem:[%s10833_s5 + $0xb18] ss:$12 sps:$4 sm:$0xff]  }
 0x895   :  { %8234 = vpow2.f32 %v4491_v41  ;;  %v4493_v7 = vmul.f32 1.442695, %v4490_v49  ;;  %v8024_v41 = vld [vmem:[%s10833_s5 + $0xb00] ss:$12 sps:$4 sm:$0xff]  }
 0x897   :  { %8236 = vpow2.f32 %v4493_v7 }
 0x89f   :  { %v8235_v13 = vpop.eup %8234 }
 0x8a0   :  { %v6649_v47 = vadd.f32 -1.0, %v8235_v13  ;;  %v8027_v13 = vld [vmem:[%s10833_s5 + $0xb14] ss:$12 sps:$4 sm:$0xff]  }
 0x8a1   :  { %v8237_v46 = vpop.eup %8236 }
 0x8a2   :  { %v4497_v60 = vsel %vm4487_vm8, %v4481_v31, %v6649_v47  ;;  %v6650_v50 = vadd.f32 -1.0, %v8237_v46  ;;  %v8019_v31 = vld [vmem:[%s10833_s5 + $0xae4] ss:$12 sps:$4 sm:$0xff]  }
 0x8a3   :  { %v4499_v8 = vpack.c.bf16 %v4497_v60, %v4497_v60  ;;  %v8025_v47 = vld [vmem:[%s10833_s5 + $0xb10] ss:$12 sps:$4 sm:$0xff]   ;;  %v8031_v60 = vld [vmem:[%s10833_s5 + $0xb2c] ss:$12 sps:$4 sm:$0xff]  }
 0x8a4   :  { %v4498_v11 = vsel %vm4488_vm9, %v4484_v53, %v6650_v50 }
 0x8a5   :  { %4694 = vmatmul.mubr.bf16.vlgmr.msra.gmra.mrb[92].mxu0 %v4499_v8  ;;  %7454 = vmatmul.mubr.bf16.vlgmr.msra.gmra.mrb[96].mxu1 %v4499_v8  ;;  %v4745_v44 = vpack.c.bf16 %v4498_v11, %v4498_v11  ;;  %v8035_v8 = vld [vmem:[%s10833_s5 + $0xb44] ss:$12 sps:$4 sm:$0xff]  }
 0x8a6   :  { %4908 = vmatpush1.bf16.msra.mxu0 %v7968_v12  ;;  %7458 = vmatpush3.bf16.msra.mxu1 %v7971_v58  ;;  %v8029_v12 = vld [vmem:[%s10833_s5 + $0xb28] ss:$12 sps:$4 sm:$0xff]   ;;  %v8032_v58 = vld [vmem:[%s10833_s5 + $0xb30] ss:$12 sps:$4 sm:$0xff]  }
 0x8a7   :  { %4909 = vmatprep.subr.bf16.mxu0 %v7974_v62  ;;  %7459 = vmatprep.subr.bf16.mxu1 %v10870_v6 }
 0x8a8   :  { %4939 = vmatprep.mubr.bf16.mxu0 %v10871_v48  ;;  %7473 = vmatprep.mubr.msk.bf16.mxu1 %vm8278_vm1, %v10870_v6 }
 0x8aa   :  { %4910 = vmatpush1.bf16.msra.mxu0 %v7972_v52  ;;  %7460 = vmatpush3.bf16.msra.mxu1 %v7975_v0 }
 0x8ab   :  { %4911 = vmatprep.subr.bf16.mxu0 %v7978_v36  ;;  %7461 = vmatprep.subr.bf16.mxu1 %v10870_v6 }
 0x8ae   :  { %4912 = vmatpush1.bf16.msra.mxu0 %v7976_v51  ;;  %7462 = vmatpush3.bf16.msra.mxu1 %v7979_v4 }
 0x8af   :  { %4913 = vmatprep.subr.bf16.mxu0 %v7982_v32  ;;  %7463 = vmatprep.subr.bf16.mxu1 %v10870_v6 }
 0x8b2   :  { %4914 = vmatpush1.bf16.msra.mxu0 %v7980_v25  ;;  %7464 = vmatpush3.bf16.msra.mxu1 %v7983_v34 }
 0x8b3   :  { %4915 = vmatprep.subr.bf16.mxu0 %v7986_v26  ;;  %7465 = vmatprep.subr.bf16.mxu1 %v10870_v6 }
 0x8b6   :  { %4916 = vmatpush1.bf16.msra.mxu0 %v7984_v39  ;;  %7466 = vmatpush3.bf16.msra.mxu1 %v7987_v42 }
 0x8b7   :  { %4917 = vmatprep.subr.bf16.mxu0 %v7990_v5  ;;  %7467 = vmatprep.subr.bf16.mxu1 %v10870_v6 }
 0x8ba   :  { %4918 = vmatpush1.bf16.msra.mxu0 %v7988_v28  ;;  %7468 = vmatpush3.bf16.msra.mxu1 %v7991_v33 }
 0x8bb   :  { %4919 = vmatprep.subr.bf16.mxu0 %v7994_v43  ;;  %7469 = vmatprep.subr.bf16.mxu1 %v10870_v6 }
 0x8be   :  { %4920 = vmatpush1.bf16.msra.mxu0 %v7992_v3  ;;  %7470 = vmatpush3.bf16.msra.mxu1 %v7995_v54  ;;  %v5000_v3 = vpop.permute.xlu0 %4999 }
 0x8bf   :  { %4921 = vmatprep.subr.bf16.mxu0 %v7998_v27  ;;  %7471 = vmatprep.subr.bf16.mxu1 %v10870_v6 }
 0x8c2   :  { %4922 = vmatpush1.bf16.msra.mxu0 %v7996_v17  ;;  %7472 = vmatpush3.bf16.msra.mxu1 %v7999_v22 }
 0x8c3   :  { %7477 = vmatprep.subr.bf16.mxu0 %v10870_v6  ;;  %5230 = vmatprep.subr.bf16.mxu1 %v8003_v30  ;;  %v8039_v30 = vld [vmem:[%s10833_s5 + $0xb5c] ss:$12 sps:$4 sm:$0xff]  }
 0x8c5   :  { %4940 = vmatmul.mubr.bf16.vlgmr.msra.gmra.mrb[96].mxu0 %v4745_v44  ;;  %7474 = vmatmul.mubr.bf16.vlgmr.msra.gmra.mrb[100].mxu1 %v4745_v44 }
 0x8c6   :  { %7478 = vmatpush3.bf16.msra.mxu0 %v10904_v56  ;;  %7485 = vmatprep.mubr.msk.bf16.mxu0 %vm8278_vm1, %v10870_v6  ;;  %v5005_v56 = vpop.permute.xlu1 %5004 }
 0x8c7   :  { %7479 = vmatprep.subr.bf16.mxu0 %v10870_v6  ;;  %5262 = vmatprep.mubr.bf16.mxu1 %v10871_v48 }
 0x8c8   :  { %5231 = vmatpush1.bf16.msra.mxu1 %v8001_v57 }
 0x8c9   :  { %5232 = vmatprep.subr.bf16.mxu1 %v8007_v9  ;;  %v8040_v9 = vld [vmem:[%s10833_s5 + $0xb60] ss:$12 sps:$4 sm:$0xff]  }
 0x8ca   :  { %7480 = vmatpush3.bf16.msra.mxu0 %v10905_v1 }
 0x8cb   :  { %7481 = vmatprep.subr.bf16.mxu0 %v10870_v6 }
 0x8cc   :  { %5233 = vmatpush1.bf16.msra.mxu1 %v8005_v45  ;;  %v8043_v45 = vld [vmem:[%s10833_s5 + $0xb74] ss:$12 sps:$4 sm:$0xff]  }
 0x8cd   :  { %5234 = vmatprep.subr.bf16.mxu1 %v8011_v19  ;;  %v8041_v19 = vld [vmem:[%s10833_s5 + $0xb70] ss:$12 sps:$4 sm:$0xff]  }
 0x8ce   :  { %7482 = vmatpush3.bf16.msra.mxu0 %v10906_v23  ;;  %v8033_v23 = vld [vmem:[%s10833_s5 + $0xb40] ss:$12 sps:$4 sm:$0xff]  }
 0x8cf   :  { %7483 = vmatprep.subr.bf16.mxu0 %v10870_v6 }
 0x8d0   :  { %5235 = vmatpush1.bf16.msra.mxu1 %v8009_v24 }
 0x8d1   :  { %5236 = vmatprep.subr.bf16.mxu1 %v8015_v61  ;;  %v8045_v61 = vld [vmem:[%s10833_s5 + $0xb88] ss:$12 sps:$4 sm:$0xff]  }
 0x8d2   :  { %7484 = vmatpush3.bf16.msra.mxu0 %v10907_v14 }
 0x8d3   :  { %7489 = vmatprep.subr.bf16.mxu0 %v10870_v6 }
 0x8d4   :  { %5237 = vmatpush1.bf16.msra.mxu1 %v8013_v55  ;;  %v8048_v55 = vld [vmem:[%s10833_s5 + $0xb90] ss:$12 sps:$4 sm:$0xff]  }
 0x8d5   :  { %7486 = vmatmul.mubr.msk.bf16.vlgmr.msra.gmra.mrb[100].mxu0 %vm296_vm0, %v8000_v35  ;;  %5238 = vmatprep.subr.bf16.mxu1 %v8019_v31  ;;  %v8036_v35 = vld [vmem:[%s10833_s5 + $0xb48] ss:$12 sps:$4 sm:$0xff]   ;;  %v8049_v31 = vld [vmem:[%s10833_s5 + $0xba0] ss:$12 sps:$4 sm:$0xff]  }
 0x8d6   :  { %7505 = vmatprep.mubr.msk.bf16.mxu0 %vm8278_vm1, %v10870_v6  ;;  %7490 = vmatpush3.bf16.msra.mxu0 %v8004_v59  ;;  %v8037_v59 = vld [vmem:[%s10833_s5 + $0xb58] ss:$12 sps:$4 sm:$0xff]  }
 0x8d7   :  { %7491 = vmatprep.subr.bf16.mxu0 %v10870_v6 }
 0x8d8   :  { %5239 = vmatpush1.bf16.msra.mxu1 %v8017_v29  ;;  %v8052_v29 = vld [vmem:[%s10833_s5 + $0xba8] ss:$12 sps:$4 sm:$0xff]  }
 0x8d9   :  { %5240 = vmatprep.subr.bf16.mxu1 %v8023_v38  ;;  %v8053_v38 = vld [vmem:[%s10833_s5 + $0xbb8] ss:$12 sps:$4 sm:$0xff]  }
 0x8da   :  { %7492 = vmatpush3.bf16.msra.mxu0 %v8008_v20 }
 0x8db   :  { %7493 = vmatprep.subr.bf16.mxu0 %v10870_v6 }
 0x8dc   :  { %5241 = vmatpush1.bf16.msra.mxu1 %v8021_v10  ;;  %v8056_v10 = vld [vmem:[%s10833_s5 + $0xbc0] ss:$12 sps:$4 sm:$0xff]  }
 0x8dd   :  { %5242 = vmatprep.subr.bf16.mxu1 %v8027_v13 }
 0x8de   :  { %7494 = vmatpush3.bf16.msra.mxu0 %v8012_v21  ;;  %v8044_v21 = vld [vmem:[%s10833_s5 + $0xb78] ss:$12 sps:$4 sm:$0xff]  }
 0x8df   :  { %7495 = vmatprep.subr.bf16.mxu0 %v10870_v6 }
 0x8e0   :  { %5243 = vmatpush1.bf16.msra.mxu1 %v8025_v47  ;;  %v8057_v47 = vld [vmem:[%s10833_s5 + $0xbd0] ss:$12 sps:$4 sm:$0xff]  }
 0x8e1   :  { %5244 = vmatprep.subr.bf16.mxu1 %v8031_v60  ;;  %v8063_v60 = vld [vmem:[%s10833_s5 + $0xbec] ss:$12 sps:$4 sm:$0xff]  }
 0x8e2   :  { %7496 = vmatpush3.bf16.msra.mxu0 %v8016_v15  ;;  %v8051_v15 = vld [vmem:[%s10833_s5 + $0xba4] ss:$12 sps:$4 sm:$0xff]  }
 0x8e3   :  { %7497 = vmatprep.subr.bf16.mxu0 %v10870_v6 }
 0x8e4   :  { %5245 = vmatpush1.bf16.msra.mxu1 %v8029_v12 }
 0x8e5   :  { %5476 = vmatprep.subr.bf16.mxu1 %v8035_v8  ;;  %v8064_v8 = vld [vmem:[%s10833_s5 + $0xbf0] ss:$12 sps:$4 sm:$0xff]  }
 0x8e6   :  { %7498 = vmatpush3.bf16.msra.mxu0 %v8020_v37  ;;  %v8055_v37 = vld [vmem:[%s10833_s5 + $0xbbc] ss:$12 sps:$4 sm:$0xff]  }
 0x8e7   :  { %7499 = vmatprep.subr.bf16.mxu0 %v10870_v6 }
 0x8ea   :  { %7500 = vmatpush3.bf16.msra.mxu0 %v8024_v41  ;;  %v8059_v41 = vld [vmem:[%s10833_s5 + $0xbd4] ss:$12 sps:$4 sm:$0xff]  }
 0x8eb   :  { %7501 = vmatprep.subr.bf16.mxu0 %v10870_v6 }
 0x8ee   :  { %7502 = vmatpush3.bf16.msra.mxu0 %v8028_v63  ;;  %v8060_v63 = vld [vmem:[%s10833_s5 + $0xbd8] ss:$12 sps:$4 sm:$0xff]  }
 0x8ef   :  { %7503 = vmatprep.subr.bf16.mxu0 %v10870_v6 }
 0x8f2   :  { %7504 = vmatpush3.bf16.msra.mxu0 %v8032_v58  ;;  %v8061_v58 = vld [vmem:[%s10833_s5 + $0xbe8] ss:$12 sps:$4 sm:$0xff]  }
 0x8f3   :  { %7509 = vmatprep.subr.bf16.mxu0 %v10870_v6 }
 0x978   :  { %v4695_v53 = vpop.f32.mrb[92].mxu0  ;;  %v4736_v62 = vpop.f32.mrb[96].mxu1 }
 0x979   :  { %v4742_v52 = vadd.f32 %v4695_v53, %v10465_v40  ;;  %v4744_v0 = vadd.f32 %v4736_v62, %v10467_v16  ;;  %v4697_v49 = vpop.f32.mrb[93].mxu0  ;;  %v7455_v36 = vpop.f32.mrb[97].mxu1 }
 0x97a   :  { %v4743_v51 = vadd.f32 %v4697_v49, %v10469_v18  ;;  %v4699_v4 = vpop.f32.mrb[94].mxu0  ;;  %v4739_v7 = vpop.f32.mrb[98].mxu1  ;;  %v8067_v49 = vld [vmem:[%s10835_s7 + $0x48] sm:$0xff]  }
 0x97b   :  { %v4700_v32 = vpop.f32.mrb[95].mxu0  ;;  %v7456_v25 = vpop.f32.mrb[99].mxu1  ;;  %v8068_v36 = vld [vmem:[%s10835_s7 + $0x8] sm:$0xff]   ;;  %v8071_v4 = vld [vmem:[%s10835_s7 + $0x58] sm:$0xff]  }
 0x97c   :  { %v8072_v7 = vld [vmem:[%s10835_s7 + $0x18] sm:$0xff]   ;;  %v8073_v32 = vld [vmem:[%s10835_s7 + $0x60] sm:$0xff]  }
 0x97d   :  { %v8074_v25 = vld [vmem:[%s10835_s7 + $0x20] sm:$0xff]  }
 0x998   :  { %v4941_v34 = vpop.f32.mrb[96].mxu0  ;;  %v4982_v26 = vpop.f32.mrb[100].mxu1 }
 0x999   :  { %v10662_v39 = vadd.f32 %v4941_v34, %v4742_v52  ;;  %v10664_v42 = vadd.f32 %v4982_v26, %v4744_v0  ;;  %v4943_v5 = vpop.f32.mrb[97].mxu0  ;;  %v7475_v28 = vpop.f32.mrb[101].mxu1  ;;  %v8065_v52 = vld [vmem:[%s10835_s7 + $0x40] sm:$0xff]   ;;  %v8075_v34 = vld [vmem:[%s10835_s7 + $0x68] sm:$0xff]  }
 0x99a   :  { %v10666_v33 = vadd.f32 %v4943_v5, %v4743_v51  ;;  %v4945_v40 = vpop.f32.mrb[98].mxu0  ;;  %v4985_v16 = vpop.f32.mrb[102].mxu1  ;;  %v8066_v0 = vld [vmem:[%s10835_s7] sm:$0xff]   ;;  %v8070_v51 = vld [vmem:[%s10835_s7 + $0x10] sm:$0xff]   ;;  %v8076_v26 = vld [vmem:[%s10835_s7 + $0x28] sm:$0xff]  }
 0x99b   :  { %v4946_v43 = vpop.f32.mrb[99].mxu0  ;;  %v7476_v46 = vpop.f32.mrb[103].mxu1  ;;  %v8077_v5 = vld [vmem:[%s10835_s7 + $0x70] sm:$0xff]   ;;  %v8079_v40 = vld [vmem:[%s10835_s7 + $0x80] sm:$0xff]   ;;  %v8080_v16 = vld [vmem:[%s10835_s7 + $0x78] sm:$0xff]  }
 0x99c   :  { %v8078_v28 = vld [vmem:[%s10835_s7 + $0x30] sm:$0xff]   ;;  %v8081_v43 = vld [vmem:[%s10835_s7 + $0x38] sm:$0xff]  }
 0x9a8   :  { %v5049_v18 = vpop.f32.mrb[100].mxu0 }
 0x9a9   :  { %v5050_v54 = vadd.f32 %v5049_v18, %v5000_v3  ;;  %v7487_v27 = vpop.f32.mrb[101].mxu0 }
 0x9aa   :  { %v5052_v50 = vpop.f32.mrb[102].mxu0 }
 0x9ab   :  { %v5058_v17 = vmin.f32 %v5050_v54, 0.0  ;;  %v7488_v22 = vpop.f32.mrb[103].mxu0  ;;  %vm5056_vm0 = vcmp.gt.f32.partialorder %v5050_v54, 0.0  ;;  %v5053_v57 = vadd.f32 %v5052_v50, %v5005_v56  ;;  %v5560_v56 = vld [vmem:[%s10834_s6] sm:$0x7] }
 0x9ad   :  { %v5060_v11 = vmul.f32 1.442695, %v5058_v17  ;;  %v5059_v20 = vmin.f32 %v5053_v57, 0.0  ;;  %vm5057_vm10 = vcmp.gt.f32.partialorder %v5053_v57, 0.0 }
 0x9af   :  { %8238 = vpow2.f32 %v5060_v11  ;;  %v5062_v24 = vmul.f32 1.442695, %v5059_v20 }
 0x9b1   :  { %8240 = vpow2.f32 %v5062_v24 }
 0x9b9   :  { %v8239_v44 = vpop.eup %8238 }
 0x9ba   :  { %v6769_v2 = vadd.f32 -1.0, %v8239_v44 }
 0x9bb   :  { %v8241_v13 = vpop.eup %8240 }
 0x9bc   :  { %v5066_v1 = vsel %vm5056_vm0, %v5050_v54, %v6769_v2  ;;  %v6770_v12 = vadd.f32 -1.0, %v8241_v13 }
 0x9bd   :  { %v5068_v14 = vpack.c.bf16 %v5066_v1, %v5066_v1  ;;  %v10908_v1 = vld [vmem:[#allocation5_spill] sm:$0xff] }
 0x9be   :  { %v5067_v53 = vsel %vm5057_vm10, %v5053_v57, %v6770_v12 }
 0x9bf   :  { %5263 = vmatmul.mubr.bf16.vlgmr.msra.gmra.mrb[104].mxu1 %v5068_v14  ;;  %7506 = vmatmul.mubr.bf16.vlgmr.msra.gmra.mrb[104].mxu0 %v5068_v14  ;;  %v5314_v62 = vpack.c.bf16 %v5067_v53, %v5067_v53  ;;  %v10910_v14 = vsub.s32 2, %v10908_v1 }
 0x9c0   :  { %5477 = vmatpush1.bf16.msra.mxu1 %v8033_v23  ;;  %7510 = vmatpush3.bf16.msra.mxu0 %v8036_v35  ;;  %v10909_v23 = vsub.s32 0, %v10908_v1 }
 0x9c1   :  { %5478 = vmatprep.subr.bf16.mxu1 %v8039_v30  ;;  %7511 = vmatprep.subr.bf16.mxu0 %v10870_v6  ;;  %v10911_v30 = vsub.s32 1, %v10908_v1 }
 0x9c2   :  { %5508 = vmatprep.mubr.bf16.mxu1 %v10871_v48  ;;  %7525 = vmatprep.mubr.msk.bf16.mxu0 %vm8278_vm1, %v10870_v6  ;;  %v8047_v48 = vld [vmem:[%s10833_s5 + $0xb8c] ss:$12 sps:$4 sm:$0xff]   ;;  %v5565_v35 = vrot.slane %v5560_v56, %v10909_v23 }
 0x9c4   :  { %5479 = vmatpush1.bf16.msra.mxu1 %v8037_v59  ;;  %7512 = vmatpush3.bf16.msra.mxu0 %v8040_v9  ;;  %v5569_v59 = vrot.slane %v5560_v56, %v10911_v30 }
 0x9c5   :  { %5480 = vmatprep.subr.bf16.mxu1 %v8043_v45  ;;  %7513 = vmatprep.subr.bf16.mxu0 %v10870_v6 }
 0x9c8   :  { %5481 = vmatpush1.bf16.msra.mxu1 %v8041_v19  ;;  %7514 = vmatpush3.bf16.msra.mxu0 %v8044_v21 }
 0x9c9   :  { %5482 = vmatprep.subr.bf16.mxu1 %v8047_v48  ;;  %7515 = vmatprep.subr.bf16.mxu0 %v10870_v6 }
 0x9cc   :  { %5483 = vmatpush1.bf16.msra.mxu1 %v8045_v61  ;;  %7516 = vmatpush3.bf16.msra.mxu0 %v8048_v55 }
 0x9cd   :  { %5484 = vmatprep.subr.bf16.mxu1 %v8051_v15  ;;  %7517 = vmatprep.subr.bf16.mxu0 %v10870_v6 }
 0x9d0   :  { %5485 = vmatpush1.bf16.msra.mxu1 %v8049_v31  ;;  %7518 = vmatpush3.bf16.msra.mxu0 %v8052_v29 }
 0x9d1   :  { %5486 = vmatprep.subr.bf16.mxu1 %v8055_v37  ;;  %7519 = vmatprep.subr.bf16.mxu0 %v10870_v6 }
 0x9d4   :  { %5487 = vmatpush1.bf16.msra.mxu1 %v8053_v38  ;;  %7520 = vmatpush3.bf16.msra.mxu0 %v8056_v10 }
 0x9d5   :  { %5488 = vmatprep.subr.bf16.mxu1 %v8059_v41  ;;  %7521 = vmatprep.subr.bf16.mxu0 %v10870_v6 }
 0x9d8   :  { %5489 = vmatpush1.bf16.msra.mxu1 %v8057_v47  ;;  %7522 = vmatpush3.bf16.msra.mxu0 %v8060_v63 }
 0x9d9   :  { %5490 = vmatprep.subr.bf16.mxu1 %v8063_v60  ;;  %7523 = vmatprep.subr.bf16.mxu0 %v10870_v6 }
 0x9dc   :  { %5491 = vmatpush1.bf16.msra.mxu1 %v8061_v58  ;;  %7524 = vmatpush3.bf16.msra.mxu0 %v8064_v8 }
 0x9dd   :  { %7529 = vmatprep.subr.bf16.mxu0 %v10870_v6  ;;  %7089 = vmatprep.subr.bf16.mxu1 %v8065_v52 }
 0x9df   :  { %5509 = vmatmul.mubr.bf16.vlgmr.msra.gmra.mrb[108].mxu1 %v5314_v62  ;;  %7526 = vmatmul.mubr.bf16.vlgmr.msra.gmra.mrb[108].mxu0 %v5314_v62 }
 0x9e0   :  { %7531 = vmatprep.mubr.msk.bf16.mxu0 %vm8278_vm1, %v10870_v6  ;;  %7090 = vmatpush3.bf16.msra.mxu1 %v8066_v0  ;;  %v8069_v6 = vld [vmem:[%s10835_s7 + $0x50] sm:$0xff]  }
 0x9e1   :  { %7091 = vmatprep.subr.bf16.mxu1 %v8067_v49  ;;  %7530 = vmatpush3.bf16.msra.mxu0 %v8079_v40 }
 0x9e4   :  { %7092 = vmatpush3.bf16.msra.mxu1 %v8068_v36 }
 0x9e5   :  { %7093 = vmatprep.subr.bf16.mxu1 %v8069_v6 }
 0x9e8   :  { %7094 = vmatpush3.bf16.msra.mxu1 %v8070_v51 }
 0x9e9   :  { %7095 = vmatprep.subr.bf16.mxu1 %v8071_v4 }
 0x9ec   :  { %7096 = vmatpush3.bf16.msra.mxu1 %v8072_v7 }
 0x9ed   :  { %7097 = vmatprep.subr.bf16.mxu1 %v8073_v32  ;;  %v6886_v32 = vld [vmem:[%s10836_s8] ss:$0 sm:$0xff] }
 0x9f0   :  { %7098 = vmatpush3.bf16.msra.mxu1 %v8074_v25 }
 0x9f1   :  { %7099 = vmatprep.subr.bf16.mxu1 %v8075_v34 }
 0x9f4   :  { %7100 = vmatpush3.bf16.msra.mxu1 %v8076_v26 }
 0x9f5   :  { %7101 = vmatprep.subr.bf16.mxu1 %v8077_v5 }
 0x9f8   :  { %7102 = vmatpush3.bf16.msra.mxu1 %v8078_v28 }
 0x9f9   :  { %7103 = vmatprep.subr.bf16.mxu1 %v8080_v16 }
 0x9fc   :  { %7104 = vmatpush3.bf16.msra.mxu1 %v8081_v43 }
 0xa92   :  { %v5264_v46 = vpop.f32.mrb[104].mxu1  ;;  %v5305_v3 = vpop.f32.mrb[104].mxu0 }
 0xa93   :  { %v5311_v18 = vadd.f32 %v5264_v46, %v10662_v39  ;;  %v5313_v54 = vadd.f32 %v5305_v3, %v10664_v42  ;;  %v5266_v27 = vpop.f32.mrb[105].mxu1  ;;  %v7507_v50 = vpop.f32.mrb[105].mxu0  ;;  %v5573_v39 = vrot.slane %v5560_v56, %v10910_v14 }
 0xa94   :  { %v5312_v17 = vadd.f32 %v5266_v27, %v10666_v33  ;;  %v5268_v22 = vpop.f32.mrb[106].mxu1  ;;  %v5308_v11 = vpop.f32.mrb[106].mxu0 }
 0xa95   :  { %v5269_v44 = vpop.f32.mrb[107].mxu1  ;;  %v7508_v2 = vpop.f32.mrb[107].mxu0 }
 0xab2   :  { %v5510_v57 = vpop.f32.mrb[108].mxu1  ;;  %v5551_v42 = vpop.f32.mrb[108].mxu0 }
 0xab3   :  { %v5557_v33 = vadd.f32 %v5510_v57, %v5311_v18  ;;  %v5559_v9 = vadd.f32 %v5551_v42, %v5313_v54  ;;  %v5512_v20 = vpop.f32.mrb[109].mxu1  ;;  %v7527_v45 = vpop.f32.mrb[109].mxu0 }
 0xab4   :  { %v5558_v19 = vadd.f32 %v5512_v20, %v5312_v17  ;;  %v5514_v21 = vpop.f32.mrb[110].mxu1  ;;  %v5554_v24 = vpop.f32.mrb[110].mxu0 }
 0xab5   :  { %v5577_v48 = vadd.f32 %v5565_v35, %v5557_v33  ;;  %v5579_v61 = vadd.f32 %v5573_v39, %v5559_v9  ;;  %v5515_v55 = vpop.f32.mrb[111].mxu1  ;;  %v7528_v15 = vpop.f32.mrb[111].mxu0 }
 0xab6   :  { %v5578_v31 = vadd.f32 %v5569_v59, %v5558_v19 }
 0xab7   :  { %v5583_v29 = vmin.f32 %v5577_v48, 0.0  ;;  %v5585_v37 = vmin.f32 %v5579_v61, 0.0  ;;  %vm5580_vm1 = vcmp.gt.f32.partialorder %v5577_v48, 0.0  ;;  %vm5582_vm11 = vcmp.gt.f32.partialorder %v5579_v61, 0.0 }
 0xab8   :  { %v5584_v38 = vmin.f32 %v5578_v31, 0.0  ;;  %vm5581_vm13 = vcmp.gt.f32.partialorder %v5578_v31, 0.0 }
 0xab9   :  { %v5586_v10 = vmul.f32 1.442695, %v5583_v29  ;;  %v5590_v41 = vmul.f32 1.442695, %v5585_v37 }
 0xaba   :  { %v5588_v13 = vmul.f32 1.442695, %v5584_v38 }
 0xabb   :  { %8242 = vpow2.f32 %v5586_v10 }
 0xabc   :  { %8244 = vpow2.f32 %v5590_v41 }
 0xabd   :  { %8246 = vpow2.f32 %v5588_v13 }
 0xac5   :  { %v8243_v47 = vpop.eup %8242 }
 0xac6   :  { %v8245_v63 = vpop.eup %8244  ;;  %v6883_v60 = vadd.f32 -1.0, %v8243_v47 }
 0xac7   :  { %v8247_v12 = vpop.eup %8246  ;;  %v6885_v58 = vadd.f32 -1.0, %v8245_v63 }
 0xac8   :  { %v6884_v8 = vadd.f32 -1.0, %v8247_v12  ;;  %v5595_v53 = vsel %vm5580_vm1, %v5577_v48, %v6883_v60 }
 0xac9   :  { %v5597_v62 = vsel %vm5582_vm11, %v5579_v61, %v6885_v58  ;;  %v5598_v36 = vpack.c.bf16 %v5595_v53, %v5595_v53 }
 0xaca   :  { %v5600_v52 = vpack.c.bf16 %v5597_v62, %v5597_v62  ;;  %v5596_v0 = vsel %vm5581_vm13, %v5578_v31, %v6884_v8 }
 0xacb   :  { %v5599_v49 = vpack.c.bf16 %v5596_v0, %v5596_v0 }
 0xacc   :  { %7532 = vmatmul.mubr.msk.bf16.vlgmr.msra.gmra.mrb[112].mxu0 %vm5744_vm12, %v5600_v52 }
 0xacd   :  { %5780 = vmatprep.mubr.bf16.mxu1 %v5599_v49 }
 0xace   :  { %5781 = vmatmul.mubr.bf16.vlgmr.msra.gmra.mrb[112].mxu1 %v5598_v36 }
 0xb9f   :  { %v5822_v6 = vpop.f32.mrb[112].mxu0 }
 0xba0   :  { %v7533_v51 = vpop.f32.mrb[113].mxu0 }
 0xba1   :  { %v7105_v4 = vpop.f32.mrb[112].mxu1  ;;  %v5825_v7 = vpop.f32.mrb[114].mxu0 }
 0xba2   :  { %v7106_v25 = vpop.f32.mrb[113].mxu1  ;;  %v7534_v34 = vpop.f32.mrb[115].mxu0 }
 0xba3   :  { %v7107_v26 = vadd.f32 %v7106_v25, %v7105_v4  ;;  %v7108_v5 = vpop.f32.mrb[114].mxu1 }
 0xba4   :  { %v7109_v28 = vpop.f32.mrb[115].mxu1 }
 0xba5   :  { %v5783_v40 = vadd.f32 %v7107_v26, %v6886_v32 }
 0xba7   :  { %v5823_v16 = vadd.f32 %v5822_v6, %v5783_v40 }
 0xba9   :  { %5828 = vst [vmem:[#allocation2] sm:$0xff] %v5823_v16 }
 0xbaa   :  { %8263 = shalt.err (!%p8260_p4)
}
 0xbab   :  { %s8264_s3 = scalar_lea.hbm %s10837_s9, 128 }
 0xbac   :  { %p8265_p5 = scmp.ne.s32.totalorder %s10837_s9, %s8264_s3  ;;  %p8268_p6 = scmp.lt.u32.totalorder %s8264_s3, %s10837_s9 }
 0xbae   :  { %p8270_p7 = pnand %p8268_p6, %p8265_p5 }
 0xbb0   :  { %8273 = shalt.err (!%p8270_p7)
}
 0xbb1   :  { %5838 = dma.vmem_to_hbm [thread:$0]  %s5836_s27, 128, %s10837_s9, [#allocation3]  }
 0xbb2   :  { %8274 = dma.done.wait [#allocation3], 128  }
 0xbb3   :  { %8275 = vsyncadd [#allocation3], 4294967168 }
 0xbb4   :  { %5842 = vsyncpa [#allocation3], 1 }

</bundles_post_ra>
